<compile_context>
chip_gen: v6e
topology: v6e:2x2x1
jax: 0.10.0
libtpu: 0.0.40
codegen_flags: <defaults>
</compile_context>

<pallas_src>
import functools

import jax
import jax.numpy as jnp
from jax.experimental import pallas as pl
from jax.experimental.pallas import tpu as pltpu


# --------------------------- in-kernel helpers ----------------------------- #

def _ln(x, g, b, eps):
    mu = jnp.mean(x, axis=-1, keepdims=True)
    xc = x - mu
    var = jnp.mean(xc * xc, axis=-1, keepdims=True)
    return xc * jax.lax.rsqrt(var + eps) * g + b


def _gelu_tanh(x):
    # TODO(synk): exact erf-GELU of nn.GELU approximated with the tanh form (erf lowering
    # inside Mosaic is not guaranteed); expect ~1e-3-level deviation from PyTorch.
    c = 0.7978845608028654  # sqrt(2/pi)
    return 0.5 * x * (1.0 + jnp.tanh(c * (x + 0.044715 * x * x * x)))


_BLOCK_KEYS = ("ln1_g", "ln1_b", "q_w", "q_b", "k_w", "k_b", "v_w", "v_b",
               "proj_w", "proj_b", "ln2_g", "ln2_b",
               "fc1_w", "fc1_b", "fc2_w", "fc2_b")


# ----------------- fused encoder (patch embed + all blocks) ----------------- #

def _encoder_kernel(patch_ref, pe_w_ref, add_ref, bias_ref,
                    ln1g_ref, ln1b_ref, qw_ref, qb_ref, kw_ref, kb_ref,
                    vw_ref, vb_ref, pw_ref, pb_ref, ln2g_ref, ln2b_ref,
                    f1w_ref, f1b_ref, f2w_ref, f2b_ref,
                    o_ref, attn_ref, *, n_heads, d_head, eps):
    f32, bf16 = jnp.float32, jnp.bfloat16

    # -- depth step 0: patch-embed + cls token + pos-embed + pad, all fused ---
    @pl.when(pl.program_id(1) == 0)
    def _():
        o_ref[0] = (jnp.dot(patch_ref[0].astype(bf16), pe_w_ref[...],
                            preferred_element_type=f32) + add_ref[...])

    x = o_ref[0]                                     # (S_pad, D) f32 residual, VMEM-resident

    # -- attention: LN1 -> Q/K/V -> per-head softmax -> single K=D output proj --
    h = _ln(x, ln1g_ref[0], ln1b_ref[0], eps).astype(bf16)
    q = jnp.dot(h, qw_ref[0], preferred_element_type=f32) + qb_ref[0]   # scale pre-folded
    k = jnp.dot(h, kw_ref[0], preferred_element_type=f32) + kb_ref[0]
    v = jnp.dot(h, vw_ref[0], preferred_element_type=f32) + vb_ref[0]
    bias = bias_ref[...]                             # (1, S_pad): 0 valid / -1e30 pad keys
    for hh in range(n_heads):                        # tiny, fully unrolled
        lo = hh * d_head
        s = jax.lax.dot_general(q[:, lo:lo + d_head].astype(bf16),
                                k[:, lo:lo + d_head].astype(bf16),
                                (((1,), (1,)), ((), ())),
                                preferred_element_type=f32) + bias
        s = s - jnp.max(s, axis=-1, keepdims=True)
        e = jnp.exp(s)
        p = e / jnp.sum(e, axis=-1, keepdims=True)
        attn_ref[:, lo:lo + d_head] = jnp.dot(
            p.astype(bf16), v[:, lo:lo + d_head].astype(bf16),
            preferred_element_type=f32)
    x = x + jnp.dot(attn_ref[...].astype(bf16), pw_ref[0],
                    preferred_element_type=f32) + pb_ref[0]

    # -- MLP: LN2 -> FC1 -> GELU -> FC2 ---------------------------------------
    h = _ln(x, ln2g_ref[0], ln2b_ref[0], eps).astype(bf16)
    h = jnp.dot(h, f1w_ref[0], preferred_element_type=f32) + f1b_ref[0]
    h = _gelu_tanh(h).astype(bf16)
    x = x + jnp.dot(h, f2w_ref[0], preferred_element_type=f32) + f2b_ref[0]
    o_ref[0] = x


def encoder_forward(patch_pad, p, cfg, eps=1e-6):
    B, S_pad, CPP = patch_pad.shape
    D, nH = cfg["dim"], cfg["heads"]
    bs = p["blocks_stacked"]
    depth = bs["q_w"].shape[0]

    def const_spec(arr):
        return pl.BlockSpec(arr.shape, lambda b, d: (0, 0))

    def block_spec(arr):
        return pl.BlockSpec((1,) + arr.shape[1:], lambda b, d: (d, 0, 0))

    in_specs = ([pl.BlockSpec((1, S_pad, CPP), lambda b, d: (b, 0, 0)),
                 const_spec(p["pe_w"]), const_spec(p["add_mat"]),
                 const_spec(p["attn_bias"])]
                + [block_spec(bs[key]) for key in _BLOCK_KEYS])

    return pl.pallas_call(
        functools.partial(_encoder_kernel, n_heads=nH, d_head=D // nH, eps=eps),
        out_shape=jax.ShapeDtypeStruct((B, S_pad, D), jnp.float32),
        grid=(B, depth),
        in_specs=in_specs,
        out_specs=pl.BlockSpec((1, S_pad, D), lambda b, d: (b, 0, 0)),
        scratch_shapes=[pltpu.VMEM((S_pad, D), jnp.float32)],
        compiler_params=pltpu.CompilerParams(
            dimension_semantics=("parallel", "arbitrary")),
    )(patch_pad, p["pe_w"], p["add_mat"], p["attn_bias"],
      *[bs[key] for key in _BLOCK_KEYS])


# ---------------- fused decoder (LN + 4 deconvs + 1x1 head) ----------------- #

def _decoder_kernel(x_ref, g_ref, bln_ref, *rest, eps):
    f32, bf16 = jnp.float32, jnp.bfloat16
    o_ref = rest[-1]
    stages = rest[:-1]                       # (w0,b0, w1,b1, w2,b2, w3,b3, wh,bh)
    y = _ln(x_ref[...], g_ref[...], bln_ref[...], eps).astype(bf16)
    n_pairs = len(stages) // 2
    for i in range(n_pairs - 1):             # ConvTranspose(k=2,s=2) stages + ReLU
        w, b = stages[2 * i], stages[2 * i + 1]
        y = jnp.maximum(jnp.dot(y, w[...], preferred_element_type=f32) + b[...],
                        0.0).astype(bf16)
    wh, bh = stages[-2], stages[-1]          # 1x1 head conv (block-diagonal), no ReLU
    o_ref[...] = jnp.dot(y, wh[...], preferred_element_type=f32) + bh[...]


def decoder_forward(feat, p, eps=1e-6):
    M, D = feat.shape
    n_fin = p["head_w_bd"].shape[1]
    tm = M // 2 if (M % 2 == 0 and (M // 2) % 8 == 0) else M   # 2 parallel steps (v7x)
    nt = M // tm

    def const_spec(arr):
        return pl.BlockSpec(arr.shape, lambda i: (0, 0))

    args = [feat, p["norm_g"], p["norm_b"]]
    in_specs = [pl.BlockSpec((tm, D), lambda i: (i, 0)),
                const_spec(p["norm_g"]), const_spec(p["norm_b"])]
    for w, b in zip(p["dec_w"], p["dec_b"]):
        args += [w, b]
        in_specs += [const_spec(w), const_spec(b)]
    args += [p["head_w_bd"], p["head_b_bd"]]
    in_specs += [const_spec(p["head_w_bd"]), const_spec(p["head_b_bd"])]

    return pl.pallas_call(
        functools.partial(_decoder_kernel, eps=eps),
        out_shape=jax.ShapeDtypeStruct((M, n_fin), jnp.float32),
        grid=(nt,),
        in_specs=in_specs,
        out_specs=pl.BlockSpec((tm, n_fin), lambda i: (i, 0)),
        compiler_params=pltpu.CompilerParams(dimension_semantics=("parallel",)),
    )(*args)


# ------------------------------ model glue --------------------------------- #

def _randn(key, shape, scale=0.02):
    return scale * jax.random.normal(key, shape, jnp.float32)


def init_params(key, cfg):
    C, P, D = cfg["in_chans"], cfg["patch"], cfg["dim"]
    depth, mlp = cfg["depth"], cfg["mlp_ratio"]
    Hp = cfg["img"] // P
    S = 1 + Hp * Hp
    keys = iter(jax.random.split(key, 64))
    p = {
        "pe_w": _randn(next(keys), (D, C, P, P)),
        "pe_b": _randn(next(keys), (D,)),
        "cls": _randn(next(keys), (1, 1, D)),
        "pos": _randn(next(keys), (1, S, D)),
        "blocks": [],
        "norm_g": jnp.ones((D,), jnp.float32),
        "norm_b": jnp.zeros((D,), jnp.float32),
    }
    for _ in range(depth):
        p["blocks"].append(dict(
            ln1_g=jnp.ones((D,), jnp.float32), ln1_b=jnp.zeros((D,), jnp.float32),
            qkv_w=_randn(next(keys), (D, 3 * D)), qkv_b=_randn(next(keys), (3 * D,)),
            proj_w=_randn(next(keys), (D, D)), proj_b=_randn(next(keys), (D,)),
            ln2_g=jnp.ones((D,), jnp.float32), ln2_b=jnp.zeros((D,), jnp.float32),
            fc1_w=_randn(next(keys), (D, mlp * D)), fc1_b=_randn(next(keys), (mlp * D,)),
            fc2_w=_randn(next(keys), (mlp * D, D)), fc2_b=_randn(next(keys), (D,)),
        ))
    chans = [D] + list(cfg["dec_channels"])
    p["deconv"] = []
    for cin, cout in zip(chans[:-1], chans[1:]):
        p["deconv"].append((_randn(next(keys), (cin, cout, 2, 2)),
                            _randn(next(keys), (cout,))))
    p["head_w"] = _randn(next(keys), (1, chans[-1], 1, 1))
    p["head_b"] = _randn(next(keys), (1,))
    return p


def _deconv_stage_mat(wt, bt, n_pos):
    """ConvTranspose2d(k=2,s=2) at `n_pos` independent patch positions as one
    block-diagonal matmul.  Input cols (pos, cin); output cols (pos, kh, kw, cout)."""
    cin, cout = wt.shape[0], wt.shape[1]
    m = jnp.transpose(wt, (0, 2, 3, 1)).reshape(cin, 4 * cout)   # cols (kh, kw, cout)
    eye = jnp.eye(n_pos, dtype=jnp.float32)
    bd = (eye[:, None, :, None] * m[None, :, None, :]).reshape(n_pos * cin,
                                                               n_pos * 4 * cout)
    bias = jnp.tile(jnp.tile(bt, 4), n_pos).reshape(1, n_pos * 4 * cout)
    return bd.astype(jnp.bfloat16), bias.astype(jnp.float32)


def prepare_params(raw, cfg):
    """One-time re-layout: stacked bf16 block weights, fused embed add-matrix,
    block-diagonal lane-dense decoder matrices."""
    C, P, D = cfg["in_chans"], cfg["patch"], cfg["dim"]
    nH = cfg["heads"]
    Hp = cfg["img"] // P
    Np = Hp * Hp
    S = 1 + Np
    S_pad = ((S + 7) // 8) * 8
    d_head = D // nH
    scale = d_head ** -0.5
    bf16, f32 = jnp.bfloat16, jnp.float32

    p = {"pe_w": raw["pe_w"].reshape(D, C * P * P).T.astype(bf16)}

    # additive matrix: row0 = cls + pos0, rows 1..Np = pe_b + pos, pad rows = 0
    pos = raw["pos"][0]
    add = jnp.zeros((S_pad, D), f32)
    add = add.at[0].set(raw["cls"][0, 0] + pos[0])
    add = add.at[1:S].set(pos[1:] + raw["pe_b"][None, :])
    p["add_mat"] = add
    p["attn_bias"] = jnp.where(jnp.arange(S_pad) < S, 0.0,
                               -1e30).reshape(1, S_pad).astype(f32)

    def stack(fn):
        return jnp.stack([fn(b) for b in raw["blocks"]], axis=0)

    bs = {
        "ln1_g": stack(lambda b: b["ln1_g"].reshape(1, D)).astype(f32),
        "ln1_b": stack(lambda b: b["ln1_b"].reshape(1, D)).astype(f32),
        "q_w": stack(lambda b: b["qkv_w"][:, :D] * scale).astype(bf16),
        "q_b": stack(lambda b: (b["qkv_b"][:D] * scale).reshape(1, D)).astype(f32),
        "k_w": stack(lambda b: b["qkv_w"][:, D:2 * D]).astype(bf16),
        "k_b": stack(lambda b: b["qkv_b"][D:2 * D].reshape(1, D)).astype(f32),
        "v_w": stack(lambda b: b["qkv_w"][:, 2 * D:]).astype(bf16),
        "v_b": stack(lambda b: b["qkv_b"][2 * D:].reshape(1, D)).astype(f32),
        "proj_w": stack(lambda b: b["proj_w"]).astype(bf16),
        "proj_b": stack(lambda b: b["proj_b"].reshape(1, D)).astype(f32),
        "ln2_g": stack(lambda b: b["ln2_g"].reshape(1, D)).astype(f32),
        "ln2_b": stack(lambda b: b["ln2_b"].reshape(1, D)).astype(f32),
        "fc1_w": stack(lambda b: b["fc1_w"]).astype(bf16),
        "fc1_b": stack(lambda b: b["fc1_b"].reshape(1, -1)).astype(f32),
        "fc2_w": stack(lambda b: b["fc2_w"]).astype(bf16),
        "fc2_b": stack(lambda b: b["fc2_b"].reshape(1, D)).astype(f32),
    }
    p["blocks_stacked"] = bs

    p["norm_g"] = raw["norm_g"].reshape(1, D).astype(f32)
    p["norm_b"] = raw["norm_b"].reshape(1, D).astype(f32)

    # decoder: block-diagonal per-patch matrices (lane-dense at every stage)
    dec_w, dec_b = [], []
    n_pos = 1
    for wt, bt in raw["deconv"]:
        w_bd, b_bd = _deconv_stage_mat(wt, bt, n_pos)
        dec_w.append(w_bd)
        dec_b.append(b_bd)
        n_pos *= 4
    p["dec_w"], p["dec_b"] = dec_w, dec_b

    c_last = raw["head_w"].shape[1]
    hw = raw["head_w"].reshape(c_last).astype(f32)
    p["head_w_bd"] = (jnp.eye(n_pos, dtype=f32)[:, None, :] * hw[None, :, None]) \
        .reshape(n_pos * c_last, n_pos).astype(bf16)
    p["head_b_bd"] = jnp.broadcast_to(raw["head_b"].reshape(1, 1), (1, n_pos)).astype(f32)
    return p


def vit_forward(x, p, cfg):
    B, C, H, W = x.shape
    P, D = cfg["patch"], cfg["dim"]
    Hp, Wp = H // P, W // P
    Np = Hp * Wp
    S_pad = p["add_mat"].shape[0]

    # patch extraction (XLA glue) already laid out in the padded (B, S_pad, .) frame:
    # row 0 is the cls slot, rows 1..Np hold the patches, trailing rows are padding.
    patches = (x.reshape(B, C, Hp, P, Wp, P)
                 .transpose(0, 2, 4, 1, 3, 5)
                 .reshape(B, Np, C * P * P))
    patch_pad = jnp.pad(patches, ((0, 0), (1, S_pad - 1 - Np), (0, 0)))

    # encoder: patch-embed + every transformer block in ONE pallas_call
    xseq = encoder_forward(patch_pad, p, cfg)                  # (B, S_pad, D)

    # drop cls + padding; the final encoder LayerNorm is fused into the decoder
    feat = xseq[:, 1:1 + Np, :].reshape(B * Np, D)

    # decoder: LN + 4x ConvTranspose(k=2,s=2)+ReLU + 1x1 head in ONE pallas_call
    dec = decoder_forward(feat, p)                             # (B*Np, 4**n_stages)

    # Morton (quad-tree) de-interleave back to NCHW — single cheap XLA transpose
    ns = len(p["dec_w"])
    f = 2 ** ns
    out = dec.reshape((B, Hp, Wp) + (2, 2) * ns)
    perm = ((0, 1) + tuple(3 + 2 * i for i in range(ns))
            + (2,) + tuple(4 + 2 * i for i in range(ns)))
    return out.transpose(perm).reshape(B, 1, Hp * f, Wp * f)


# --------------------------------- main ------------------------------------ #

if __name__ == "__main__":
    cfg = dict(
        img=32, patch=8, in_chans=3,
        dim=64, heads=4, depth=2, mlp_ratio=4,
        dec_channels=(32, 16, 8, 4),   # scaled-down analog of 512/256/128/64
    )
    key = jax.random.PRNGKey(0)
    k_x, k_p = jax.random.split(key)
    raw_params = init_params(k_p, cfg)
    params = prepare_params(raw_params, cfg)
    x = jax.random.normal(k_x, (2, cfg["in_chans"], cfg["img"], cfg["img"]), jnp.float32)

    fwd = jax.jit(functools.partial(vit_forward, cfg=cfg))
    out = fwd(x, params)
    jax.block_until_ready(out)
    assert out.shape == (2, 1, 64, 64), out.shape
    print("KERNEL_OK")
</pallas_src>

<mosaic_0001>
module attributes {stable_mosaic.version = 11 : i64} {
  func.func @_encoder_kernel(%arg0: i32, %arg1: i32, %arg2: memref<1x24x192xf32, #tpu.memory_space<vmem>>, %arg3: memref<192x64xbf16, #tpu.memory_space<vmem>>, %arg4: memref<24x64xf32, #tpu.memory_space<vmem>>, %arg5: memref<1x24xf32, #tpu.memory_space<vmem>>, %arg6: memref<1x1x64xf32, #tpu.memory_space<vmem>>, %arg7: memref<1x1x64xf32, #tpu.memory_space<vmem>>, %arg8: memref<1x64x64xbf16, #tpu.memory_space<vmem>>, %arg9: memref<1x1x64xf32, #tpu.memory_space<vmem>>, %arg10: memref<1x64x64xbf16, #tpu.memory_space<vmem>>, %arg11: memref<1x1x64xf32, #tpu.memory_space<vmem>>, %arg12: memref<1x64x64xbf16, #tpu.memory_space<vmem>>, %arg13: memref<1x1x64xf32, #tpu.memory_space<vmem>>, %arg14: memref<1x64x64xbf16, #tpu.memory_space<vmem>>, %arg15: memref<1x1x64xf32, #tpu.memory_space<vmem>>, %arg16: memref<1x1x64xf32, #tpu.memory_space<vmem>>, %arg17: memref<1x1x64xf32, #tpu.memory_space<vmem>>, %arg18: memref<1x64x256xbf16, #tpu.memory_space<vmem>>, %arg19: memref<1x1x256xf32, #tpu.memory_space<vmem>>, %arg20: memref<1x256x64xbf16, #tpu.memory_space<vmem>>, %arg21: memref<1x1x64xf32, #tpu.memory_space<vmem>>, %arg22: memref<1x24x64xf32, #tpu.memory_space<vmem>>, %arg23: memref<24x64xf32, #tpu.memory_space<vmem>>) attributes {dimension_semantics = [#tpu.dimension_semantics<parallel>, #tpu.dimension_semantics<arbitrary>], iteration_bounds = array<i64: 2, 2>, scalar_prefetch = 0 : i64, scratch_operands = 1 : i64, tpu.core_type = #tpu.core_type<tc>, window_params = [{transform_indices = @transform_0, window_bounds = array<i64: 1, 24, 192>}, {pipeline_mode = #tpu.pipeline_mode<synchronous>, transform_indices = @transform_1, window_bounds = array<i64: 192, 64>}, {pipeline_mode = #tpu.pipeline_mode<synchronous>, transform_indices = @transform_2, window_bounds = array<i64: 24, 64>}, {pipeline_mode = #tpu.pipeline_mode<synchronous>, transform_indices = @transform_3, window_bounds = array<i64: 1, 24>}, {transform_indices = @transform_4, window_bounds = array<i64: 1, 1, 64>}, {transform_indices = @transform_5, window_bounds = array<i64: 1, 1, 64>}, {transform_indices = @transform_6, window_bounds = array<i64: 1, 64, 64>}, {transform_indices = @transform_7, window_bounds = array<i64: 1, 1, 64>}, {transform_indices = @transform_8, window_bounds = array<i64: 1, 64, 64>}, {transform_indices = @transform_9, window_bounds = array<i64: 1, 1, 64>}, {transform_indices = @transform_10, window_bounds = array<i64: 1, 64, 64>}, {transform_indices = @transform_11, window_bounds = array<i64: 1, 1, 64>}, {transform_indices = @transform_12, window_bounds = array<i64: 1, 64, 64>}, {transform_indices = @transform_13, window_bounds = array<i64: 1, 1, 64>}, {transform_indices = @transform_14, window_bounds = array<i64: 1, 1, 64>}, {transform_indices = @transform_15, window_bounds = array<i64: 1, 1, 64>}, {transform_indices = @transform_16, window_bounds = array<i64: 1, 64, 256>}, {transform_indices = @transform_17, window_bounds = array<i64: 1, 1, 256>}, {transform_indices = @transform_18, window_bounds = array<i64: 1, 256, 64>}, {transform_indices = @transform_19, window_bounds = array<i64: 1, 1, 64>}, {transform_indices = @transform_20, window_bounds = array<i64: 1, 24, 64>}]} {
    %c0_i32 = arith.constant 0 : i32
    %0 = arith.cmpi eq, %arg1, %c0_i32 : i32
    %1 = arith.extui %0 : i1 to i32
    %c0_i32_0 = arith.constant 0 : i32
    %2 = arith.cmpi ne, %1, %c0_i32_0 : i32
    scf.if %2 {
      %c0_98 = arith.constant 0 : index
      %c0_99 = arith.constant 0 : index
      %c0_100 = arith.constant 0 : index
      %203 = vector.load %arg2[%c0_98, %c0_99, %c0_100] : memref<1x24x192xf32, #tpu.memory_space<vmem>>, vector<1x24x192xf32>
      %204 = vector.shape_cast %203 : vector<1x24x192xf32> to vector<24x192xf32>
      %205 = arith.truncf %204 : vector<24x192xf32> to vector<24x192xbf16>
      %c0_101 = arith.constant 0 : index
      %c0_102 = arith.constant 0 : index
      %206 = vector.load %arg3[%c0_101, %c0_102] : memref<192x64xbf16, #tpu.memory_space<vmem>>, vector<192x64xbf16>
      %cst_103 = arith.constant dense<0.000000e+00> : vector<24x64xf32>
      %207 = tpu.matmul %205, %206, %cst_103 {dimension_numbers = #tpu.dot_dimension_numbers<[1], [0], [0], [1], [0, 0, 1, 1], [], []>} : vector<24x192xbf16>, vector<192x64xbf16>, vector<24x64xf32> -> vector<24x64xf32>
      %c0_104 = arith.constant 0 : index
      %c0_105 = arith.constant 0 : index
      %208 = vector.load %arg4[%c0_104, %c0_105] : memref<24x64xf32, #tpu.memory_space<vmem>>, vector<24x64xf32>
      %209 = arith.addf %207, %208 : vector<24x64xf32>
      %c0_106 = arith.constant 0 : index
      %c0_107 = arith.constant 0 : index
      %c0_108 = arith.constant 0 : index
      %210 = vector.load %arg22[%c0_106, %c0_107, %c0_108] : memref<1x24x64xf32, #tpu.memory_space<vmem>>, vector<1x24x64xf32>
      %211 = vector.shape_cast %210 : vector<1x24x64xf32> to vector<24x64xf32>
      %212 = vector.shape_cast %209 : vector<24x64xf32> to vector<1x24x64xf32>
      tpu.vector_store %arg22[%c0_106, %c0_107, %c0_108], %212 {strides = array<i32>} : memref<1x24x64xf32, #tpu.memory_space<vmem>>, vector<1x24x64xf32>,
    } else {
    }
    %c0 = arith.constant 0 : index
    %c0_1 = arith.constant 0 : index
    %c0_2 = arith.constant 0 : index
    %3 = vector.load %arg22[%c0, %c0_1, %c0_2] : memref<1x24x64xf32, #tpu.memory_space<vmem>>, vector<1x24x64xf32>
    %4 = vector.shape_cast %3 : vector<1x24x64xf32> to vector<24x64xf32>
    %c0_3 = arith.constant 0 : index
    %c0_4 = arith.constant 0 : index
    %c0_5 = arith.constant 0 : index
    %5 = vector.load %arg6[%c0_3, %c0_4, %c0_5] : memref<1x1x64xf32, #tpu.memory_space<vmem>>, vector<1x1x64xf32>
    %6 = vector.shape_cast %5 : vector<1x1x64xf32> to vector<1x64xf32>
    %c0_6 = arith.constant 0 : index
    %c0_7 = arith.constant 0 : index
    %c0_8 = arith.constant 0 : index
    %7 = vector.load %arg7[%c0_6, %c0_7, %c0_8] : memref<1x1x64xf32, #tpu.memory_space<vmem>>, vector<1x1x64xf32>
    %8 = vector.shape_cast %7 : vector<1x1x64xf32> to vector<1x64xf32>
    %cst = arith.constant dense<0.000000e+00> : vector<24xf32>
    %9 = vector.multi_reduction <add>, %4, %cst [1] : vector<24x64xf32> to vector<24xf32>
    %10 = vector.shape_cast %9 : vector<24xf32> to vector<24x1xf32>
    %cst_9 = arith.constant 6.400000e+01 : f32
    %11 = vector.broadcast %cst_9 : f32 to vector<24x1xf32>
    %12 = arith.divf %10, %11 : vector<24x1xf32>
    %13 = vector.broadcast %12 : vector<24x1xf32> to vector<24x64xf32>
    %14 = arith.subf %4, %13 : vector<24x64xf32>
    %15 = arith.mulf %14, %14 : vector<24x64xf32>
    %cst_10 = arith.constant dense<0.000000e+00> : vector<24xf32>
    %16 = vector.multi_reduction <add>, %15, %cst_10 [1] : vector<24x64xf32> to vector<24xf32>
    %17 = vector.shape_cast %16 : vector<24xf32> to vector<24x1xf32>
    %cst_11 = arith.constant 6.400000e+01 : f32
    %18 = vector.broadcast %cst_11 : f32 to vector<24x1xf32>
    %19 = arith.divf %17, %18 : vector<24x1xf32>
    %cst_12 = arith.constant 9.99999997E-7 : f32
    %20 = vector.broadcast %cst_12 : f32 to vector<24x1xf32>
    %21 = arith.addf %19, %20 : vector<24x1xf32>
    %22 = math.rsqrt %21 : vector<24x1xf32>
    %23 = vector.broadcast %22 : vector<24x1xf32> to vector<24x64xf32>
    %24 = arith.mulf %14, %23 : vector<24x64xf32>
    %25 = vector.broadcast %6 : vector<1x64xf32> to vector<24x64xf32>
    %26 = arith.mulf %24, %25 : vector<24x64xf32>
    %27 = vector.broadcast %8 : vector<1x64xf32> to vector<24x64xf32>
    %28 = arith.addf %26, %27 : vector<24x64xf32>
    %29 = arith.truncf %28 : vector<24x64xf32> to vector<24x64xbf16>
    %c0_13 = arith.constant 0 : index
    %c0_14 = arith.constant 0 : index
    %c0_15 = arith.constant 0 : index
    %30 = vector.load %arg8[%c0_13, %c0_14, %c0_15] : memref<1x64x64xbf16, #tpu.memory_space<vmem>>, vector<1x64x64xbf16>
    %31 = vector.shape_cast %30 : vector<1x64x64xbf16> to vector<64x64xbf16>
    %cst_16 = arith.constant dense<0.000000e+00> : vector<24x64xf32>
    %32 = tpu.matmul %29, %31, %cst_16 {dimension_numbers = #tpu.dot_dimension_numbers<[1], [0], [0], [1], [0, 0, 1, 1], [], []>} : vector<24x64xbf16>, vector<64x64xbf16>, vector<24x64xf32> -> vector<24x64xf32>
    %c0_17 = arith.constant 0 : index
    %c0_18 = arith.constant 0 : index
    %c0_19 = arith.constant 0 : index
    %33 = vector.load %arg9[%c0_17, %c0_18, %c0_19] : memref<1x1x64xf32, #tpu.memory_space<vmem>>, vector<1x1x64xf32>
    %34 = vector.shape_cast %33 : vector<1x1x64xf32> to vector<1x64xf32>
    %35 = vector.broadcast %34 : vector<1x64xf32> to vector<24x64xf32>
    %36 = arith.addf %32, %35 : vector<24x64xf32>
    %c0_20 = arith.constant 0 : index
    %c0_21 = arith.constant 0 : index
    %c0_22 = arith.constant 0 : index
    %37 = vector.load %arg10[%c0_20, %c0_21, %c0_22] : memref<1x64x64xbf16, #tpu.memory_space<vmem>>, vector<1x64x64xbf16>
    %38 = vector.shape_cast %37 : vector<1x64x64xbf16> to vector<64x64xbf16>
    %cst_23 = arith.constant dense<0.000000e+00> : vector<24x64xf32>
    %39 = tpu.matmul %29, %38, %cst_23 {dimension_numbers = #tpu.dot_dimension_numbers<[1], [0], [0], [1], [0, 0, 1, 1], [], []>} : vector<24x64xbf16>, vector<64x64xbf16>, vector<24x64xf32> -> vector<24x64xf32>
    %c0_24 = arith.constant 0 : index
    %c0_25 = arith.constant 0 : index
    %c0_26 = arith.constant 0 : index
    %40 = vector.load %arg11[%c0_24, %c0_25, %c0_26] : memref<1x1x64xf32, #tpu.memory_space<vmem>>, vector<1x1x64xf32>
    %41 = vector.shape_cast %40 : vector<1x1x64xf32> to vector<1x64xf32>
    %42 = vector.broadcast %41 : vector<1x64xf32> to vector<24x64xf32>
    %43 = arith.addf %39, %42 : vector<24x64xf32>
    %c0_27 = arith.constant 0 : index
    %c0_28 = arith.constant 0 : index
    %c0_29 = arith.constant 0 : index
    %44 = vector.load %arg12[%c0_27, %c0_28, %c0_29] : memref<1x64x64xbf16, #tpu.memory_space<vmem>>, vector<1x64x64xbf16>
    %45 = vector.shape_cast %44 : vector<1x64x64xbf16> to vector<64x64xbf16>
    %cst_30 = arith.constant dense<0.000000e+00> : vector<24x64xf32>
    %46 = tpu.matmul %29, %45, %cst_30 {dimension_numbers = #tpu.dot_dimension_numbers<[1], [0], [0], [1], [0, 0, 1, 1], [], []>} : vector<24x64xbf16>, vector<64x64xbf16>, vector<24x64xf32> -> vector<24x64xf32>
    %c0_31 = arith.constant 0 : index
    %c0_32 = arith.constant 0 : index
    %c0_33 = arith.constant 0 : index
    %47 = vector.load %arg13[%c0_31, %c0_32, %c0_33] : memref<1x1x64xf32, #tpu.memory_space<vmem>>, vector<1x1x64xf32>
    %48 = vector.shape_cast %47 : vector<1x1x64xf32> to vector<1x64xf32>
    %49 = vector.broadcast %48 : vector<1x64xf32> to vector<24x64xf32>
    %50 = arith.addf %46, %49 : vector<24x64xf32>
    %c0_34 = arith.constant 0 : index
    %c0_35 = arith.constant 0 : index
    %51 = vector.load %arg5[%c0_34, %c0_35] : memref<1x24xf32, #tpu.memory_space<vmem>>, vector<1x24xf32>
    %52 = vector.extract_strided_slice %36 {offsets = [0, 0], sizes = [24, 16], strides = [1, 1]} : vector<24x64xf32> to vector<24x16xf32>
    %53 = arith.truncf %52 : vector<24x16xf32> to vector<24x16xbf16>
    %54 = vector.extract_strided_slice %43 {offsets = [0, 0], sizes = [24, 16], strides = [1, 1]} : vector<24x64xf32> to vector<24x16xf32>
    %55 = arith.truncf %54 : vector<24x16xf32> to vector<24x16xbf16>
    %cst_36 = arith.constant dense<0.000000e+00> : vector<24x24xf32>
    %56 = tpu.matmul %53, %55, %cst_36 {dimension_numbers = #tpu.dot_dimension_numbers<[1], [1], [0], [0], [0, 0, 1, 0], [], []>} : vector<24x16xbf16>, vector<24x16xbf16>, vector<24x24xf32> -> vector<24x24xf32>
    %57 = vector.broadcast %51 : vector<1x24xf32> to vector<24x24xf32>
    %58 = arith.addf %56, %57 : vector<24x24xf32>
    %cst_37 = arith.constant dense<0xFF800000> : vector<24xf32>
    %59 = vector.multi_reduction <maximumf>, %58, %cst_37 [1] : vector<24x24xf32> to vector<24xf32>
    %60 = vector.shape_cast %59 : vector<24xf32> to vector<24x1xf32>
    %61 = vector.broadcast %60 : vector<24x1xf32> to vector<24x24xf32>
    %62 = arith.subf %58, %61 : vector<24x24xf32>
    %63 = math.exp %62 : vector<24x24xf32>
    %cst_38 = arith.constant dense<0.000000e+00> : vector<24xf32>
    %64 = vector.multi_reduction <add>, %63, %cst_38 [1] : vector<24x24xf32> to vector<24xf32>
    %65 = vector.shape_cast %64 : vector<24xf32> to vector<24x1xf32>
    %66 = vector.broadcast %65 : vector<24x1xf32> to vector<24x24xf32>
    %67 = arith.divf %63, %66 : vector<24x24xf32>
    %68 = arith.truncf %67 : vector<24x24xf32> to vector<24x24xbf16>
    %69 = vector.extract_strided_slice %50 {offsets = [0, 0], sizes = [24, 16], strides = [1, 1]} : vector<24x64xf32> to vector<24x16xf32>
    %70 = arith.truncf %69 : vector<24x16xf32> to vector<24x16xbf16>
    %cst_39 = arith.constant dense<0.000000e+00> : vector<24x16xf32>
    %71 = tpu.matmul %68, %70, %cst_39 {dimension_numbers = #tpu.dot_dimension_numbers<[1], [0], [0], [1], [0, 0, 1, 1], [], []>} : vector<24x24xbf16>, vector<24x16xbf16>, vector<24x16xf32> -> vector<24x16xf32>
    %c0_40 = arith.constant 0 : index
    %c0_41 = arith.constant 0 : index
    %72 = vector.load %arg23[%c0_40, %c0_41] : memref<24x64xf32, #tpu.memory_space<vmem>>, vector<24x16xf32>
    tpu.vector_store %arg23[%c0_40, %c0_41], %71 {strides = array<i32>} : memref<24x64xf32, #tpu.memory_space<vmem>>, vector<24x16xf32>,
    %73 = vector.extract_strided_slice %36 {offsets = [0, 16], sizes = [24, 16], strides = [1, 1]} : vector<24x64xf32> to vector<24x16xf32>
    %74 = arith.truncf %73 : vector<24x16xf32> to vector<24x16xbf16>
    %75 = vector.extract_strided_slice %43 {offsets = [0, 16], sizes = [24, 16], strides = [1, 1]} : vector<24x64xf32> to vector<24x16xf32>
    %76 = arith.truncf %75 : vector<24x16xf32> to vector<24x16xbf16>
    %cst_42 = arith.constant dense<0.000000e+00> : vector<24x24xf32>
    %77 = tpu.matmul %74, %76, %cst_42 {dimension_numbers = #tpu.dot_dimension_numbers<[1], [1], [0], [0], [0, 0, 1, 0], [], []>} : vector<24x16xbf16>, vector<24x16xbf16>, vector<24x24xf32> -> vector<24x24xf32>
    %78 = vector.broadcast %51 : vector<1x24xf32> to vector<24x24xf32>
    %79 = arith.addf %77, %78 : vector<24x24xf32>
    %cst_43 = arith.constant dense<0xFF800000> : vector<24xf32>
    %80 = vector.multi_reduction <maximumf>, %79, %cst_43 [1] : vector<24x24xf32> to vector<24xf32>
    %81 = vector.shape_cast %80 : vector<24xf32> to vector<24x1xf32>
    %82 = vector.broadcast %81 : vector<24x1xf32> to vector<24x24xf32>
    %83 = arith.subf %79, %82 : vector<24x24xf32>
    %84 = math.exp %83 : vector<24x24xf32>
    %cst_44 = arith.constant dense<0.000000e+00> : vector<24xf32>
    %85 = vector.multi_reduction <add>, %84, %cst_44 [1] : vector<24x24xf32> to vector<24xf32>
    %86 = vector.shape_cast %85 : vector<24xf32> to vector<24x1xf32>
    %87 = vector.broadcast %86 : vector<24x1xf32> to vector<24x24xf32>
    %88 = arith.divf %84, %87 : vector<24x24xf32>
    %89 = arith.truncf %88 : vector<24x24xf32> to vector<24x24xbf16>
    %90 = vector.extract_strided_slice %50 {offsets = [0, 16], sizes = [24, 16], strides = [1, 1]} : vector<24x64xf32> to vector<24x16xf32>
    %91 = arith.truncf %90 : vector<24x16xf32> to vector<24x16xbf16>
    %cst_45 = arith.constant dense<0.000000e+00> : vector<24x16xf32>
    %92 = tpu.matmul %89, %91, %cst_45 {dimension_numbers = #tpu.dot_dimension_numbers<[1], [0], [0], [1], [0, 0, 1, 1], [], []>} : vector<24x24xbf16>, vector<24x16xbf16>, vector<24x16xf32> -> vector<24x16xf32>
    %c0_46 = arith.constant 0 : index
    %c16 = arith.constant 16 : index
    %93 = vector.load %arg23[%c0_46, %c16] : memref<24x64xf32, #tpu.memory_space<vmem>>, vector<24x16xf32>
    tpu.vector_store %arg23[%c0_46, %c16], %92 {strides = array<i32>} : memref<24x64xf32, #tpu.memory_space<vmem>>, vector<24x16xf32>,
    %94 = vector.extract_strided_slice %36 {offsets = [0, 32], sizes = [24, 16], strides = [1, 1]} : vector<24x64xf32> to vector<24x16xf32>
    %95 = arith.truncf %94 : vector<24x16xf32> to vector<24x16xbf16>
    %96 = vector.extract_strided_slice %43 {offsets = [0, 32], sizes = [24, 16], strides = [1, 1]} : vector<24x64xf32> to vector<24x16xf32>
    %97 = arith.truncf %96 : vector<24x16xf32> to vector<24x16xbf16>
    %cst_47 = arith.constant dense<0.000000e+00> : vector<24x24xf32>
    %98 = tpu.matmul %95, %97, %cst_47 {dimension_numbers = #tpu.dot_dimension_numbers<[1], [1], [0], [0], [0, 0, 1, 0], [], []>} : vector<24x16xbf16>, vector<24x16xbf16>, vector<24x24xf32> -> vector<24x24xf32>
    %99 = vector.broadcast %51 : vector<1x24xf32> to vector<24x24xf32>
    %100 = arith.addf %98, %99 : vector<24x24xf32>
    %cst_48 = arith.constant dense<0xFF800000> : vector<24xf32>
    %101 = vector.multi_reduction <maximumf>, %100, %cst_48 [1] : vector<24x24xf32> to vector<24xf32>
    %102 = vector.shape_cast %101 : vector<24xf32> to vector<24x1xf32>
    %103 = vector.broadcast %102 : vector<24x1xf32> to vector<24x24xf32>
    %104 = arith.subf %100, %103 : vector<24x24xf32>
    %105 = math.exp %104 : vector<24x24xf32>
    %cst_49 = arith.constant dense<0.000000e+00> : vector<24xf32>
    %106 = vector.multi_reduction <add>, %105, %cst_49 [1] : vector<24x24xf32> to vector<24xf32>
    %107 = vector.shape_cast %106 : vector<24xf32> to vector<24x1xf32>
    %108 = vector.broadcast %107 : vector<24x1xf32> to vector<24x24xf32>
    %109 = arith.divf %105, %108 : vector<24x24xf32>
    %110 = arith.truncf %109 : vector<24x24xf32> to vector<24x24xbf16>
    %111 = vector.extract_strided_slice %50 {offsets = [0, 32], sizes = [24, 16], strides = [1, 1]} : vector<24x64xf32> to vector<24x16xf32>
    %112 = arith.truncf %111 : vector<24x16xf32> to vector<24x16xbf16>
    %cst_50 = arith.constant dense<0.000000e+00> : vector<24x16xf32>
    %113 = tpu.matmul %110, %112, %cst_50 {dimension_numbers = #tpu.dot_dimension_numbers<[1], [0], [0], [1], [0, 0, 1, 1], [], []>} : vector<24x24xbf16>, vector<24x16xbf16>, vector<24x16xf32> -> vector<24x16xf32>
    %c0_51 = arith.constant 0 : index
    %c32 = arith.constant 32 : index
    %114 = vector.load %arg23[%c0_51, %c32] : memref<24x64xf32, #tpu.memory_space<vmem>>, vector<24x16xf32>
    tpu.vector_store %arg23[%c0_51, %c32], %113 {strides = array<i32>} : memref<24x64xf32, #tpu.memory_space<vmem>>, vector<24x16xf32>,
    %115 = vector.extract_strided_slice %36 {offsets = [0, 48], sizes = [24, 16], strides = [1, 1]} : vector<24x64xf32> to vector<24x16xf32>
    %116 = arith.truncf %115 : vector<24x16xf32> to vector<24x16xbf16>
    %117 = vector.extract_strided_slice %43 {offsets = [0, 48], sizes = [24, 16], strides = [1, 1]} : vector<24x64xf32> to vector<24x16xf32>
    %118 = arith.truncf %117 : vector<24x16xf32> to vector<24x16xbf16>
    %cst_52 = arith.constant dense<0.000000e+00> : vector<24x24xf32>
    %119 = tpu.matmul %116, %118, %cst_52 {dimension_numbers = #tpu.dot_dimension_numbers<[1], [1], [0], [0], [0, 0, 1, 0], [], []>} : vector<24x16xbf16>, vector<24x16xbf16>, vector<24x24xf32> -> vector<24x24xf32>
    %120 = vector.broadcast %51 : vector<1x24xf32> to vector<24x24xf32>
    %121 = arith.addf %119, %120 : vector<24x24xf32>
    %cst_53 = arith.constant dense<0xFF800000> : vector<24xf32>
    %122 = vector.multi_reduction <maximumf>, %121, %cst_53 [1] : vector<24x24xf32> to vector<24xf32>
    %123 = vector.shape_cast %122 : vector<24xf32> to vector<24x1xf32>
    %124 = vector.broadcast %123 : vector<24x1xf32> to vector<24x24xf32>
    %125 = arith.subf %121, %124 : vector<24x24xf32>
    %126 = math.exp %125 : vector<24x24xf32>
    %cst_54 = arith.constant dense<0.000000e+00> : vector<24xf32>
    %127 = vector.multi_reduction <add>, %126, %cst_54 [1] : vector<24x24xf32> to vector<24xf32>
    %128 = vector.shape_cast %127 : vector<24xf32> to vector<24x1xf32>
    %129 = vector.broadcast %128 : vector<24x1xf32> to vector<24x24xf32>
    %130 = arith.divf %126, %129 : vector<24x24xf32>
    %131 = arith.truncf %130 : vector<24x24xf32> to vector<24x24xbf16>
    %132 = vector.extract_strided_slice %50 {offsets = [0, 48], sizes = [24, 16], strides = [1, 1]} : vector<24x64xf32> to vector<24x16xf32>
    %133 = arith.truncf %132 : vector<24x16xf32> to vector<24x16xbf16>
    %cst_55 = arith.constant dense<0.000000e+00> : vector<24x16xf32>
    %134 = tpu.matmul %131, %133, %cst_55 {dimension_numbers = #tpu.dot_dimension_numbers<[1], [0], [0], [1], [0, 0, 1, 1], [], []>} : vector<24x24xbf16>, vector<24x16xbf16>, vector<24x16xf32> -> vector<24x16xf32>
    %c0_56 = arith.constant 0 : index
    %c48 = arith.constant 48 : index
    %135 = vector.load %arg23[%c0_56, %c48] : memref<24x64xf32, #tpu.memory_space<vmem>>, vector<24x16xf32>
    tpu.vector_store %arg23[%c0_56, %c48], %134 {strides = array<i32>} : memref<24x64xf32, #tpu.memory_space<vmem>>, vector<24x16xf32>,
    %c0_57 = arith.constant 0 : index
    %c0_58 = arith.constant 0 : index
    %136 = vector.load %arg23[%c0_57, %c0_58] : memref<24x64xf32, #tpu.memory_space<vmem>>, vector<24x64xf32>
    %137 = arith.truncf %136 : vector<24x64xf32> to vector<24x64xbf16>
    %c0_59 = arith.constant 0 : index
    %c0_60 = arith.constant 0 : index
    %c0_61 = arith.constant 0 : index
    %138 = vector.load %arg14[%c0_59, %c0_60, %c0_61] : memref<1x64x64xbf16, #tpu.memory_space<vmem>>, vector<1x64x64xbf16>
    %139 = vector.shape_cast %138 : vector<1x64x64xbf16> to vector<64x64xbf16>
    %cst_62 = arith.constant dense<0.000000e+00> : vector<24x64xf32>
    %140 = tpu.matmul %137, %139, %cst_62 {dimension_numbers = #tpu.dot_dimension_numbers<[1], [0], [0], [1], [0, 0, 1, 1], [], []>} : vector<24x64xbf16>, vector<64x64xbf16>, vector<24x64xf32> -> vector<24x64xf32>
    %141 = arith.addf %4, %140 : vector<24x64xf32>
    %c0_63 = arith.constant 0 : index
    %c0_64 = arith.constant 0 : index
    %c0_65 = arith.constant 0 : index
    %142 = vector.load %arg15[%c0_63, %c0_64, %c0_65] : memref<1x1x64xf32, #tpu.memory_space<vmem>>, vector<1x1x64xf32>
    %143 = vector.shape_cast %142 : vector<1x1x64xf32> to vector<1x64xf32>
    %144 = vector.broadcast %143 : vector<1x64xf32> to vector<24x64xf32>
    %145 = arith.addf %141, %144 : vector<24x64xf32>
    %c0_66 = arith.constant 0 : index
    %c0_67 = arith.constant 0 : index
    %c0_68 = arith.constant 0 : index
    %146 = vector.load %arg16[%c0_66, %c0_67, %c0_68] : memref<1x1x64xf32, #tpu.memory_space<vmem>>, vector<1x1x64xf32>
    %147 = vector.shape_cast %146 : vector<1x1x64xf32> to vector<1x64xf32>
    %c0_69 = arith.constant 0 : index
    %c0_70 = arith.constant 0 : index
    %c0_71 = arith.constant 0 : index
    %148 = vector.load %arg17[%c0_69, %c0_70, %c0_71] : memref<1x1x64xf32, #tpu.memory_space<vmem>>, vector<1x1x64xf32>
    %149 = vector.shape_cast %148 : vector<1x1x64xf32> to vector<1x64xf32>
    %cst_72 = arith.constant dense<0.000000e+00> : vector<24xf32>
    %150 = vector.multi_reduction <add>, %145, %cst_72 [1] : vector<24x64xf32> to vector<24xf32>
    %151 = vector.shape_cast %150 : vector<24xf32> to vector<24x1xf32>
    %cst_73 = arith.constant 6.400000e+01 : f32
    %152 = vector.broadcast %cst_73 : f32 to vector<24x1xf32>
    %153 = arith.divf %151, %152 : vector<24x1xf32>
    %154 = vector.broadcast %153 : vector<24x1xf32> to vector<24x64xf32>
    %155 = arith.subf %145, %154 : vector<24x64xf32>
    %156 = arith.mulf %155, %155 : vector<24x64xf32>
    %cst_74 = arith.constant dense<0.000000e+00> : vector<24xf32>
    %157 = vector.multi_reduction <add>, %156, %cst_74 [1] : vector<24x64xf32> to vector<24xf32>
    %158 = vector.shape_cast %157 : vector<24xf32> to vector<24x1xf32>
    %cst_75 = arith.constant 6.400000e+01 : f32
    %159 = vector.broadcast %cst_75 : f32 to vector<24x1xf32>
    %160 = arith.divf %158, %159 : vector<24x1xf32>
    %cst_76 = arith.constant 9.99999997E-7 : f32
    %161 = vector.broadcast %cst_76 : f32 to vector<24x1xf32>
    %162 = arith.addf %160, %161 : vector<24x1xf32>
    %163 = math.rsqrt %162 : vector<24x1xf32>
    %164 = vector.broadcast %163 : vector<24x1xf32> to vector<24x64xf32>
    %165 = arith.mulf %155, %164 : vector<24x64xf32>
    %166 = vector.broadcast %147 : vector<1x64xf32> to vector<24x64xf32>
    %167 = arith.mulf %165, %166 : vector<24x64xf32>
    %168 = vector.broadcast %149 : vector<1x64xf32> to vector<24x64xf32>
    %169 = arith.addf %167, %168 : vector<24x64xf32>
    %170 = arith.truncf %169 : vector<24x64xf32> to vector<24x64xbf16>
    %c0_77 = arith.constant 0 : index
    %c0_78 = arith.constant 0 : index
    %c0_79 = arith.constant 0 : index
    %171 = vector.load %arg18[%c0_77, %c0_78, %c0_79] : memref<1x64x256xbf16, #tpu.memory_space<vmem>>, vector<1x64x256xbf16>
    %172 = vector.shape_cast %171 : vector<1x64x256xbf16> to vector<64x256xbf16>
    %cst_80 = arith.constant dense<0.000000e+00> : vector<24x256xf32>
    %173 = tpu.matmul %170, %172, %cst_80 {dimension_numbers = #tpu.dot_dimension_numbers<[1], [0], [0], [1], [0, 0, 1, 1], [], []>} : vector<24x64xbf16>, vector<64x256xbf16>, vector<24x256xf32> -> vector<24x256xf32>
    %c0_81 = arith.constant 0 : index
    %c0_82 = arith.constant 0 : index
    %c0_83 = arith.constant 0 : index
    %174 = vector.load %arg19[%c0_81, %c0_82, %c0_83] : memref<1x1x256xf32, #tpu.memory_space<vmem>>, vector<1x1x256xf32>
    %175 = vector.shape_cast %174 : vector<1x1x256xf32> to vector<1x256xf32>
    %176 = vector.broadcast %175 : vector<1x256xf32> to vector<24x256xf32>
    %177 = arith.addf %173, %176 : vector<24x256xf32>
    %cst_84 = arith.constant 5.000000e-01 : f32
    %178 = vector.broadcast %cst_84 : f32 to vector<24x256xf32>
    %179 = arith.mulf %178, %177 : vector<24x256xf32>
    %cst_85 = arith.constant 4.471500e-02 : f32
    %180 = vector.broadcast %cst_85 : f32 to vector<24x256xf32>
    %181 = arith.mulf %180, %177 : vector<24x256xf32>
    %182 = arith.mulf %181, %177 : vector<24x256xf32>
    %183 = arith.mulf %182, %177 : vector<24x256xf32>
    %184 = arith.addf %177, %183 : vector<24x256xf32>
    %cst_86 = arith.constant 0.797884583 : f32
    %185 = vector.broadcast %cst_86 : f32 to vector<24x256xf32>
    %186 = arith.mulf %185, %184 : vector<24x256xf32>
    %187 = math.tanh %186 : vector<24x256xf32>
    %cst_87 = arith.constant 1.000000e+00 : f32
    %188 = vector.broadcast %cst_87 : f32 to vector<24x256xf32>
    %189 = arith.addf %188, %187 : vector<24x256xf32>
    %190 = arith.mulf %179, %189 : vector<24x256xf32>
    %191 = arith.truncf %190 : vector<24x256xf32> to vector<24x256xbf16>
    %c0_88 = arith.constant 0 : index
    %c0_89 = arith.constant 0 : index
    %c0_90 = arith.constant 0 : index
    %192 = vector.load %arg20[%c0_88, %c0_89, %c0_90] : memref<1x256x64xbf16, #tpu.memory_space<vmem>>, vector<1x256x64xbf16>
    %193 = vector.shape_cast %192 : vector<1x256x64xbf16> to vector<256x64xbf16>
    %cst_91 = arith.constant dense<0.000000e+00> : vector<24x64xf32>
    %194 = tpu.matmul %191, %193, %cst_91 {dimension_numbers = #tpu.dot_dimension_numbers<[1], [0], [0], [1], [0, 0, 1, 1], [], []>} : vector<24x256xbf16>, vector<256x64xbf16>, vector<24x64xf32> -> vector<24x64xf32>
    %195 = arith.addf %145, %194 : vector<24x64xf32>
    %c0_92 = arith.constant 0 : index
    %c0_93 = arith.constant 0 : index
    %c0_94 = arith.constant 0 : index
    %196 = vector.load %arg21[%c0_92, %c0_93, %c0_94] : memref<1x1x64xf32, #tpu.memory_space<vmem>>, vector<1x1x64xf32>
    %197 = vector.shape_cast %196 : vector<1x1x64xf32> to vector<1x64xf32>
    %198 = vector.broadcast %197 : vector<1x64xf32> to vector<24x64xf32>
    %199 = arith.addf %195, %198 : vector<24x64xf32>
    %c0_95 = arith.constant 0 : index
    %c0_96 = arith.constant 0 : index
    %c0_97 = arith.constant 0 : index
    %200 = vector.load %arg22[%c0_95, %c0_96, %c0_97] : memref<1x24x64xf32, #tpu.memory_space<vmem>>, vector<1x24x64xf32>
    %201 = vector.shape_cast %200 : vector<1x24x64xf32> to vector<24x64xf32>
    %202 = vector.shape_cast %199 : vector<24x64xf32> to vector<1x24x64xf32>
    tpu.vector_store %arg22[%c0_95, %c0_96, %c0_97], %202 {strides = array<i32>} : memref<1x24x64xf32, #tpu.memory_space<vmem>>, vector<1x24x64xf32>,
    return
  }
  func.func @transform_0(%arg0: i32, %arg1: i32) -> (i32, i32, i32) {
    %c0_i32 = arith.constant 0 : i32
    %c0_i32_0 = arith.constant 0 : i32
    %c0_i32_1 = arith.constant 0 : i32
    return %arg0, %c0_i32, %c0_i32_0 : i32, i32, i32
  }
  func.func @transform_1(%arg0: i32, %arg1: i32) -> (i32, i32) {
    %c0_i32 = arith.constant 0 : i32
    %c0_i32_0 = arith.constant 0 : i32
    %c0_i32_1 = arith.constant 0 : i32
    return %c0_i32, %c0_i32_0 : i32, i32
  }
  func.func @transform_2(%arg0: i32, %arg1: i32) -> (i32, i32) {
    %c0_i32 = arith.constant 0 : i32
    %c0_i32_0 = arith.constant 0 : i32
    %c0_i32_1 = arith.constant 0 : i32
    return %c0_i32, %c0_i32_0 : i32, i32
  }
  func.func @transform_3(%arg0: i32, %arg1: i32) -> (i32, i32) {
    %c0_i32 = arith.constant 0 : i32
    %c0_i32_0 = arith.constant 0 : i32
    %c0_i32_1 = arith.constant 0 : i32
    return %c0_i32, %c0_i32_0 : i32, i32
  }
  func.func @transform_4(%arg0: i32, %arg1: i32) -> (i32, i32, i32) {
    %c0_i32 = arith.constant 0 : i32
    %c0_i32_0 = arith.constant 0 : i32
    %c0_i32_1 = arith.constant 0 : i32
    return %arg1, %c0_i32, %c0_i32_0 : i32, i32, i32
  }
  func.func @transform_5(%arg0: i32, %arg1: i32) -> (i32, i32, i32) {
    %c0_i32 = arith.constant 0 : i32
    %c0_i32_0 = arith.constant 0 : i32
    %c0_i32_1 = arith.constant 0 : i32
    return %arg1, %c0_i32, %c0_i32_0 : i32, i32, i32
  }
  func.func @transform_6(%arg0: i32, %arg1: i32) -> (i32, i32, i32) {
    %c0_i32 = arith.constant 0 : i32
    %c0_i32_0 = arith.constant 0 : i32
    %c0_i32_1 = arith.constant 0 : i32
    return %arg1, %c0_i32, %c0_i32_0 : i32, i32, i32
  }
  func.func @transform_7(%arg0: i32, %arg1: i32) -> (i32, i32, i32) {
    %c0_i32 = arith.constant 0 : i32
    %c0_i32_0 = arith.constant 0 : i32
    %c0_i32_1 = arith.constant 0 : i32
    return %arg1, %c0_i32, %c0_i32_0 : i32, i32, i32
  }
  func.func @transform_8(%arg0: i32, %arg1: i32) -> (i32, i32, i32) {
    %c0_i32 = arith.constant 0 : i32
    %c0_i32_0 = arith.constant 0 : i32
    %c0_i32_1 = arith.constant 0 : i32
    return %arg1, %c0_i32, %c0_i32_0 : i32, i32, i32
  }
  func.func @transform_9(%arg0: i32, %arg1: i32) -> (i32, i32, i32) {
    %c0_i32 = arith.constant 0 : i32
    %c0_i32_0 = arith.constant 0 : i32
    %c0_i32_1 = arith.constant 0 : i32
    return %arg1, %c0_i32, %c0_i32_0 : i32, i32, i32
  }
  func.func @transform_10(%arg0: i32, %arg1: i32) -> (i32, i32, i32) {
    %c0_i32 = arith.constant 0 : i32
    %c0_i32_0 = arith.constant 0 : i32
    %c0_i32_1 = arith.constant 0 : i32
    return %arg1, %c0_i32, %c0_i32_0 : i32, i32, i32
  }
  func.func @transform_11(%arg0: i32, %arg1: i32) -> (i32, i32, i32) {
    %c0_i32 = arith.constant 0 : i32
    %c0_i32_0 = arith.constant 0 : i32
    %c0_i32_1 = arith.constant 0 : i32
    return %arg1, %c0_i32, %c0_i32_0 : i32, i32, i32
  }
  func.func @transform_12(%arg0: i32, %arg1: i32) -> (i32, i32, i32) {
    %c0_i32 = arith.constant 0 : i32
    %c0_i32_0 = arith.constant 0 : i32
    %c0_i32_1 = arith.constant 0 : i32
    return %arg1, %c0_i32, %c0_i32_0 : i32, i32, i32
  }
  func.func @transform_13(%arg0: i32, %arg1: i32) -> (i32, i32, i32) {
    %c0_i32 = arith.constant 0 : i32
    %c0_i32_0 = arith.constant 0 : i32
    %c0_i32_1 = arith.constant 0 : i32
    return %arg1, %c0_i32, %c0_i32_0 : i32, i32, i32
  }
  func.func @transform_14(%arg0: i32, %arg1: i32) -> (i32, i32, i32) {
    %c0_i32 = arith.constant 0 : i32
    %c0_i32_0 = arith.constant 0 : i32
    %c0_i32_1 = arith.constant 0 : i32
    return %arg1, %c0_i32, %c0_i32_0 : i32, i32, i32
  }
  func.func @transform_15(%arg0: i32, %arg1: i32) -> (i32, i32, i32) {
    %c0_i32 = arith.constant 0 : i32
    %c0_i32_0 = arith.constant 0 : i32
    %c0_i32_1 = arith.constant 0 : i32
    return %arg1, %c0_i32, %c0_i32_0 : i32, i32, i32
  }
  func.func @transform_16(%arg0: i32, %arg1: i32) -> (i32, i32, i32) {
    %c0_i32 = arith.constant 0 : i32
    %c0_i32_0 = arith.constant 0 : i32
    %c0_i32_1 = arith.constant 0 : i32
    return %arg1, %c0_i32, %c0_i32_0 : i32, i32, i32
  }
  func.func @transform_17(%arg0: i32, %arg1: i32) -> (i32, i32, i32) {
    %c0_i32 = arith.constant 0 : i32
    %c0_i32_0 = arith.constant 0 : i32
    %c0_i32_1 = arith.constant 0 : i32
    return %arg1, %c0_i32, %c0_i32_0 : i32, i32, i32
  }
  func.func @transform_18(%arg0: i32, %arg1: i32) -> (i32, i32, i32) {
    %c0_i32 = arith.constant 0 : i32
    %c0_i32_0 = arith.constant 0 : i32
    %c0_i32_1 = arith.constant 0 : i32
    return %arg1, %c0_i32, %c0_i32_0 : i32, i32, i32
  }
  func.func @transform_19(%arg0: i32, %arg1: i32) -> (i32, i32, i32) {
    %c0_i32 = arith.constant 0 : i32
    %c0_i32_0 = arith.constant 0 : i32
    %c0_i32_1 = arith.constant 0 : i32
    return %arg1, %c0_i32, %c0_i32_0 : i32, i32, i32
  }
  func.func @transform_20(%arg0: i32, %arg1: i32) -> (i32, i32, i32) {
    %c0_i32 = arith.constant 0 : i32
    %c0_i32_0 = arith.constant 0 : i32
    %c0_i32_1 = arith.constant 0 : i32
    return %arg0, %c0_i32, %c0_i32_0 : i32, i32, i32
  }
}

module attributes {stable_mosaic.version = 11 : i64} {
  func.func @_decoder_kernel(%arg0: i32, %arg1: memref<16x64xf32, #tpu.memory_space<vmem>>, %arg2: memref<1x64xf32, #tpu.memory_space<vmem>>, %arg3: memref<1x64xf32, #tpu.memory_space<vmem>>, %arg4: memref<64x128xbf16, #tpu.memory_space<vmem>>, %arg5: memref<1x128xf32, #tpu.memory_space<vmem>>, %arg6: memref<128x256xbf16, #tpu.memory_space<vmem>>, %arg7: memref<1x256xf32, #tpu.memory_space<vmem>>, %arg8: memref<256x512xbf16, #tpu.memory_space<vmem>>, %arg9: memref<1x512xf32, #tpu.memory_space<vmem>>, %arg10: memref<512x1024xbf16, #tpu.memory_space<vmem>>, %arg11: memref<1x1024xf32, #tpu.memory_space<vmem>>, %arg12: memref<1024x256xbf16, #tpu.memory_space<vmem>>, %arg13: memref<1x256xf32, #tpu.memory_space<vmem>>, %arg14: memref<16x256xf32, #tpu.memory_space<vmem>>) attributes {dimension_semantics = [#tpu.dimension_semantics<parallel>], iteration_bounds = array<i64: 2>, scalar_prefetch = 0 : i64, scratch_operands = 0 : i64, tpu.core_type = #tpu.core_type<tc>, window_params = [{transform_indices = @transform_0, window_bounds = array<i64: 16, 64>}, {pipeline_mode = #tpu.pipeline_mode<synchronous>, transform_indices = @transform_1, window_bounds = array<i64: 1, 64>}, {pipeline_mode = #tpu.pipeline_mode<synchronous>, transform_indices = @transform_2, window_bounds = array<i64: 1, 64>}, {pipeline_mode = #tpu.pipeline_mode<synchronous>, transform_indices = @transform_3, window_bounds = array<i64: 64, 128>}, {pipeline_mode = #tpu.pipeline_mode<synchronous>, transform_indices = @transform_4, window_bounds = array<i64: 1, 128>}, {pipeline_mode = #tpu.pipeline_mode<synchronous>, transform_indices = @transform_5, window_bounds = array<i64: 128, 256>}, {pipeline_mode = #tpu.pipeline_mode<synchronous>, transform_indices = @transform_6, window_bounds = array<i64: 1, 256>}, {pipeline_mode = #tpu.pipeline_mode<synchronous>, transform_indices = @transform_7, window_bounds = array<i64: 256, 512>}, {pipeline_mode = #tpu.pipeline_mode<synchronous>, transform_indices = @transform_8, window_bounds = array<i64: 1, 512>}, {pipeline_mode = #tpu.pipeline_mode<synchronous>, transform_indices = @transform_9, window_bounds = array<i64: 512, 1024>}, {pipeline_mode = #tpu.pipeline_mode<synchronous>, transform_indices = @transform_10, window_bounds = array<i64: 1, 1024>}, {pipeline_mode = #tpu.pipeline_mode<synchronous>, transform_indices = @transform_11, window_bounds = array<i64: 1024, 256>}, {pipeline_mode = #tpu.pipeline_mode<synchronous>, transform_indices = @transform_12, window_bounds = array<i64: 1, 256>}, {transform_indices = @transform_13, window_bounds = array<i64: 16, 256>}]} {
    %c0 = arith.constant 0 : index
    %c0_0 = arith.constant 0 : index
    %0 = vector.load %arg1[%c0, %c0_0] : memref<16x64xf32, #tpu.memory_space<vmem>>, vector<16x64xf32>
    %c0_1 = arith.constant 0 : index
    %c0_2 = arith.constant 0 : index
    %1 = vector.load %arg2[%c0_1, %c0_2] : memref<1x64xf32, #tpu.memory_space<vmem>>, vector<1x64xf32>
    %c0_3 = arith.constant 0 : index
    %c0_4 = arith.constant 0 : index
    %2 = vector.load %arg3[%c0_3, %c0_4] : memref<1x64xf32, #tpu.memory_space<vmem>>, vector<1x64xf32>
    %cst = arith.constant dense<0.000000e+00> : vector<16xf32>
    %3 = vector.multi_reduction <add>, %0, %cst [1] : vector<16x64xf32> to vector<16xf32>
    %4 = vector.shape_cast %3 : vector<16xf32> to vector<16x1xf32>
    %cst_5 = arith.constant 6.400000e+01 : f32
    %5 = vector.broadcast %cst_5 : f32 to vector<16x1xf32>
    %6 = arith.divf %4, %5 : vector<16x1xf32>
    %7 = vector.broadcast %6 : vector<16x1xf32> to vector<16x64xf32>
    %8 = arith.subf %0, %7 : vector<16x64xf32>
    %9 = arith.mulf %8, %8 : vector<16x64xf32>
    %cst_6 = arith.constant dense<0.000000e+00> : vector<16xf32>
    %10 = vector.multi_reduction <add>, %9, %cst_6 [1] : vector<16x64xf32> to vector<16xf32>
    %11 = vector.shape_cast %10 : vector<16xf32> to vector<16x1xf32>
    %cst_7 = arith.constant 6.400000e+01 : f32
    %12 = vector.broadcast %cst_7 : f32 to vector<16x1xf32>
    %13 = arith.divf %11, %12 : vector<16x1xf32>
    %cst_8 = arith.constant 9.99999997E-7 : f32
    %14 = vector.broadcast %cst_8 : f32 to vector<16x1xf32>
    %15 = arith.addf %13, %14 : vector<16x1xf32>
    %16 = math.rsqrt %15 : vector<16x1xf32>
    %17 = vector.broadcast %16 : vector<16x1xf32> to vector<16x64xf32>
    %18 = arith.mulf %8, %17 : vector<16x64xf32>
    %19 = vector.broadcast %1 : vector<1x64xf32> to vector<16x64xf32>
    %20 = arith.mulf %18, %19 : vector<16x64xf32>
    %21 = vector.broadcast %2 : vector<1x64xf32> to vector<16x64xf32>
    %22 = arith.addf %20, %21 : vector<16x64xf32>
    %23 = arith.truncf %22 : vector<16x64xf32> to vector<16x64xbf16>
    %c0_9 = arith.constant 0 : index
    %c0_10 = arith.constant 0 : index
    %24 = vector.load %arg4[%c0_9, %c0_10] : memref<64x128xbf16, #tpu.memory_space<vmem>>, vector<64x128xbf16>
    %cst_11 = arith.constant dense<0.000000e+00> : vector<16x128xf32>
    %25 = tpu.matmul %23, %24, %cst_11 {dimension_numbers = #tpu.dot_dimension_numbers<[1], [0], [0], [1], [0, 0, 1, 1], [], []>} : vector<16x64xbf16>, vector<64x128xbf16>, vector<16x128xf32> -> vector<16x128xf32>
    %c0_12 = arith.constant 0 : index
    %c0_13 = arith.constant 0 : index
    %26 = vector.load %arg5[%c0_12, %c0_13] : memref<1x128xf32, #tpu.memory_space<vmem>>, vector<1x128xf32>
    %27 = vector.broadcast %26 : vector<1x128xf32> to vector<16x128xf32>
    %28 = arith.addf %25, %27 : vector<16x128xf32>
    %cst_14 = arith.constant 0.000000e+00 : f32
    %29 = vector.broadcast %cst_14 : f32 to vector<16x128xf32>
    %30 = arith.maximumf %28, %29 : vector<16x128xf32>
    %31 = arith.truncf %30 : vector<16x128xf32> to vector<16x128xbf16>
    %c0_15 = arith.constant 0 : index
    %c0_16 = arith.constant 0 : index
    %32 = vector.load %arg6[%c0_15, %c0_16] : memref<128x256xbf16, #tpu.memory_space<vmem>>, vector<128x256xbf16>
    %cst_17 = arith.constant dense<0.000000e+00> : vector<16x256xf32>
    %33 = tpu.matmul %31, %32, %cst_17 {dimension_numbers = #tpu.dot_dimension_numbers<[1], [0], [0], [1], [0, 0, 1, 1], [], []>} : vector<16x128xbf16>, vector<128x256xbf16>, vector<16x256xf32> -> vector<16x256xf32>
    %c0_18 = arith.constant 0 : index
    %c0_19 = arith.constant 0 : index
    %34 = vector.load %arg7[%c0_18, %c0_19] : memref<1x256xf32, #tpu.memory_space<vmem>>, vector<1x256xf32>
    %35 = vector.broadcast %34 : vector<1x256xf32> to vector<16x256xf32>
    %36 = arith.addf %33, %35 : vector<16x256xf32>
    %cst_20 = arith.constant 0.000000e+00 : f32
    %37 = vector.broadcast %cst_20 : f32 to vector<16x256xf32>
    %38 = arith.maximumf %36, %37 : vector<16x256xf32>
    %39 = arith.truncf %38 : vector<16x256xf32> to vector<16x256xbf16>
    %c0_21 = arith.constant 0 : index
    %c0_22 = arith.constant 0 : index
    %40 = vector.load %arg8[%c0_21, %c0_22] : memref<256x512xbf16, #tpu.memory_space<vmem>>, vector<256x512xbf16>
    %cst_23 = arith.constant dense<0.000000e+00> : vector<16x512xf32>
    %41 = tpu.matmul %39, %40, %cst_23 {dimension_numbers = #tpu.dot_dimension_numbers<[1], [0], [0], [1], [0, 0, 1, 1], [], []>} : vector<16x256xbf16>, vector<256x512xbf16>, vector<16x512xf32> -> vector<16x512xf32>
    %c0_24 = arith.constant 0 : index
    %c0_25 = arith.constant 0 : index
    %42 = vector.load %arg9[%c0_24, %c0_25] : memref<1x512xf32, #tpu.memory_space<vmem>>, vector<1x512xf32>
    %43 = vector.broadcast %42 : vector<1x512xf32> to vector<16x512xf32>
    %44 = arith.addf %41, %43 : vector<16x512xf32>
    %cst_26 = arith.constant 0.000000e+00 : f32
    %45 = vector.broadcast %cst_26 : f32 to vector<16x512xf32>
    %46 = arith.maximumf %44, %45 : vector<16x512xf32>
    %47 = arith.truncf %46 : vector<16x512xf32> to vector<16x512xbf16>
    %c0_27 = arith.constant 0 : index
    %c0_28 = arith.constant 0 : index
    %48 = vector.load %arg10[%c0_27, %c0_28] : memref<512x1024xbf16, #tpu.memory_space<vmem>>, vector<512x1024xbf16>
    %cst_29 = arith.constant dense<0.000000e+00> : vector<16x1024xf32>
    %49 = tpu.matmul %47, %48, %cst_29 {dimension_numbers = #tpu.dot_dimension_numbers<[1], [0], [0], [1], [0, 0, 1, 1], [], []>} : vector<16x512xbf16>, vector<512x1024xbf16>, vector<16x1024xf32> -> vector<16x1024xf32>
    %c0_30 = arith.constant 0 : index
    %c0_31 = arith.constant 0 : index
    %50 = vector.load %arg11[%c0_30, %c0_31] : memref<1x1024xf32, #tpu.memory_space<vmem>>, vector<1x1024xf32>
    %51 = vector.broadcast %50 : vector<1x1024xf32> to vector<16x1024xf32>
    %52 = arith.addf %49, %51 : vector<16x1024xf32>
    %cst_32 = arith.constant 0.000000e+00 : f32
    %53 = vector.broadcast %cst_32 : f32 to vector<16x1024xf32>
    %54 = arith.maximumf %52, %53 : vector<16x1024xf32>
    %55 = arith.truncf %54 : vector<16x1024xf32> to vector<16x1024xbf16>
    %c0_33 = arith.constant 0 : index
    %c0_34 = arith.constant 0 : index
    %56 = vector.load %arg12[%c0_33, %c0_34] : memref<1024x256xbf16, #tpu.memory_space<vmem>>, vector<1024x256xbf16>
    %cst_35 = arith.constant dense<0.000000e+00> : vector<16x256xf32>
    %57 = tpu.matmul %55, %56, %cst_35 {dimension_numbers = #tpu.dot_dimension_numbers<[1], [0], [0], [1], [0, 0, 1, 1], [], []>} : vector<16x1024xbf16>, vector<1024x256xbf16>, vector<16x256xf32> -> vector<16x256xf32>
    %c0_36 = arith.constant 0 : index
    %c0_37 = arith.constant 0 : index
    %58 = vector.load %arg13[%c0_36, %c0_37] : memref<1x256xf32, #tpu.memory_space<vmem>>, vector<1x256xf32>
    %59 = vector.broadcast %58 : vector<1x256xf32> to vector<16x256xf32>
    %60 = arith.addf %57, %59 : vector<16x256xf32>
    %c0_38 = arith.constant 0 : index
    %c0_39 = arith.constant 0 : index
    %61 = vector.load %arg14[%c0_38, %c0_39] : memref<16x256xf32, #tpu.memory_space<vmem>>, vector<16x256xf32>
    tpu.vector_store %arg14[%c0_38, %c0_39], %60 {strides = array<i32>} : memref<16x256xf32, #tpu.memory_space<vmem>>, vector<16x256xf32>,
    return
  }
  func.func @transform_0(%arg0: i32) -> (i32, i32) {
    %c0_i32 = arith.constant 0 : i32
    %c0_i32_0 = arith.constant 0 : i32
    return %arg0, %c0_i32 : i32, i32
  }
  func.func @transform_1(%arg0: i32) -> (i32, i32) {
    %c0_i32 = arith.constant 0 : i32
    %c0_i32_0 = arith.constant 0 : i32
    %c0_i32_1 = arith.constant 0 : i32
    return %c0_i32, %c0_i32_0 : i32, i32
  }
  func.func @transform_2(%arg0: i32) -> (i32, i32) {
    %c0_i32 = arith.constant 0 : i32
    %c0_i32_0 = arith.constant 0 : i32
    %c0_i32_1 = arith.constant 0 : i32
    return %c0_i32, %c0_i32_0 : i32, i32
  }
  func.func @transform_3(%arg0: i32) -> (i32, i32) {
    %c0_i32 = arith.constant 0 : i32
    %c0_i32_0 = arith.constant 0 : i32
    %c0_i32_1 = arith.constant 0 : i32
    return %c0_i32, %c0_i32_0 : i32, i32
  }
  func.func @transform_4(%arg0: i32) -> (i32, i32) {
    %c0_i32 = arith.constant 0 : i32
    %c0_i32_0 = arith.constant 0 : i32
    %c0_i32_1 = arith.constant 0 : i32
    return %c0_i32, %c0_i32_0 : i32, i32
  }
  func.func @transform_5(%arg0: i32) -> (i32, i32) {
    %c0_i32 = arith.constant 0 : i32
    %c0_i32_0 = arith.constant 0 : i32
    %c0_i32_1 = arith.constant 0 : i32
    return %c0_i32, %c0_i32_0 : i32, i32
  }
  func.func @transform_6(%arg0: i32) -> (i32, i32) {
    %c0_i32 = arith.constant 0 : i32
    %c0_i32_0 = arith.constant 0 : i32
    %c0_i32_1 = arith.constant 0 : i32
    return %c0_i32, %c0_i32_0 : i32, i32
  }
  func.func @transform_7(%arg0: i32) -> (i32, i32) {
    %c0_i32 = arith.constant 0 : i32
    %c0_i32_0 = arith.constant 0 : i32
    %c0_i32_1 = arith.constant 0 : i32
    return %c0_i32, %c0_i32_0 : i32, i32
  }
  func.func @transform_8(%arg0: i32) -> (i32, i32) {
    %c0_i32 = arith.constant 0 : i32
    %c0_i32_0 = arith.constant 0 : i32
    %c0_i32_1 = arith.constant 0 : i32
    return %c0_i32, %c0_i32_0 : i32, i32
  }
  func.func @transform_9(%arg0: i32) -> (i32, i32) {
    %c0_i32 = arith.constant 0 : i32
    %c0_i32_0 = arith.constant 0 : i32
    %c0_i32_1 = arith.constant 0 : i32
    return %c0_i32, %c0_i32_0 : i32, i32
  }
  func.func @transform_10(%arg0: i32) -> (i32, i32) {
    %c0_i32 = arith.constant 0 : i32
    %c0_i32_0 = arith.constant 0 : i32
    %c0_i32_1 = arith.constant 0 : i32
    return %c0_i32, %c0_i32_0 : i32, i32
  }
  func.func @transform_11(%arg0: i32) -> (i32, i32) {
    %c0_i32 = arith.constant 0 : i32
    %c0_i32_0 = arith.constant 0 : i32
    %c0_i32_1 = arith.constant 0 : i32
    return %c0_i32, %c0_i32_0 : i32, i32
  }
  func.func @transform_12(%arg0: i32) -> (i32, i32) {
    %c0_i32 = arith.constant 0 : i32
    %c0_i32_0 = arith.constant 0 : i32
    %c0_i32_1 = arith.constant 0 : i32
    return %c0_i32, %c0_i32_0 : i32, i32
  }
  func.func @transform_13(%arg0: i32) -> (i32, i32) {
    %c0_i32 = arith.constant 0 : i32
    %c0_i32_0 = arith.constant 0 : i32
    return %arg0, %c0_i32 : i32, i32
  }
}

</mosaic_0001>

<bundles_post_ra>
// kernel: vit_forward.2
= control target key start
LH: loop header
LB: loop body
LE: loop exit
PB: predicated region body
PF: predicated region fallthrough
CT: control target
= control target key end

     0   :  { %s5140_s0 = inlined_call_operand.vmem [shape: f32[2,24,192], index: 0, kind: input, shape index: {}]   ;;  %s5141_s1 = inlined_call_operand.vmem [shape: bf16[192,64], index: 1, kind: input, shape index: {}]   ;;  %s5142_s2 = inlined_call_operand.hbm [shape: f32[24,64], index: 2, kind: input, shape index: {}]   ;;  %s5143_s3 = inlined_call_operand.hbm [shape: f32[1,24], index: 3, kind: input, shape index: {}]   ;;  %s5144_s4 = inlined_call_operand.hbm [shape: f32[2,1,64], index: 4, kind: input, shape index: {}]   ;;  %s5145_s5 = inlined_call_operand.hbm [shape: f32[2,1,64], index: 5, kind: input, shape index: {}]   ;;  %s5146_s6 = inlined_call_operand.vmem [shape: bf16[2,64,64], index: 6, kind: input, shape index: {}]   ;;  %s5147_s7 = inlined_call_operand.hbm [shape: f32[2,1,64], index: 7, kind: input, shape index: {}]   ;;  %s5148_s8 = inlined_call_operand.vmem [shape: bf16[2,64,64], index: 8, kind: input, shape index: {}]   ;;  %s5149_s9 = inlined_call_operand.hbm [shape: f32[2,1,64], index: 9, kind: input, shape index: {}]   ;;  %s5150_s10 = inlined_call_operand.vmem [shape: bf16[2,64,64], index: 10, kind: input, shape index: {}]   ;;  %s5151_s11 = inlined_call_operand.hbm [shape: f32[2,1,64], index: 11, kind: input, shape index: {}]   ;;  %s5152_s12 = inlined_call_operand.hbm [shape: bf16[2,64,64], index: 12, kind: input, shape index: {}]   ;;  %s5153_s13 = inlined_call_operand.hbm [shape: f32[2,1,64], index: 13, kind: input, shape index: {}]   ;;  %s5154_s14 = inlined_call_operand.hbm [shape: f32[2,1,64], index: 14, kind: input, shape index: {}]   ;;  %s5155_s15 = inlined_call_operand.hbm [shape: f32[2,1,64], index: 15, kind: input, shape index: {}]   ;;  %s5156_s16 = inlined_call_operand.vmem [shape: bf16[2,64,256], index: 16, kind: input, shape index: {}]   ;;  %s5157_s17 = inlined_call_operand.hbm [shape: f32[2,1,256], index: 17, kind: input, shape index: {}]   ;;  %s5158_s18 = inlined_call_operand.vmem [shape: bf16[2,256,64], index: 18, kind: input, shape index: {}]   ;;  %s5159_s19 = inlined_call_operand.hbm [shape: f32[2,1,64], index: 19, kind: input, shape index: {}]   ;;  %s5160_s20 = inlined_call_operand.vmem [shape: f32[2,24,64], index: 20, kind: output, shape index: {}]  }
   0x1   :  { %5177 = sst [smem:[#allocation32_spill]] %s5140_s0 }
   0x2   :  { %5178 = sst [smem:[#allocation33_spill]] %s5141_s1 }
   0x3   :  { %5179 = sst [smem:[#allocation34_spill]] %s5142_s2 }
   0x4   :  { %5180 = sst [smem:[#allocation35_spill]] %s5143_s3 }
   0x5   :  { %5181 = sst [smem:[#allocation36_spill]] %s5144_s4 }
   0x6   :  { %5182 = sst [smem:[#allocation37_spill]] %s5145_s5 }
   0x7   :  { %5183 = sst [smem:[#allocation38_spill]] %s5146_s6 }
   0x8   :  { %5184 = sst [smem:[#allocation39_spill]] %s5147_s7 }
   0x9   :  { %5185 = sst [smem:[#allocation40_spill]] %s5148_s8 }
   0xa   :  { %5186 = sst [smem:[#allocation41_spill]] %s5149_s9 }
   0xb   :  { %5187 = sst [smem:[#allocation42_spill]] %s5150_s10 }
   0xc   :  { %5188 = sst [smem:[#allocation43_spill]] %s5151_s11 }
   0xd   :  { %5189 = sst [smem:[#allocation44_spill]] %s5152_s12 }
   0xe   :  { %5190 = sst [smem:[#allocation45_spill]] %s5153_s13 }
   0xf   :  { %5191 = sst [smem:[#allocation46_spill]] %s5154_s14 }
  0x10   :  { %5192 = sst [smem:[#allocation47_spill]] %s5155_s15 }
  0x11   :  { %5193 = sst [smem:[#allocation48_spill]] %s5156_s16 }
  0x12   :  { %5194 = sst [smem:[#allocation49_spill]] %s5157_s17 }
  0x13   :  { %5195 = sst [smem:[#allocation50_spill]] %s5158_s18 }
  0x14   :  { %5196 = sst [smem:[#allocation51_spill]] %s5159_s19 }
  0x15   :  { %5197 = sst [smem:[#allocation52_spill]] %s5160_s20 }
  0x16   :  { %25 = vsyncpa [#allocation4], 0 }
  0x17   :  { %26 = vsyncpa [#allocation6], 0  ;;  %s4443_s1 = smov 0   ;;  %s4445_s22 = smov 0  }
  0x18   :  { %s4447_s23 = smov 0   ;;  %s4449_s24 = smov 0  }
  0x19   :  { %s4451_s2 = smov 0   ;;  %s4453_s25 = smov 0  }
  0x1a   :  { %s4455_s3 = smov 0   ;;  %s4457_s26 = smov 0  }
  0x1b LB: > { %5198 = sst [smem:[#allocation21_spill]] %s4287_s22  ;;  %s5163_s27 = sadd.s32 4294967295, %s4311_s26   ;;  %s4311_s26 = sphi %s4457_s26, %s32_s26   ;;  %s4307_s3 = sphi %s4455_s3, %s5253_s3   ;;  %s4303_s25 = sphi %s4453_s25, %s5255_s25   ;;  %s4299_s2 = sphi %s4451_s2, %s5251_s2   ;;  %s4295_s24 = sphi %s4449_s24, %s5254_s24   ;;  %s4291_s23 = sphi %s4447_s23, %s5250_s23   ;;  %s4287_s22 = sphi %s4445_s22, %s5249_s22   ;;  %s4283_s1 = sphi %s4443_s1, %s5248_s1  }
  0x1c   : > { %5199 = sst [smem:[#allocation22_spill]] %s4291_s23  ;;  %s41_s28 = sadd.s32 1, %s4303_s25 }
  0x1d   : > { %5200 = sst [smem:[#allocation23_spill]] %s4295_s24  ;;  %p42_p0 = scmp.ge.s32.totalorder %s41_s28, 2 }
  0x1e   : > { %5201 = sst [smem:[#allocation24_spill]] %s4299_s2  ;;  %s44_s4 = sadd.s32 1, %s4307_s3 }
  0x1f   : > { %5202 = sst [smem:[#allocation25_spill]] %s4307_s3  ;;  %s140_s29 = sadd.s32 1, %s4291_s23 }
  0x20   : > { %5203 = sst [smem:[#allocation26_spill]] %s4311_s26  ;;  %p147_p1 = scmp.ne.s32.totalorder %s4291_s23, %s4287_s22 }
  0x21   : > { %s5257_s28 = smov (%p42_p0, %s41_s28), 0  ;;  %s5259_s4 = smov (!%p42_p0, %s44_s4), %s4307_s3 }
  0x22   : > { %5204 = sst [smem:[#allocation27_spill]] %s5257_s28  ;;  %s137_s30 = ssub.s32 %s4303_s25, %s5257_s28 }
  0x23   : > { %p148_p2 = scmp.eq.s32.totalorder %s4311_s26, 0  ;;  %p46_p3 = scmp.ge.s32.totalorder %s5259_s4, 2 }
  0x24   : > { %p138_p4 = scmp.eq.s32.totalorder %s137_s30, 0  ;;  %p153_p6 = scmp.ne.s32.totalorder %s4287_s22, %s4283_s1 }
  0x25   : > { %p4493_p5 = por %p148_p2, %p147_p1  ;;  %s5261_s4 = smov (%p46_p3, %s5259_s4), 0 }
  0x26   : > { %5206 = sst [smem:[#allocation28_spill]] %s5261_s4  ;;  %p4505_p7 = scmp.eq.s32.totalorder %s5163_s27, 0 }
  0x27   : > { %s4501_s21 = scalar_select %p138_p4, %s4291_s23, %s140_s29  }
  0x28   : > { %s5208_s3 = scalar_select %p4505_p7, 1, 0 }
  0x29   : > { %5207 = sst [smem:[#allocation29_spill]] %s4501_s21  ;;  %p3222_p8 = scmp.ge.s32.totalorder %s4311_s26, 1 }
  0x2a   : > { %5209 = sst [smem:[#allocation30_spill]] %s5208_s3  ;;  %p580_p9 = scmp.lt.s32.totalorder %s4311_s26, 5 }
  0x2b   : > { %p4513_p10 = por %p4505_p7, %p153_p6  ;;  %s4313_s29 = smov [#allocation3]  }
  0x2c   : > { %p4517_p11 = pnand %p3222_p8, %p580_p9  ;;  %s595_s4 = sshll.u32 %s4313_s29, 4  ;;  %s596_s4 = int_to_ptr.vmem [resolvable:$true] %s595_s4 }
  0x2d   : > { %s5210_s30 = scalar_select %p4513_p10, 1, 0 }
  0x2e   : > { %p3622_p12 = pneg %p4517_p11  ;;  %p3665_p13 = scmp.lt.s32.totalorder %s4311_s26, 4 }
  0x2f   : > { %5211 = sst [smem:[#allocation31_spill]] %s5210_s30  ;;  %s4531_s28 = sand.u32 1, %s4291_s23  }
  0x30   : > { %p4526_p0 = pnand %p3622_p12, %p4505_p7  ;;  %p4535_p1 = pnand %p3665_p13, %p4493_p5 }
  0x31   : > { %s628_s20 = sand.u32 1, %s4311_s26   ;;  %s3888_s29 = scalar_lea.vmem %s596_s4, 384 }
  0x32   : > { %p3879_p2 = pneg %p4526_p0  ;;  %p3889_p3 = scmp.ne.s32.totalorder %s596_s4, %s3888_s29 }
  0x33   : > { %p3896_p8 = scmp.lt.s32.totalorder %s596_s4, %s596_s4  ;;  %p3897_p9 = scmp.lt.s32.totalorder %s3888_s29, %s3888_s29 }
  0x34   : > { %p3891_p4 = pnand %p3889_p3, %p3879_p2 }
  0x35   : > { %p3898_p12 = por %p3897_p9, %p3896_p8 }
  0x36   : > { %p3892_p6 = pneg %p3891_p4 }
  0x38   : > { %p3899_p10 = pnand %p3898_p12, %p3892_p6 }
  0x3a   : > { %3902 = shalt.err (!%p3899_p10)
}
  0x3b   : > { %s4314_s23 = smov 128   ;;  %s4315_s0 = smov 8  }
  0x3c   : > { %s5215_s10 = sld [smem:[#allocation34_spill]]  ;;  %s4551_s8 = sshll.u32 %s4303_s25, 4 }
  0x3d   : > { %s631_s6 = scalar_lea.vmem [#allocation7], %s4531_s28  ;;  %s5216_s30 = sld [smem:[#allocation36_spill]] }
  0x3e   : > { %s638_s24 = sshll.u32 %s631_s6, 4  ;;  %s4558_s26 = scalar_lea.sflag [#allocation4], %s628_s20  ;;  %s639_s24 = int_to_ptr.vmem [resolvable:$true] %s638_s24 }
  0x3f   : > { %p4562_p5 = pneg %p4535_p1  ;;  %s3916_s16 = scalar_lea.vmem %s639_s24, 16 }
  0x40   : > { %p3917_p10 = scmp.ne.s32.totalorder %s639_s24, %s3916_s16 }
  0x42   : > { %3625 = dma.hbm_to_vmem [thread:$0]  (!%p4526_p0), %s5215_s10, 384, %s596_s4, [#allocation4], %s4314_s23, %s4314_s23, %s4315_s0  }
  0x43   : > { %s636_s22 = scalar_lea.hbm %s5216_s30, %s4551_s8  ;;  %p3919_p13 = pnand %p3917_p10, %p4562_p5 }
  0x44   : > { %s4316_s10 = smov [#allocation7]  }
  0x45   : > { %p3920_p3 = pneg %p3919_p13  ;;  %s3921_s6 = sshll.u32 %s4316_s10, 4  ;;  %s3922_s6 = int_to_ptr.vmem [resolvable:$false] %s3921_s6 }
  0x46   : > { %s3923_s18 = scalar_lea.vmem %s3922_s6, 32  ;;  %p3924_p4 = scmp.lt.s32.totalorder %s639_s24, %s3922_s6 }
  0x47   : > { %p3925_p6 = scmp.lt.s32.totalorder %s3923_s18, %s3916_s16 }
  0x49   : > { %p3926_p8 = por %p3925_p6, %p3924_p4 }
  0x4b   : > { %p3927_p9 = pnand %p3926_p8, %p3920_p3 }
  0x4d   : > { %3930 = shalt.err (!%p3927_p9)
}
  0x4e   : > { %3632 = dma.hbm_to_vmem [thread:$0]  (!%p4535_p1), %s636_s22, 16, %s639_s24, %s4558_s26  }
  0x4f   : > { %s5218_s5 = sld [smem:[#allocation37_spill]]  ;;  %s648_s4 = scalar_lea.vmem [#allocation8], %s4531_s28 }
  0x50   : > { %s655_s30 = sshll.u32 %s648_s4, 4  ;;  %s5219_s7 = sld [smem:[#allocation39_spill]]  ;;  %s656_s30 = int_to_ptr.vmem [resolvable:$true] %s655_s30 }
  0x51   : > { %s3944_s10 = scalar_lea.vmem %s656_s30, 16  ;;  %s4317_s6 = smov [#allocation8]  }
  0x52   : > { %p3945_p12 = scmp.ne.s32.totalorder %s656_s30, %s3944_s10  ;;  %s3949_s18 = sshll.u32 %s4317_s6, 4  ;;  %s3950_s18 = int_to_ptr.vmem [resolvable:$false] %s3949_s18 }
  0x53   : > { %s3951_s22 = scalar_lea.vmem %s3950_s18, 32  ;;  %p3952_p3 = scmp.lt.s32.totalorder %s656_s30, %s3950_s18 }
  0x54   : > { %p3947_p10 = pnand %p3945_p12, %p4562_p5  ;;  %p3953_p4 = scmp.lt.s32.totalorder %s3951_s22, %s3944_s10 }
  0x55   : > { %s653_s2 = scalar_lea.hbm %s5218_s5, %s4551_s8 }
  0x56   : > { %s678_s16 = scalar_lea.hbm %s5219_s7, %s4551_s8  ;;  %p3948_p13 = pneg %p3947_p10 }
  0x57   : > { %p3954_p6 = por %p3953_p4, %p3952_p3 }
  0x59   : > { %p3955_p8 = pnand %p3954_p6, %p3948_p13 }
  0x5b   : > { %3958 = shalt.err (!%p3955_p8)
}
  0x5c   : > { %3635 = dma.hbm_to_vmem [thread:$0]  (!%p4535_p1), %s653_s2, 16, %s656_s30, %s4558_s26  }
  0x5d   : > { %s673_s24 = scalar_lea.vmem [#allocation9], %s4531_s28  ;;  %s5220_s9 = sld [smem:[#allocation41_spill]] }
  0x5e   : > { %s680_s20 = sshll.u32 %s673_s24, 4  ;;  %s4318_s10 = smov [#allocation9]   ;;  %s681_s20 = int_to_ptr.vmem [resolvable:$true] %s680_s20 }
  0x5f   : > { %s3972_s29 = scalar_lea.vmem %s681_s20, 16  ;;  %s3977_s6 = sshll.u32 %s4318_s10, 4  ;;  %s3978_s6 = int_to_ptr.vmem [resolvable:$false] %s3977_s6 }
  0x60   : > { %p3973_p9 = scmp.ne.s32.totalorder %s681_s20, %s3972_s29  ;;  %s3979_s18 = scalar_lea.vmem %s3978_s6, 32 }
  0x61   : > { %p3980_p13 = scmp.lt.s32.totalorder %s681_s20, %s3978_s6  ;;  %p3981_p3 = scmp.lt.s32.totalorder %s3979_s18, %s3972_s29 }
  0x62   : > { %p3975_p12 = pnand %p3973_p9, %p4562_p5 }
  0x63   : > { %s703_s0 = scalar_lea.hbm %s5220_s9, %s4551_s8  ;;  %p3982_p4 = por %p3981_p3, %p3980_p13 }
  0x64   : > { %p3976_p10 = pneg %p3975_p12 }
  0x66   : > { %p3983_p6 = pnand %p3982_p4, %p3976_p10 }
  0x68   : > { %3986 = shalt.err (!%p3983_p6)
}
  0x69   : > { %3638 = dma.hbm_to_vmem [thread:$0]  (!%p4535_p1), %s678_s16, 16, %s681_s20, %s4558_s26  }
  0x6a   : > { %s698_s22 = scalar_lea.vmem [#allocation10], %s4531_s28  ;;  %s5221_s11 = sld [smem:[#allocation43_spill]] }
  0x6b   : > { %s705_s24 = sshll.u32 %s698_s22, 4  ;;  %s4319_s6 = smov [#allocation10]   ;;  %s706_s24 = int_to_ptr.vmem [resolvable:$true] %s705_s24 }
  0x6c   : > { %s4000_s10 = scalar_lea.vmem %s706_s24, 16  ;;  %s4005_s18 = sshll.u32 %s4319_s6, 4  ;;  %s4006_s18 = int_to_ptr.vmem [resolvable:$false] %s4005_s18 }
  0x6d   : > { %p4001_p8 = scmp.ne.s32.totalorder %s706_s24, %s4000_s10  ;;  %s4007_s2 = scalar_lea.vmem %s4006_s18, 32 }
  0x6e   : > { %p4008_p10 = scmp.lt.s32.totalorder %s706_s24, %s4006_s18  ;;  %p4009_p13 = scmp.lt.s32.totalorder %s4007_s2, %s4000_s10 }
  0x6f   : > { %p4003_p9 = pnand %p4001_p8, %p4562_p5 }
  0x70   : > { %s728_s29 = scalar_lea.hbm %s5221_s11, %s4551_s8  ;;  %p4010_p3 = por %p4009_p13, %p4008_p10 }
  0x71   : > { %p4004_p12 = pneg %p4003_p9 }
  0x73   : > { %p4011_p4 = pnand %p4010_p3, %p4004_p12 }
  0x75   : > { %4014 = shalt.err (!%p4011_p4)
}
  0x76   : > { %3641 = dma.hbm_to_vmem [thread:$0]  (!%p4535_p1), %s703_s0, 16, %s706_s24, %s4558_s26  }
  0x77   : > { %s723_s30 = scalar_lea.vmem [#allocation11], %s4531_s28  ;;  %s3231_s23 = sshll.u32 %s4531_s28, 5 }
  0x78   : > { %s730_s22 = sshll.u32 %s723_s30, 4  ;;  %s4320_s10 = smov [#allocation11]   ;;  %s731_s22 = int_to_ptr.vmem [resolvable:$true] %s730_s22 }
  0x79   : > { %s4028_s4 = scalar_lea.vmem %s731_s22, 16  ;;  %s4033_s6 = sshll.u32 %s4320_s10, 4  ;;  %s4034_s6 = int_to_ptr.vmem [resolvable:$false] %s4033_s6 }
  0x7a   : > { %p4029_p6 = scmp.ne.s32.totalorder %s731_s22, %s4028_s4  ;;  %s4035_s18 = scalar_lea.vmem %s4034_s6, 32 }
  0x7b   : > { %p4036_p12 = scmp.lt.s32.totalorder %s731_s22, %s4034_s6  ;;  %p4037_p10 = scmp.lt.s32.totalorder %s4035_s18, %s4028_s4 }
  0x7c   : > { %p4031_p8 = pnand %p4029_p6, %p4562_p5 }
  0x7d   : > { %p4038_p13 = por %p4037_p10, %p4036_p12 }
  0x7e   : > { %p4032_p9 = pneg %p4031_p8 }
  0x80   : > { %p4039_p3 = pnand %p4038_p13, %p4032_p9 }
  0x82   : > { %4042 = shalt.err (!%p4039_p3)
}
  0x83   : > { %3644 = dma.hbm_to_vmem [thread:$0]  (!%p4535_p1), %s728_s29, 16, %s731_s22, %s4558_s26  }
  0x84   : > { %s3351_s2 = sshll.u32 %s4303_s25, 9  ;;  %s741_s16 = scalar_lea.vmem [#allocation12], %s3231_s23 }
  0x85   : > { %s748_s20 = sshll.u32 %s741_s16, 4  ;;  %s5222_s12 = sld [smem:[#allocation44_spill]]  ;;  %s749_s20 = int_to_ptr.vmem [resolvable:$true] %s748_s20 }
  0x86   : > { %s4056_s6 = scalar_lea.vmem %s749_s20, 512  ;;  %s4321_s18 = smov [#allocation12]  }
  0x87   : > { %p4057_p4 = scmp.ne.s32.totalorder %s749_s20, %s4056_s6  ;;  %s4061_s0 = sshll.u32 %s4321_s18, 4  ;;  %s4062_s0 = int_to_ptr.vmem [resolvable:$false] %s4061_s0 }
  0x88   : > { %s4063_s24 = scalar_lea.vmem %s4062_s0, 1024  ;;  %p4064_p9 = scmp.lt.s32.totalorder %s749_s20, %s4062_s0 }
  0x89   : > { %p4059_p6 = pnand %p4057_p4, %p4562_p5  ;;  %p4065_p12 = scmp.lt.s32.totalorder %s4063_s24, %s4056_s6 }
  0x8b   : > { %s747_s4 = scalar_lea.hbm %s5222_s12, %s3351_s2  ;;  %p4060_p8 = pneg %p4059_p6 }
  0x8c   : > { %p4066_p10 = por %p4065_p12, %p4064_p9 }
  0x8e   : > { %p4067_p13 = pnand %p4066_p10, %p4060_p8 }
  0x90   : > { %4070 = shalt.err (!%p4067_p13)
}
  0x91   : > { %s4322_s29 = smov 64   ;;  %s4323_s22 = smov 4  }
  0x92   : > { %3647 = dma.hbm_to_vmem [thread:$0]  (!%p4535_p1), %s747_s4, 512, %s749_s20, %s4558_s26, %s4322_s29, %s4322_s29, %s4323_s22  }
  0x93   : > { %s5223_s13 = sld [smem:[#allocation45_spill]]  ;;  %s761_s30 = scalar_lea.vmem [#allocation13], %s4531_s28 }
  0x94   : > { %s768_s10 = sshll.u32 %s761_s30, 4  ;;  %s5224_s14 = sld [smem:[#allocation46_spill]]  ;;  %s769_s10 = int_to_ptr.vmem [resolvable:$true] %s768_s10 }
  0x95   : > { %s4084_s24 = scalar_lea.vmem %s769_s10, 16  ;;  %s4324_s5 = smov [#allocation13]  }
  0x96   : > { %p4085_p3 = scmp.ne.s32.totalorder %s769_s10, %s4084_s24  ;;  %s4089_s7 = sshll.u32 %s4324_s5, 4  ;;  %s4090_s7 = int_to_ptr.vmem [resolvable:$false] %s4089_s7 }
  0x97   : > { %s4091_s20 = scalar_lea.vmem %s4090_s7, 32  ;;  %p4092_p8 = scmp.lt.s32.totalorder %s769_s10, %s4090_s7 }
  0x98   : > { %p4087_p4 = pnand %p4085_p3, %p4562_p5  ;;  %p4093_p9 = scmp.lt.s32.totalorder %s4091_s20, %s4084_s24 }
  0x99   : > { %s766_s16 = scalar_lea.hbm %s5223_s13, %s4551_s8 }
  0x9a   : > { %s783_s0 = scalar_lea.hbm %s5224_s14, %s4551_s8  ;;  %p4088_p6 = pneg %p4087_p4 }
  0x9b   : > { %p4094_p12 = por %p4093_p9, %p4092_p8 }
  0x9d   : > { %p4095_p10 = pnand %p4094_p12, %p4088_p6 }
  0x9f   : > { %4098 = shalt.err (!%p4095_p10)
}
  0xa0   : > { %3650 = dma.hbm_to_vmem [thread:$0]  (!%p4535_p1), %s766_s16, 16, %s769_s10, %s4558_s26  }
  0xa1   : > { %s778_s4 = scalar_lea.vmem [#allocation14], %s4531_s28  ;;  %s5225_s15 = sld [smem:[#allocation47_spill]] }
  0xa2   : > { %s785_s29 = sshll.u32 %s778_s4, 4  ;;  %s4325_s7 = smov [#allocation14]   ;;  %s786_s29 = int_to_ptr.vmem [resolvable:$true] %s785_s29 }
  0xa3   : > { %s4112_s2 = scalar_lea.vmem %s786_s29, 16  ;;  %s4117_s30 = sshll.u32 %s4325_s7, 4  ;;  %s4118_s30 = int_to_ptr.vmem [resolvable:$false] %s4117_s30 }
  0xa4   : > { %p4113_p13 = scmp.ne.s32.totalorder %s786_s29, %s4112_s2  ;;  %s4119_s6 = scalar_lea.vmem %s4118_s30, 32 }
  0xa5   : > { %p4120_p6 = scmp.lt.s32.totalorder %s786_s29, %s4118_s30  ;;  %p4121_p8 = scmp.lt.s32.totalorder %s4119_s6, %s4112_s2 }
  0xa6   : > { %p4115_p3 = pnand %p4113_p13, %p4562_p5 }
  0xa7   : > { %s800_s5 = scalar_lea.hbm %s5225_s15, %s4551_s8  ;;  %p4122_p9 = por %p4121_p8, %p4120_p6 }
  0xa8   : > { %p4116_p4 = pneg %p4115_p3 }
  0xaa   : > { %p4123_p12 = pnand %p4122_p9, %p4116_p4 }
  0xac   : > { %4126 = shalt.err (!%p4123_p12)
}
  0xad   : > { %3653 = dma.hbm_to_vmem [thread:$0]  (!%p4535_p1), %s783_s0, 16, %s786_s29, %s4558_s26  }
  0xae   : > { %s795_s18 = scalar_lea.vmem [#allocation15], %s4531_s28  ;;  %s3237_s20 = sshll.u32 %s4531_s28, 1 }
  0xaf   : > { %s802_s24 = sshll.u32 %s795_s18, 4  ;;  %s4326_s22 = smov [#allocation15]   ;;  %s803_s24 = int_to_ptr.vmem [resolvable:$true] %s802_s24 }
  0xb0   : > { %s4140_s4 = scalar_lea.vmem %s803_s24, 16  ;;  %s4145_s23 = sshll.u32 %s4326_s22, 4  ;;  %s4146_s23 = int_to_ptr.vmem [resolvable:$false] %s4145_s23 }
  0xb1   : > { %p4141_p10 = scmp.ne.s32.totalorder %s803_s24, %s4140_s4  ;;  %s4147_s2 = scalar_lea.vmem %s4146_s23, 32 }
  0xb2   : > { %p4148_p4 = scmp.lt.s32.totalorder %s803_s24, %s4146_s23  ;;  %p4149_p6 = scmp.lt.s32.totalorder %s4147_s2, %s4140_s4 }
  0xb3   : > { %p4143_p13 = pnand %p4141_p10, %p4562_p5 }
  0xb4   : > { %p4150_p8 = por %p4149_p6, %p4148_p4 }
  0xb5   : > { %p4144_p3 = pneg %p4143_p13 }
  0xb7   : > { %p4151_p9 = pnand %p4150_p8, %p4144_p3 }
  0xb9   : > { %4154 = shalt.err (!%p4151_p9)
}
  0xba   : > { %3656 = dma.hbm_to_vmem [thread:$0]  (!%p4535_p1), %s800_s5, 16, %s803_s24, %s4558_s26  }
  0xbb   : > { %s3352_s7 = sshll.u32 %s4303_s25, 5  ;;  %s821_s30 = scalar_lea.vmem [#allocation16], %s3237_s20 }
  0xbc   : > { %s829_s6 = sshll.u32 %s821_s30, 4  ;;  %s5226_s17 = sld [smem:[#allocation49_spill]]  ;;  %s830_s6 = int_to_ptr.vmem [resolvable:$true] %s829_s6 }
  0xbd   : > { %s4168_s4 = scalar_lea.vmem %s830_s6, 32  ;;  %s4327_s22 = smov [#allocation16]  }
  0xbe   : > { %p4169_p12 = scmp.ne.s32.totalorder %s830_s6, %s4168_s4  ;;  %s4173_s23 = sshll.u32 %s4327_s22, 4  ;;  %s4174_s23 = int_to_ptr.vmem [resolvable:$false] %s4173_s23 }
  0xbf   : > { %s4175_s2 = scalar_lea.vmem %s4174_s23, 64  ;;  %p4176_p3 = scmp.lt.s32.totalorder %s830_s6, %s4174_s23 }
  0xc0   : > { %p4171_p10 = pnand %p4169_p12, %p4562_p5  ;;  %p4177_p4 = scmp.lt.s32.totalorder %s4175_s2, %s4168_s4 }
  0xc2   : > { %s827_s18 = scalar_lea.hbm %s5226_s17, %s3352_s7  ;;  %p4172_p13 = pneg %p4171_p10 }
  0xc3   : > { %p4178_p6 = por %p4177_p4, %p4176_p3 }
  0xc5   : > { %p4179_p8 = pnand %p4178_p6, %p4172_p13 }
  0xc7   : > { %4182 = shalt.err (!%p4179_p8)
}
  0xc8   : > { %3659 = dma.hbm_to_vmem [thread:$0]  (!%p4535_p1), %s827_s18, 32, %s830_s6, %s4558_s26  }
  0xc9   : > { %s4328_s5 = smov [#allocation5]   ;;  %s5227_s19 = sld [smem:[#allocation51_spill]] }
  0xca   : > { %s609_s24 = sshll.u32 %s4328_s5, 4  ;;  %s847_s7 = scalar_lea.vmem [#allocation17], %s4531_s28  ;;  %s610_s24 = int_to_ptr.vmem [resolvable:$true] %s609_s24 }
  0xcb   : > { %s854_s30 = sshll.u32 %s847_s7, 4  ;;  %s4194_s16 = scalar_lea.vmem %s610_s24, 16  ;;  %s855_s30 = int_to_ptr.vmem [resolvable:$true] %s854_s30 }
  0xcc   : > { %p4195_p9 = scmp.ne.s32.totalorder %s610_s24, %s4194_s16  ;;  %s4201_s10 = scalar_lea.vmem %s610_s24, 32 }
  0xcd   : > { %p4202_p13 = scmp.lt.s32.totalorder %s610_s24, %s610_s24  ;;  %p4203_p3 = scmp.lt.s32.totalorder %s4201_s10, %s4194_s16 }
  0xce   : > { %p4197_p12 = pnand %p4195_p9, %p3879_p2 }
  0xcf   : > { %s852_s29 = scalar_lea.hbm %s5227_s19, %s4551_s8  ;;  %p4204_p4 = por %p4203_p3, %p4202_p13 }
  0xd0   : > { %p4198_p10 = pneg %p4197_p12 }
  0xd2   : > { %p4205_p6 = pnand %p4204_p4, %p4198_p10 }
  0xd4   : > { %4208 = shalt.err (!%p4205_p6)
}
  0xd5   : > { %s5228_s4 = sld [smem:[#allocation35_spill]]  ;;  %s4222_s28 = scalar_lea.vmem %s855_s30, 16 }
  0xd6   : > { %p4223_p8 = scmp.ne.s32.totalorder %s855_s30, %s4222_s28  ;;  %s4329_s22 = smov [#allocation17]  }
  0xd7   : > { %s4227_s23 = sshll.u32 %s4329_s22, 4  ;;  %s4228_s23 = int_to_ptr.vmem [resolvable:$false] %s4227_s23 }
  0xd8   : > { %p4225_p7 = pnand %p4223_p8, %p4562_p5  ;;  %s4229_s2 = scalar_lea.vmem %s4228_s23, 32 }
  0xd9   : > { %p4230_p9 = scmp.lt.s32.totalorder %s855_s30, %s4228_s23  ;;  %p4231_p12 = scmp.lt.s32.totalorder %s4229_s2, %s4222_s28 }
  0xda   : > { %p4226_p2 = pneg %p4225_p7 }
  0xdb   : > { %3628 = dma.hbm_to_vmem [thread:$0]  (!%p4526_p0), %s5228_s4, 16, %s610_s24, [#allocation6]  }
  0xdc   : > { %p4232_p10 = por %p4231_p12, %p4230_p9 }
  0xde   : > { %p4233_p13 = pnand %p4232_p10, %p4226_p2 }
  0xe0   : > { %4236 = shalt.err (!%p4233_p13)
}
  0xe1   : > { %3662 = dma.hbm_to_vmem [thread:$0]  (!%p4535_p1), %s852_s29, 16, %s855_s30, %s4558_s26  }
  0xe2   : > { %863 = sbr.rel (%p4517_p11) target bundleno = 4045 (0xfcd), region = 100  ;;  %s5229_s3 = sld [smem:[#allocation30_spill]] (!%p4517_p11) }
  0xe8   : > { %p5230_p7 = scmp.ne.s32.totalorder %s5229_s3, 0 }
  0xea   : > { %4270 = dma.done.wait (%p5230_p7), [#allocation4], 384  }
  0xeb   : > { %4272 = vsyncadd (%p5230_p7), [#allocation4], 4294966912 }
  0xec   : > { %4274 = dma.done.wait (%p5230_p7), [#allocation6], 16  }
  0xed   : > { %4276 = vsyncadd (%p5230_p7), [#allocation6], 4294967280  ;;  %s5231_s21 = sld [smem:[#allocation26_spill]] }
  0xee   : > { %s5233_s20 = sld [smem:[#allocation21_spill]] }
  0xef   : > { %s5234_s8 = sld [smem:[#allocation31_spill]] }
  0xf3   : > { %s5232_s24 = sadd.s32 4294967295, %s5231_s21  }
  0xf4   : > { %s873_s26 = sand.u32 1, %s5232_s24   ;;  %s4722_s0 = sand.u32 1, %s5233_s20  }
  0xf5   : > { %s874_s1 = scalar_lea.sflag [#allocation4], %s873_s26  ;;  %p5235_p11 = scmp.ne.s32.totalorder %s5234_s8, 0 }
  0xf7   : > { %4278 = dma.done.wait (%p5235_p11), %s874_s1, 688  }
  0xf8   : > { %4280 = vsyncadd (%p5235_p11), %s874_s1, 4294966608  ;;  %s5236_s7 = sld [smem:[#allocation24_spill]]  ;;  %s3244_s16 = sshll.u32 %s4722_s0, 5 }
  0xf9   : > { %s5237_s30 = sld [smem:[#allocation23_spill]]  ;;  %s3245_s10 = sshll.u32 %s4722_s0, 1 }
  0xfa   : > { %s5238_s2 = sld [smem:[#allocation32_spill]]  ;;  %s884_s9 = scalar_lea.vmem [#allocation8], %s4722_s0 }
  0xfb   : > { %s5239_s21 = sld [smem:[#allocation38_spill]]  ;;  %s900_s29 = scalar_lea.vmem [#allocation10], %s4722_s0 }
  0xfc   : > { %s5240_s26 = sld [smem:[#allocation40_spill]]  ;;  %s4774_s19 = scalar_lea.vmem [#allocation12], %s3244_s16 }
  0xfd   : > { %s5241_s11 = sld [smem:[#allocation42_spill]]  ;;  %s933_s22 = scalar_lea.vmem [#allocation14], %s4722_s0 }
  0xfe   : > { %p1086_p0 = scmp.lt.s32.totalorder %s5236_s7, 1  ;;  %s5242_s23 = sld [smem:[#allocation48_spill]] }
  0xff   : > { %p1091_p1 = scmp.lt.s32.totalorder %s5237_s30, 1  ;;  %s5243_s13 = sld [smem:[#allocation50_spill]] }
 0x100   : > { %s5263_s7 = smov (!%p1086_p0, %s5236_s7), 1  ;;  %s5244_s15 = sld [smem:[#allocation52_spill]] }
 0x101   : > { %s1092_s6 = scalar_select %p1091_p1, %s5237_s30, 1 }
 0x102   : > { %s3590_s18 = smul.u32 48, %s5263_s7  ;;  %p3258_p5 = scmp.ne.s32.totalorder %s5237_s30, 0 }
 0x103   : > { %s3353_s4 = sshll.u32 %s1092_s6, 5  ;;  %s3356_s28 = sshll.u32 %s1092_s6, 6 }
 0x104   : > { %s4738_s27 = scalar_lea.vmem %s5238_s2, %s3590_s18  ;;  %s4743_s24 = scalar_lea.vmem %s5239_s21, %s3353_s4 }
 0x105   : > { %s4748_s1 = scalar_lea.vmem %s5240_s26, %s3353_s4  ;;  %s4753_s12 = scalar_lea.vmem %s5241_s11, %s3353_s4 }
 0x106   : > { %s4758_s2 = scalar_lea.vmem %s5242_s23, %s3356_s28  ;;  %s3357_s5 = sshll.u32 %s1092_s6, 7 }
 0x107   : > { %s4763_s14 = scalar_lea.vmem %s5243_s13, %s3357_s5  ;;  %s3591_s20 = smul.u32 24, %s5263_s7 }
 0x108   : > { %s892_s11 = scalar_lea.vmem [#allocation9], %s4722_s0  ;;  %s908_s4 = scalar_lea.vmem [#allocation11], %s4722_s0 }
 0x109   : > { %s4768_s17 = scalar_lea.vmem %s5244_s15, %s3591_s20  ;;  %s925_s28 = scalar_lea.vmem [#allocation13], %s4722_s0 }
 0x10a   : > { %s941_s6 = scalar_lea.vmem [#allocation15], %s4722_s0  ;;  %s4779_s18 = scalar_lea.vmem [#allocation16], %s3245_s10 }
 0x10b   : > { %s958_s23 = scalar_lea.vmem [#allocation17], %s4722_s0  ;;  %1125 = sbr.rel (%p3258_p5) target bundleno = 522 (0x20a), region = 156 }
 0x10c   : > { %s5245_s5 = sld [smem:[#allocation33_spill]] (!%p3258_p5) }
 0x110   : > { %v4330_v1 = vmov 0   ;;  %v1127_v5 = vld [vmem:[%s4738_s27 + $0x8] sm:$0xff]  ;;  %v1129_v6 = vld [vmem:[%s4738_s27 + $0x18] sm:$0xff]  ;;  %vm1235_vm0 = vcmask 523264   ;;  %v1126_v18 = vld [vmem:[%s4738_s27] sm:$0xff] }
 0x111   : > { %1242 = vmatprep.subr.bf16.mxu0 %v4330_v1  ;;  %3554 = vmatprep.subr.bf16.mxu1 %v4330_v1  ;;  %v1131_v7 = vld [vmem:[%s4738_s27 + $0x28] sm:$0xff]  ;;  %v1133_v8 = vpack.c.bf16 %v1129_v6, %v1127_v5  ;;  %v1128_v19 = vld [vmem:[%s4738_s27 + $0x10] sm:$0xff]  ;;  %v1130_v20 = vld [vmem:[%s4738_s27 + $0x20] sm:$0xff] }
 0x112   : > { %v3746_v0 = vld [vmem:[%s5245_s5 + $0x38] sm:$0xff]   ;;  %v3747_v2 = vld [vmem:[%s5245_s5 + $0x30] sm:$0xff]   ;;  %v3748_v3 = vld [vmem:[%s5245_s5 + $0x28] sm:$0xff]   ;;  %v1135_v9 = vpack.c.bf16 %v1131_v7, %v1131_v7  ;;  %v1132_v21 = vpack.c.bf16 %v1128_v19, %v1126_v18  ;;  %v1134_v22 = vpack.c.bf16 %v1130_v20, %v1130_v20 }
 0x113   : > { %1243 = vmatpush1.bf16.msra.mxu0 %v3746_v0  ;;  %3566 = vmatpush1.bf16.msra.mxu1 %v3746_v0  ;;  %v3749_v4 = vld [vmem:[%s5245_s5 + $0x20] sm:$0xff]   ;;  %v3750_v10 = vld [vmem:[%s5245_s5 + $0x18] sm:$0xff]   ;;  %v3751_v11 = vld [vmem:[%s5245_s5 + $0x10] sm:$0xff]  }
 0x114   : > { %1244 = vmatprep.subr.bf16.mxu0 %v4330_v1  ;;  %3555 = vmatprep.subr.bf16.mxu1 %v4330_v1  ;;  %v3752_v12 = vld [vmem:[%s5245_s5 + $0x8] sm:$0xff]   ;;  %v3753_v13 = vld [vmem:[%s5245_s5] sm:$0xff]   ;;  %v3754_v14 = vld [vmem:[%s5245_s5 + $0x58] sm:$0xff]  }
 0x115   : > { %3271 = vmatprep.mubr.msk.bf16.mxu0 %vm1235_vm0, %v1133_v8  ;;  %3272 = vmatprep.mubr.msk.bf16.mxu1 %vm1235_vm0, %v1135_v9  ;;  %v3755_v15 = vld [vmem:[%s5245_s5 + $0x50] sm:$0xff]   ;;  %v3756_v16 = vld [vmem:[%s5245_s5 + $0x48] sm:$0xff]   ;;  %v3757_v17 = vld [vmem:[%s5245_s5 + $0x40] sm:$0xff]  }
 0x116   : > { %v1160_v23 = vld [vmem:[#allocation3] sm:$0xff]  ;;  %v1162_v24 = vld [vmem:[#allocation3 + $0x10] sm:$0xff]  ;;  %v1161_v31 = vld [vmem:[#allocation3 + $0x8] sm:$0xff] }
 0x117   : > { %1245 = vmatpush1.bf16.msra.mxu0 %v3747_v2  ;;  %3567 = vmatpush1.bf16.msra.mxu1 %v3747_v2 }
 0x118   : > { %1246 = vmatprep.subr.bf16.mxu0 %v4330_v1  ;;  %3556 = vmatprep.subr.bf16.mxu1 %v4330_v1 }
 0x11b   : > { %1247 = vmatpush1.bf16.msra.mxu0 %v3748_v3  ;;  %3568 = vmatpush1.bf16.msra.mxu1 %v3748_v3 }
 0x11c   : > { %1248 = vmatprep.subr.bf16.mxu0 %v4330_v1  ;;  %3557 = vmatprep.subr.bf16.mxu1 %v4330_v1 }
 0x11f   : > { %1249 = vmatpush1.bf16.msra.mxu0 %v3749_v4  ;;  %3569 = vmatpush1.bf16.msra.mxu1 %v3749_v4 }
 0x120   : > { %1250 = vmatprep.subr.bf16.mxu0 %v4330_v1  ;;  %3558 = vmatprep.subr.bf16.mxu1 %v4330_v1 }
 0x123   : > { %1251 = vmatpush1.bf16.msra.mxu0 %v3750_v10  ;;  %3570 = vmatpush1.bf16.msra.mxu1 %v3750_v10 }
 0x124   : > { %1252 = vmatprep.subr.bf16.mxu0 %v4330_v1  ;;  %3559 = vmatprep.subr.bf16.mxu1 %v4330_v1 }
 0x127   : > { %1253 = vmatpush1.bf16.msra.mxu0 %v3751_v11  ;;  %3571 = vmatpush1.bf16.msra.mxu1 %v3751_v11 }
 0x128   : > { %1254 = vmatprep.subr.bf16.mxu0 %v4330_v1  ;;  %3560 = vmatprep.subr.bf16.mxu1 %v4330_v1 }
 0x12b   : > { %1255 = vmatpush1.bf16.msra.mxu0 %v3752_v12  ;;  %3572 = vmatpush1.bf16.msra.mxu1 %v3752_v12 }
 0x12c   : > { %1256 = vmatprep.subr.bf16.mxu0 %v4330_v1  ;;  %3561 = vmatprep.subr.bf16.mxu1 %v4330_v1 }
 0x12f   : > { %1257 = vmatpush1.bf16.msra.mxu0 %v3753_v13  ;;  %3573 = vmatpush1.bf16.msra.mxu1 %v3753_v13 }
 0x130   : > { %1266 = vmatprep.subr.bf16.mxu0 %v4330_v1  ;;  %3562 = vmatprep.subr.bf16.mxu1 %v4330_v1 }
 0x133   : > { %1267 = vmatpush2.bf16.msra.mxu0 %v3754_v14  ;;  %3574 = vmatpush2.bf16.msra.mxu1 %v3754_v14 }
 0x134   : > { %1268 = vmatprep.subr.bf16.mxu0 %v4330_v1  ;;  %3563 = vmatprep.subr.bf16.mxu1 %v4330_v1 }
 0x137   : > { %1269 = vmatpush2.bf16.msra.mxu0 %v3755_v15  ;;  %3575 = vmatpush2.bf16.msra.mxu1 %v3755_v15 }
 0x138   : > { %1270 = vmatprep.subr.bf16.mxu0 %v4330_v1  ;;  %3564 = vmatprep.subr.bf16.mxu1 %v4330_v1 }
 0x13b   : > { %1271 = vmatpush2.bf16.msra.mxu0 %v3756_v16  ;;  %3576 = vmatpush2.bf16.msra.mxu1 %v3756_v16 }
 0x13c   : > { %1272 = vmatprep.subr.bf16.mxu0 %v4330_v1  ;;  %3565 = vmatprep.subr.bf16.mxu1 %v4330_v1 }
 0x13f   : > { %1273 = vmatpush2.bf16.msra.mxu0 %v3757_v17  ;;  %3577 = vmatpush2.bf16.msra.mxu1 %v3757_v17 }
 0x142   : > { %1275 = vmatmul.mubr.bf16.vlgmr.msra.gmra.mxu0 %v1132_v21  ;;  %1283 = vmatmul.mubr.bf16.vlgmr.msra.gmra.mxu1 %v1134_v22 }
 0x202   : > { %v1276_v25 = vpop.f32.mrf.mxu0  ;;  %v1284_v26 = vpop.f32.mrf.mxu1 }
 0x203   : > { %v1277_v27 = vadd.f32 %v1276_v25, %v1160_v23  ;;  %v1285_v28 = vadd.f32 %v1284_v26, %v1162_v24 }
 0x204   : > { %v1278_v29 = vpop.f32.mrf.mxu0  ;;  %v1286_v30 = vpop.f32.mrf.mxu1 }
 0x205   : > { %1290 = vst.msk [vmem:[%s4768_s17] sm:$0xff] %vm1235_vm0, %v1277_v27  ;;  %1292 = vst.msk [vmem:[%s4768_s17 + $0x10] sm:$0xff] %vm1235_vm0, %v1285_v28 }
 0x206   : > { %v1279_v32 = vpop.f32.mrf.mxu0  ;;  %v1287_v33 = vpop.f32.mrf.mxu1 }
 0x207   : > { %v1280_v34 = vadd.f32 %v1279_v32, %v1161_v31 }
 0x208   : > { %v1281_v35 = vpop.f32.mrf.mxu0  ;;  %v1288_v36 = vpop.f32.mrf.mxu1 }
 0x209   : > { %1291 = vst.msk [vmem:[%s4768_s17 + $0x8] sm:$0xff] %vm1235_vm0, %v1280_v34 }
 0x20a PF: > { %vm1298_vm1 = vcmask 523264   ;;  %v3758_v58 = vld [vmem:[%s4743_s24 + $0x18] sm:$0xff]   ;;  %v3760_v60 = vld [vmem:[%s4743_s24 + $0x10] sm:$0xff]   ;;  %v3762_v62 = vld [vmem:[%s4743_s24 + $0x8] sm:$0xff]   ;;  %vm1742_vm2 = vcmask 1043456   ;;  %vm1637_vm3 = vcmask 130048  }
 0x20b   : > { %v3759_v59 = vld [vmem:[%s4753_s12 + $0x18] sm:$0xff]   ;;  %v3761_v61 = vld [vmem:[%s4753_s12 + $0x10] sm:$0xff]   ;;  %3442 = vmatprep.subr.bf16.mxu1 %v3758_v58  ;;  %v3763_v63 = vld [vmem:[%s4753_s12 + $0x8] sm:$0xff]   ;;  %s4331_s27 = smov 112   ;;  %vm1698_vm4 = vcmask 195584   ;;  %vm1980_vm5 = vcmask 261248  }
 0x20c   : > { %v1293_v37 = vld [vmem:[%s4768_s17] sm:$0xff]  ;;  %v1295_v38 = vld [vmem:[%s4768_s17 + $0x10] sm:$0xff]  ;;  %3466 = vmatprep.subr.bf16.mxu0 %v3759_v59  ;;  %3443 = vmatpush3.bf16.msra.mxu1 %v3758_v58  ;;  %v3766_v2 = vld [vmem:[%s4748_s1 + $0x18] sm:$0xff]   ;;  %vm2161_vm6 = vcmask 392448   ;;  %vm2342_vm7 = vcmask 523648  }
 0x20d   : > { %v1299_v40 = vsel %vm1298_vm1, %v1293_v37, 0.0  ;;  %v1305_v41 = vsel %vm1298_vm1, %v1295_v38, 0.0  ;;  %3467 = vmatpush3.bf16.msra.mxu0 %v3759_v59  ;;  %3444 = vmatprep.subr.bf16.mxu1 %v3760_v60  ;;  %v3764_v0 = vld [vmem:[%s4743_s24] sm:$0xff]   ;;  %v3767_v28 = vld [vmem:[%s4748_s1 + $0x10] sm:$0xff]   ;;  %v3768_v29 = vld [vmem:[%s4748_s1 + $0x8] sm:$0xff]   ;;  %s4332_s24 = smov 96  }
 0x20e   : > { %1300 = vadd.xlane.f32.xlu0 %v1299_v40  ;;  %1306 = vadd.xlane.f32.xlu1 %v1305_v41  ;;  %v3765_v1 = vld [vmem:[%s4753_s12] sm:$0xff]   ;;  %s5246_s12 = scalar_lea.vmem [#allocation7], %s4722_s0 }
 0x20f   : > { %3468 = vmatprep.subr.bf16.mxu0 %v3761_v61  ;;  %v3273_v14 = vld [vmem:[%s5246_s12] ss:$0 sm:$0xff] }
 0x210   : > { %v1294_v39 = vld [vmem:[%s4768_s17 + $0x8] sm:$0xff]  ;;  %3445 = vmatpush3.bf16.msra.mxu1 %v3760_v60  ;;  %v3274_v20 = vld [vmem:[%s884_s9] ss:$0 sm:$0xff]  ;;  %s4334_s9 = smov 16  }
 0x211   : > { %v1302_v42 = vsel %vm1298_vm1, %v1294_v39, 0.0  ;;  %3469 = vmatpush3.bf16.msra.mxu0 %v3761_v61  ;;  %3446 = vmatprep.subr.bf16.mxu1 %v3762_v62  ;;  %v3769_v30 = vld [vmem:[%s4748_s1] sm:$0xff]   ;;  %s4333_s1 = smov 80  }
 0x212   : > { %1303 = vadd.xlane.f32.xlu0 %v1302_v42  ;;  %3470 = vmatprep.subr.bf16.mxu0 %v3763_v63  ;;  %v3289_v31 = vld [vmem:[%s908_s4] ss:$0 sm:$0xff] }
 0x213   : > { %v3275_v41 = vld [vmem:[%s892_s11] ss:$0 sm:$0xff]  ;;  %s4335_s11 = smov 32  }
 0x214   : > { %3447 = vmatpush3.bf16.msra.mxu1 %v3762_v62 }
 0x215   : > { %3471 = vmatpush3.bf16.msra.mxu0 %v3763_v63  ;;  %3448 = vmatprep.subr.bf16.mxu1 %v3764_v0 }
 0x216   : > { %3472 = vmatprep.subr.bf16.mxu0 %v3765_v1 }
 0x218   : > { %3449 = vmatpush3.bf16.msra.mxu1 %v3764_v0 }
 0x219   : > { %3473 = vmatpush3.bf16.msra.mxu0 %v3765_v1  ;;  %3454 = vmatprep.subr.bf16.mxu1 %v3766_v2 }
 0x297   : > { %v1301_v43 = vpop.xlane.xlu0 %1300  ;;  %v1307_v44 = vpop.xlane.xlu1 %1306 }
 0x298   : > { %v1309_v45 = vmul.f32 0.015625, %v1301_v43  ;;  %v1311_v46 = vmul.f32 0.015625, %v1307_v44 }
 0x29a   : > { %v1312_v47 = vsub.f32 %v1293_v37, %v1309_v45  ;;  %v1314_v48 = vsub.f32 %v1295_v38, %v1311_v46 }
 0x29b   : > { %v1304_v49 = vpop.xlane.xlu0 %1303 }
 0x29c   : > { %v1310_v50 = vmul.f32 0.015625, %v1304_v49  ;;  %v1315_v51 = vmul.f32 %v1312_v47, %v1312_v47  ;;  %v1317_v52 = vmul.f32 %v1314_v48, %v1314_v48 }
 0x29e   : > { %v1313_v53 = vsub.f32 %v1294_v39, %v1310_v50  ;;  %v1318_v54 = vsel %vm1298_vm1, %v1315_v51, 0.0  ;;  %v1324_v55 = vsel %vm1298_vm1, %v1317_v52, 0.0  ;;  %v3282_v50 = vld [vmem:[%s900_s29] ss:$0 sm:$0xff]  ;;  %s4336_s29 = smov 48  }
 0x29f   : > { %1319 = vadd.xlane.f32.xlu1 %v1318_v54 }
 0x2a0   : > { %v1316_v56 = vmul.f32 %v1313_v53, %v1313_v53 }
 0x2a2   : > { %v1321_v57 = vsel %vm1298_vm1, %v1316_v56, 0.0 }
 0x2a3   : > { %1325 = vadd.xlane.f32.xlu1 %v1324_v55  ;;  %1322 = vadd.xlane.f32.xlu0 %v1321_v57 }
 0x328   : > { %v1320_v3 = vpop.xlane.xlu1 %1319 }
 0x329   : > { %v1327_v4 = vmul.f32 0.015625, %v1320_v3 }
 0x32b   : > { %v1330_v5 = vadd.f32 1e-06, %v1327_v4 }
 0x32c   : > { %v1326_v6 = vpop.xlane.xlu1 %1325  ;;  %v1323_v7 = vpop.xlane.xlu0 %1322 }
 0x32d   : > { %3802 = vrsqrt.f32 %v1330_v5  ;;  %v1329_v8 = vmul.f32 0.015625, %v1326_v6  ;;  %v1328_v9 = vmul.f32 0.015625, %v1323_v7  ;;  %v4938_v7 = vld [vmem:[#allocation5] ss:$0 sm:$0xff] }
 0x32f   : > { %v1332_v10 = vadd.f32 1e-06, %v1329_v8  ;;  %v1331_v11 = vadd.f32 1e-06, %v1328_v9 }
 0x331   : > { %3804 = vrsqrt.f32 %v1332_v10 }
 0x332   : > { %3806 = vrsqrt.f32 %v1331_v11 }
 0x33a   : > { %v3803_v12 = vpop.eup %3802 }
 0x33b   : > { %v1336_v13 = vmul.f32 %v3803_v12, %v1312_v47 }
 0x33d   : > { %v1345_v19 = vmul.f32 %v3273_v14, %v1336_v13 }
 0x33e   : > { %v3805_v15 = vpop.eup %3804 }
 0x33f   : > { %v3807_v16 = vpop.eup %3806  ;;  %v1338_v17 = vmul.f32 %v3805_v15, %v1314_v48  ;;  %v1354_v24 = vadd.f32 %v3274_v20, %v1345_v19 }
 0x340   : > { %v1337_v18 = vmul.f32 %v3807_v16, %v1313_v53 }
 0x341   : > { %v1347_v21 = vmul.f32 %v3273_v14, %v1338_v17 }
 0x342   : > { %v1346_v22 = vmul.f32 %v3273_v14, %v1337_v18 }
 0x343   : > { %v1356_v23 = vadd.f32 %v3274_v20, %v1347_v21 }
 0x344   : > { %v1355_v25 = vadd.f32 %v3274_v20, %v1346_v22 }
 0x345   : > { %v1358_v26 = vpack.c.bf16 %v1356_v23, %v1356_v23 }
 0x346   : > { %v1357_v27 = vpack.c.bf16 %v1355_v25, %v1354_v24 }
 0x348   : > { %3450 = vmatprep.mubr.msk.bf16.mxu1 %vm1298_vm1, %v1357_v27  ;;  %3474 = vmatprep.mubr.msk.bf16.mxu0 %vm1298_vm1, %v1357_v27 }
 0x349   : > { %3451 = vmatmul.mubr.msk.bf16.vlgmr.msra.gmra.mxu1 %vm1298_vm1, %v1358_v26  ;;  %3475 = vmatmul.mubr.msk.bf16.vlgmr.msra.gmra.mxu0 %vm1298_vm1, %v1358_v26 }
 0x34a   : > { %3455 = vmatpush3.bf16.msra.mxu1 %v3766_v2  ;;  %3462 = vmatprep.mubr.msk.bf16.mxu1 %vm1298_vm1, %v1357_v27 }
 0x34b   : > { %3456 = vmatprep.subr.bf16.mxu1 %v3767_v28 }
 0x34e   : > { %3457 = vmatpush3.bf16.msra.mxu1 %v3767_v28 }
 0x34f   : > { %3458 = vmatprep.subr.bf16.mxu1 %v3768_v29 }
 0x352   : > { %3459 = vmatpush3.bf16.msra.mxu1 %v3768_v29 }
 0x353   : > { %3460 = vmatprep.subr.bf16.mxu1 %v3769_v30 }
 0x356   : > { %3461 = vmatpush3.bf16.msra.mxu1 %v3769_v30 }
 0x359   : > { %3463 = vmatmul.mubr.msk.bf16.vlgmr.msra.gmra.mxu1 %vm1298_vm1, %v1358_v26 }
 0x409   : > { %v3452_v32 = vpop.f32.mrf.mxu1  ;;  %v3476_v33 = vpop.f32.mrf.mxu0 }
 0x40a   : > { %v1621_v34 = vadd.f32 %v3476_v33, %v3289_v31  ;;  %v1447_v61 = vadd.f32 %v3452_v32, %v3275_v41 }
 0x40b   : > { %v1438_v35 = vpop.f32.mrf.mxu1  ;;  %v1612_v36 = vpop.f32.mrf.mxu0 }
 0x40c   : > { %v4890_v37 = vpack.c.bf16 %v1621_v34, %v1621_v34  ;;  %v1439_v44 = vadd.f32 %v3275_v41, %v1438_v35  ;;  %v1613_v45 = vadd.f32 %v3289_v31, %v1612_v36  ;;  %v4926_v63 = vpack.c.bf16 %v1447_v61, %v1447_v61 }
 0x40d   : > { %v3453_v38 = vpop.f32.mrf.mxu1  ;;  %v3477_v39 = vpop.f32.mrf.mxu0 }
 0x40e   : > { %3580 = vmatprep.subr.msk.bf16.mxu0 %vm1742_vm2, %v4890_v37  ;;  %v1744_v40 = vsel %vm1742_vm2, %v4890_v37, 0 }
 0x40f   : > { %v1441_v42 = vpop.f32.mrf.mxu1  ;;  %v1615_v43 = vpop.f32.mrf.mxu0  ;;  %3487 = vmatpush3.bf16.msra.mxu0 %v1744_v40 }
 0x410   : > { %v1442_v46 = vadd.f32 %v3275_v41, %v1441_v42  ;;  %v1616_v47 = vadd.f32 %v3289_v31, %v1615_v43 }
 0x412   : > { %v4898_v48 = vpack.c.bf16 %v1442_v46, %v1439_v44  ;;  %v4900_v49 = vpack.c.bf16 %v1616_v47, %v1613_v45 }
 0x414   : > { %3482 = vmatprep.mubr.msk.bf16.mxu1 %vm1637_vm3, %v4898_v48  ;;  %3488 = vmatprep.subr.bf16.mxu0 %v4900_v49 }
 0x415   : > { %3489 = vmatpush3.bf16.msra.mxu0 %v4900_v49 }
 0x419   : > { %v3464_v51 = vpop.f32.mrf.mxu1 }
 0x41a   : > { %v1534_v52 = vadd.f32 %v3464_v51, %v3282_v50 }
 0x41b   : > { %v1525_v53 = vpop.f32.mrf.mxu1 }
 0x41c   : > { %v4908_v54 = vpack.c.bf16 %v1534_v52, %v1534_v52  ;;  %v1526_v58 = vadd.f32 %v3282_v50, %v1525_v53 }
 0x41d   : > { %v3465_v55 = vpop.f32.mrf.mxu1 }
 0x41e   : > { %1807 = vrot.lane.b32.xlu0 %v4908_v54, %s4331_s27  ;;  %3578 = vmatprep.subr.msk.bf16.mxu1 %vm1637_vm3, %v4908_v54  ;;  %v1648_v56 = vsel %vm1637_vm3, %v4908_v54, 0 }
 0x41f   : > { %v1528_v57 = vpop.f32.mrf.mxu1  ;;  %3479 = vmatpush3.bf16.xpose.msra.mxu1 %v1648_v56 }
 0x420   : > { %v1529_v59 = vadd.f32 %v3282_v50, %v1528_v57 }
 0x422   : > { %v4916_v60 = vpack.c.bf16 %v1529_v59, %v1526_v58 }
 0x424   : > { %1805 = vrot.lane.b32.xlu1 %v4916_v60, %s4331_s27  ;;  %3579 = vmatprep.subr.msk.bf16.mxu1 %vm1637_vm3, %v4916_v60  ;;  %v1645_v62 = vsel %vm1637_vm3, %v4916_v60, 0 }
 0x427   : > { %3481 = vmatpush3.bf16.xpose.msra.mxu1 %v1645_v62 }
 0x428   : > { %1799 = vrot.lane.b32.xlu1 %v4898_v48, %s4331_s27 }
 0x42c   : > { %1801 = vrot.lane.b32.xlu1 %v4926_v63, %s4331_s27 }
 0x42e   : > { %3483 = vmatmul.mubr.msk.bf16.vlgmr.msra.gmra.mxu1 %vm1637_vm3, %v4926_v63 }
 0x490   : > { %v1808_v0 = vpop.permute.xlu0 %1807 }
 0x491   : > { %v1819_v1 = vsel %vm1637_vm3, %v1808_v0, 0  ;;  %3581 = vmatprep.subr.msk.bf16.mxu1 %vm1637_vm3, %v1808_v0 }
 0x492   : > { %3495 = vmatpush3.bf16.xpose.msra.mxu1 %v1819_v1 }
 0x496   : > { %v1806_v2 = vpop.permute.xlu1 %1805 }
 0x497   : > { %3582 = vmatprep.subr.msk.bf16.mxu1 %vm1637_vm3, %v1806_v2  ;;  %v1816_v3 = vsel %vm1637_vm3, %v1806_v2, 0 }
 0x49a   : > { %v1800_v4 = vpop.permute.xlu1 %1799  ;;  %3497 = vmatpush3.bf16.xpose.msra.mxu1 %v1816_v3 }
 0x49b   : > { %3498 = vmatprep.mubr.msk.bf16.mxu1 %vm1637_vm3, %v1800_v4 }
 0x49e   : > { %v1802_v5 = vpop.permute.xlu1 %1801 }
 0x4a1   : > { %3499 = vmatmul.mubr.msk.bf16.vlgmr.msra.gmra.mxu1 %vm1637_vm3, %v1802_v5 }
 0x4ee   : > { %v3484_v6 = vpop.f32.mrf.mxu1 }
 0x4ef   : > { %v1693_v11 = vadd.f32 %v3484_v6, %v4938_v7 }
 0x4f0   : > { %v1684_v8 = vpop.f32.mrf.mxu1 }
 0x4f1   : > { %v1685_v9 = vadd.f32 %v4938_v7, %v1684_v8  ;;  %v1705_v16 = vsel %vm1698_vm4, %v1693_v11, -inf }
 0x4f2   : > { %v3485_v10 = vpop.f32.mrf.mxu1 }
 0x4f3   : > { %v1699_v12 = vsel %vm1698_vm4, %v1685_v9, -inf }
 0x4f4   : > { %v1687_v13 = vpop.f32.mrf.mxu1  ;;  %1700 = vmax.xlane.f32.xlu0 %v1699_v12 }
 0x4f5   : > { %v1688_v14 = vadd.f32 %v4938_v7, %v1687_v13 }
 0x4f7   : > { %v1702_v15 = vsel %vm1698_vm4, %v1688_v14, -inf }
 0x4f8   : > { %1703 = vmax.xlane.f32.xlu1 %v1702_v15  ;;  %1706 = vmax.xlane.f32.xlu0 %v1705_v16 }
 0x561   : > { %v3500_v17 = vpop.f32.mrf.mxu1 }
 0x562   : > { %v1864_v18 = vadd.f32 %v3500_v17, %v4938_v7 }
 0x563   : > { %v1855_v19 = vpop.f32.mrf.mxu1 }
 0x564   : > { %v1856_v20 = vadd.f32 %v4938_v7, %v1855_v19  ;;  %v1875_v21 = vsel %vm1698_vm4, %v1864_v18, -inf }
 0x565   : > { %v3501_v22 = vpop.f32.mrf.mxu1  ;;  %1876 = vmax.xlane.f32.xlu1 %v1875_v21 }
 0x566   : > { %v1869_v23 = vsel %vm1698_vm4, %v1856_v20, -inf }
 0x567   : > { %v1858_v24 = vpop.f32.mrf.mxu1  ;;  %1870 = vmax.xlane.f32.xlu0 %v1869_v23 }
 0x568   : > { %v1859_v25 = vadd.f32 %v4938_v7, %v1858_v24 }
 0x56a   : > { %v1872_v26 = vsel %vm1698_vm4, %v1859_v25, -inf }
 0x56b   : > { %1873 = vmax.xlane.f32.xlu0 %v1872_v26 }
 0x57d   : > { %v1701_v27 = vpop.xlane.xlu0 %1700 }
 0x57e   : > { %v1708_v28 = vsub.f32 %v1685_v9, %v1701_v27 }
 0x580   : > { %v1711_v35 = vmul.f32 1.442695, %v1708_v28 }
 0x581   : > { %v1704_v29 = vpop.xlane.xlu1 %1703  ;;  %v1707_v30 = vpop.xlane.xlu0 %1706 }
 0x582   : > { %v1709_v31 = vsub.f32 %v1688_v14, %v1704_v29  ;;  %v1710_v32 = vsub.f32 %v1693_v11, %v1707_v30 }
 0x584   : > { %v1713_v33 = vmul.f32 1.442695, %v1709_v31  ;;  %v1715_v34 = vmul.f32 1.442695, %v1710_v32 }
 0x586   : > { %3808 = vpow2.f32 %v1713_v33 }
 0x587   : > { %3810 = vpow2.f32 %v1715_v34 }
 0x588   : > { %3812 = vpow2.f32 %v1711_v35 }
 0x593   : > { %v3809_v36 = vpop.eup %3808 }
 0x594   : > { %v3811_v38 = vpop.eup %3810  ;;  %v1720_v39 = vsel %vm1698_vm4, %v3809_v36, 0.0 }
 0x595   : > { %1721 = vadd.xlane.f32.xlu1 %v1720_v39  ;;  %v1723_v40 = vsel %vm1698_vm4, %v3811_v38, 0.0  ;;  %v3813_v41 = vpop.eup %3812 }
 0x596   : > { %1724 = vadd.xlane.f32.xlu0 %v1723_v40  ;;  %v1717_v42 = vsel %vm1698_vm4, %v3813_v41, 0.0 }
 0x59a   : > { %1718 = vadd.xlane.f32.xlu0 %v1717_v42 }
 0x5ee   : > { %v1877_v43 = vpop.xlane.xlu1 %1876 }
 0x5ef   : > { %v1880_v44 = vsub.f32 %v1864_v18, %v1877_v43 }
 0x5f0   : > { %v1871_v45 = vpop.xlane.xlu0 %1870 }
 0x5f1   : > { %v1885_v46 = vmul.f32 1.442695, %v1880_v44  ;;  %v1878_v47 = vsub.f32 %v1856_v20, %v1871_v45 }
 0x5f3   : > { %3814 = vpow2.f32 %v1885_v46  ;;  %v1881_v50 = vmul.f32 1.442695, %v1878_v47 }
 0x5f4   : > { %v1874_v51 = vpop.xlane.xlu0 %1873 }
 0x5f5   : > { %3816 = vpow2.f32 %v1881_v50  ;;  %v1879_v52 = vsub.f32 %v1859_v25, %v1874_v51 }
 0x5f7   : > { %v1883_v53 = vmul.f32 1.442695, %v1879_v52 }
 0x5f9   : > { %3818 = vpow2.f32 %v1883_v53 }
 0x600   : > { %v3815_v55 = vpop.eup %3814 }
 0x601   : > { %v1893_v56 = vsel %vm1698_vm4, %v3815_v55, 0.0 }
 0x602   : > { %v3817_v57 = vpop.eup %3816  ;;  %1894 = vadd.xlane.f32.xlu1 %v1893_v56 }
 0x603   : > { %v1887_v58 = vsel %vm1698_vm4, %v3817_v57, 0.0 }
 0x606   : > { %v3819_v59 = vpop.eup %3818  ;;  %1888 = vadd.xlane.f32.xlu1 %v1887_v58 }
 0x607   : > { %v1890_v61 = vsel %vm1698_vm4, %v3819_v59, 0.0 }
 0x608   : > { %1891 = vadd.xlane.f32.xlu0 %v1890_v61 }
 0x617   : > { %1906 = vrot.lane.b32.xlu1 %v4900_v49, %s4331_s27 }
 0x61b   : > { %1990 = vrot.lane.b32.xlu1 %v4908_v54, %s4332_s24 }
 0x61e   : > { %1908 = vrot.lane.b32.xlu0 %v4890_v37, %s4331_s27  ;;  %v1722_v62 = vpop.xlane.xlu1 %1721 }
 0x61f   : > { %v1725_v0 = vpop.xlane.xlu0 %1724  ;;  %1988 = vrot.lane.b32.xlu1 %v4916_v60, %s4332_s24 }
 0x620   : > { %3820 = vrcp.f32 %v1725_v0 }
 0x621   : > { %3822 = vrcp.f32 %v1722_v62 }
 0x622   : > { %1984 = vrot.lane.b32.xlu0 %v4898_v48, %s4332_s24 }
 0x623   : > { %v1719_v1 = vpop.xlane.xlu0 %1718  ;;  %1986 = vrot.lane.b32.xlu1 %v4926_v63, %s4332_s24 }
 0x624   : > { %3824 = vrcp.f32 %v1719_v1 }
 0x62d   : > { %v3821_v2 = vpop.eup %3820 }
 0x62e   : > { %v3823_v3 = vpop.eup %3822  ;;  %v1731_v5 = vmul.f32 %v3821_v2, %v3811_v38 }
 0x62f   : > { %v1729_v8 = vmul.f32 %v3823_v3, %v3809_v36 }
 0x630   : > { %v1733_v10 = vpack.c.bf16 %v1731_v5, %v1731_v5 }
 0x631   : > { %v3825_v4 = vpop.eup %3824 }
 0x632   : > { %v1727_v6 = vmul.f32 %v3825_v4, %v3813_v41 }
 0x634   : > { %v1732_v9 = vpack.c.bf16 %v1729_v8, %v1727_v6 }
 0x636   : > { %3490 = vmatprep.mubr.msk.bf16.mxu0 %vm1698_vm4, %v1732_v9 }
 0x637   : > { %3491 = vmatmul.mubr.msk.bf16.vlgmr.msra.gmra.mxu0 %vm1698_vm4, %v1733_v10 }
 0x68b   : > { %v1895_v11 = vpop.xlane.xlu1 %1894 }
 0x68c   : > { %3826 = vrcp.f32 %v1895_v11 }
 0x68f   : > { %v1889_v12 = vpop.xlane.xlu1 %1888 }
 0x690   : > { %3828 = vrcp.f32 %v1889_v12 }
 0x691   : > { %v1892_v13 = vpop.xlane.xlu0 %1891 }
 0x692   : > { %3830 = vrcp.f32 %v1892_v13 }
 0x693   : > { %v1907_v14 = vpop.permute.xlu1 %1906 }
 0x695   : > { %v1909_v15 = vpop.permute.xlu0 %1908 }
 0x696   : > { %v1918_v16 = vsel %vm1742_vm2, %v1909_v15, 0  ;;  %3583 = vmatprep.subr.msk.bf16.mxu0 %vm1742_vm2, %v1909_v15 }
 0x697   : > { %3503 = vmatpush3.bf16.msra.mxu0 %v1918_v16  ;;  %v1991_v17 = vpop.permute.xlu1 %1990 }
 0x698   : > { %3504 = vmatprep.subr.bf16.mxu0 %v1907_v14  ;;  %v2002_v26 = vsel %vm1637_vm3, %v1991_v17, 0 }
 0x699   : > { %v3827_v18 = vpop.eup %3826  ;;  %v1985_v27 = vpop.permute.xlu0 %1984 }
 0x69a   : > { %v1901_v21 = vmul.f32 %v3827_v18, %v3815_v55 }
 0x69b   : > { %3505 = vmatpush3.bf16.msra.mxu0 %v1907_v14  ;;  %v1989_v28 = vpop.permute.xlu1 %1988 }
 0x69c   : > { %3584 = vmatprep.subr.msk.bf16.mxu0 %vm1637_vm3, %v1991_v17  ;;  %v1903_v25 = vpack.c.bf16 %v1901_v21, %v1901_v21  ;;  %v1999_v29 = vsel %vm1637_vm3, %v1989_v28, 0 }
 0x69d   : > { %v3829_v19 = vpop.eup %3828 }
 0x69e   : > { %v1897_v22 = vmul.f32 %v3829_v19, %v3817_v57 }
 0x69f   : > { %v3831_v20 = vpop.eup %3830  ;;  %v1987_v30 = vpop.permute.xlu1 %1986 }
 0x6a0   : > { %v1899_v23 = vmul.f32 %v3831_v20, %v3819_v59 }
 0x6a2   : > { %v1902_v24 = vpack.c.bf16 %v1899_v23, %v1897_v22 }
 0x6a4   : > { %3506 = vmatprep.mubr.msk.bf16.mxu0 %vm1698_vm4, %v1902_v24 }
 0x6a5   : > { %3507 = vmatmul.mubr.msk.bf16.vlgmr.msra.gmra.mxu0 %vm1698_vm4, %v1903_v25 }
 0x6a6   : > { %3511 = vmatpush3.bf16.xpose.msra.mxu0 %v2002_v26  ;;  %3514 = vmatprep.mubr.msk.bf16.mxu0 %vm1637_vm3, %v1985_v27 }
 0x6a7   : > { %3585 = vmatprep.subr.msk.bf16.mxu0 %vm1637_vm3, %v1989_v28 }
 0x6ae   : > { %3513 = vmatpush3.bf16.xpose.msra.mxu0 %v1999_v29 }
 0x6b5   : > { %3515 = vmatmul.mubr.msk.bf16.vlgmr.msra.gmra.mxu0 %vm1637_vm3, %v1987_v30 }
 0x6f7   : > { %v3492_v31 = vpop.f32.mrf.mxu0 }
 0x6f8   : > { %1796 = vst.msk [vmem:[#allocation2 + $0x10] sm:$0xff] %vm1637_vm3, %v3492_v31 }
 0x6f9   : > { %v1780_v32 = vpop.f32.mrf.mxu0 }
 0x6fa   : > { %1794 = vst.msk [vmem:[#allocation2] sm:$0xff] %vm1637_vm3, %v1780_v32 }
 0x6fb   : > { %v3493_v33 = vpop.f32.mrf.mxu0 }
 0x6fd   : > { %v1783_v34 = vpop.f32.mrf.mxu0 }
 0x6fe   : > { %1795 = vst.msk [vmem:[#allocation2 + $0x8] sm:$0xff] %vm1637_vm3, %v1783_v34 }
 0x765   : > { %v4985_v35 = vpop.f32.mrf.mxu0 }
 0x767   : > { %v4987_v36 = vpop.f32.mrf.mxu0 }
 0x769   : > { %v3509_v38 = vpop.f32.mrf.mxu0 }
 0x76b   : > { %v4989_v39 = vpop.f32.mrf.mxu0 }
 0x775   : > { %v3516_v40 = vpop.f32.mrf.mxu0 }
 0x776   : > { %v2047_v44 = vadd.f32 %v3516_v40, %v4938_v7 }
 0x777   : > { %v2038_v41 = vpop.f32.mrf.mxu0 }
 0x778   : > { %v2039_v42 = vadd.f32 %v4938_v7, %v2038_v41  ;;  %v2058_v51 = vsel %vm1698_vm4, %v2047_v44, -inf }
 0x779   : > { %v3517_v43 = vpop.f32.mrf.mxu0 }
 0x77a   : > { %v2052_v45 = vsel %vm1698_vm4, %v2039_v42, -inf }
 0x77b   : > { %v2041_v46 = vpop.f32.mrf.mxu0  ;;  %2053 = vmax.xlane.f32.xlu0 %v2052_v45 }
 0x77c   : > { %v2042_v47 = vadd.f32 %v4938_v7, %v2041_v46 }
 0x77e   : > { %v2055_v50 = vsel %vm1698_vm4, %v2042_v47, -inf }
 0x77f   : > { %2056 = vmax.xlane.f32.xlu1 %v2055_v50  ;;  %2059 = vmax.xlane.f32.xlu0 %v2058_v51 }
 0x804   : > { %v2054_v52 = vpop.xlane.xlu0 %2053 }
 0x805   : > { %v2061_v53 = vsub.f32 %v2039_v42, %v2054_v52 }
 0x807   : > { %v2064_v55 = vmul.f32 1.442695, %v2061_v53 }
 0x808   : > { %v2057_v56 = vpop.xlane.xlu1 %2056  ;;  %v2060_v57 = vpop.xlane.xlu0 %2059 }
 0x809   : > { %3832 = vpow2.f32 %v2064_v55  ;;  %v2062_v58 = vsub.f32 %v2042_v47, %v2057_v56  ;;  %v2063_v59 = vsub.f32 %v2047_v44, %v2060_v57 }
 0x80b   : > { %v2066_v61 = vmul.f32 1.442695, %v2062_v58  ;;  %v2068_v62 = vmul.f32 1.442695, %v2063_v59 }
 0x80d   : > { %3834 = vpow2.f32 %v2066_v61 }
 0x80e   : > { %3836 = vpow2.f32 %v2068_v62 }
 0x816   : > { %v3833_v0 = vpop.eup %3832 }
 0x817   : > { %v2070_v1 = vsel %vm1698_vm4, %v3833_v0, 0.0 }
 0x818   : > { %2071 = vadd.xlane.f32.xlu0 %v2070_v1 }
 0x81a   : > { %v3835_v2 = vpop.eup %3834 }
 0x81b   : > { %v3837_v3 = vpop.eup %3836  ;;  %v2073_v4 = vsel %vm1698_vm4, %v3835_v2, 0.0 }
 0x81c   : > { %2074 = vadd.xlane.f32.xlu0 %v2073_v4  ;;  %v2076_v5 = vsel %vm1698_vm4, %v3837_v3, 0.0 }
 0x81d   : > { %2077 = vadd.xlane.f32.xlu1 %v2076_v5 }
 0x82e   : > { %2087 = vrot.lane.b32.xlu1 %v4900_v49, %s4332_s24 }
 0x832   : > { %2171 = vrot.lane.b32.xlu1 %v4908_v54, %s4333_s1  ;;  %2089 = vrot.lane.b32.xlu0 %v4890_v37, %s4332_s24 }
 0x836   : > { %2169 = vrot.lane.b32.xlu1 %v4916_v60, %s4333_s1  ;;  %2165 = vrot.lane.b32.xlu0 %v4898_v48, %s4333_s1 }
 0x83a   : > { %2167 = vrot.lane.b32.xlu1 %v4926_v63, %s4333_s1 }
 0x8a1   : > { %v2072_v6 = vpop.xlane.xlu0 %2071 }
 0x8a2   : > { %3838 = vrcp.f32 %v2072_v6 }
 0x8a5   : > { %v2075_v8 = vpop.xlane.xlu0 %2074 }
 0x8a6   : > { %v2078_v9 = vpop.xlane.xlu1 %2077  ;;  %3840 = vrcp.f32 %v2075_v8 }
 0x8a7   : > { %3842 = vrcp.f32 %v2078_v9 }
 0x8a9   : > { %v2090_v10 = vpop.permute.xlu0 %2089 }
 0x8aa   : > { %v2088_v54 = vpop.permute.xlu1 %2087  ;;  %v2099_v11 = vsel %vm1742_vm2, %v2090_v10, 0  ;;  %3586 = vmatprep.subr.msk.bf16.mxu1 %vm1742_vm2, %v2090_v10 }
 0x8ab   : > { %3519 = vmatpush3.bf16.msra.mxu1 %v2099_v11  ;;  %v3770_v11 = vld [vmem:[%s4774_s19 + $0x18] sm:$0xff]  }
 0x8ac   : > { %3520 = vmatprep.subr.bf16.mxu1 %v2088_v54 }
 0x8ad   : > { %v2166_v19 = vpop.permute.xlu0 %2165 }
 0x8ae   : > { %v2172_v60 = vpop.permute.xlu1 %2171 }
 0x8af   : > { %3521 = vmatpush3.bf16.msra.mxu1 %v2088_v54  ;;  %v3839_v48 = vpop.eup %3838  ;;  %v2183_v18 = vsel %vm1637_vm3, %v2172_v60, 0 }
 0x8b0   : > { %3587 = vmatprep.subr.msk.bf16.mxu1 %vm1637_vm3, %v2172_v60  ;;  %v2080_v13 = vmul.f32 %v3839_v48, %v3833_v0  ;;  %v3771_v60 = vld [vmem:[%s4774_s19 + $0x10] sm:$0xff]   ;;  %v3772_v48 = vld [vmem:[%s4774_s19 + $0x8] sm:$0xff]  }
 0x8b2   : > { %v2170_v20 = vpop.permute.xlu1 %2169 }
 0x8b3   : > { %v3841_v63 = vpop.eup %3840  ;;  %v2180_v21 = vsel %vm1637_vm3, %v2170_v20, 0 }
 0x8b4   : > { %v3843_v12 = vpop.eup %3842  ;;  %v2082_v14 = vmul.f32 %v3841_v63, %v3835_v2  ;;  %v3773_v63 = vld [vmem:[%s4774_s19] sm:$0xff]  }
 0x8b5   : > { %v2084_v15 = vmul.f32 %v3843_v12, %v3837_v3 }
 0x8b6   : > { %v2085_v16 = vpack.c.bf16 %v2082_v14, %v2080_v13  ;;  %v2168_v22 = vpop.permute.xlu1 %2167 }
 0x8b7   : > { %v2086_v17 = vpack.c.bf16 %v2084_v15, %v2084_v15 }
 0x8b8   : > { %3522 = vmatprep.mubr.msk.bf16.mxu1 %vm1698_vm4, %v2085_v16 }
 0x8b9   : > { %3523 = vmatmul.mubr.msk.bf16.vlgmr.msra.gmra.mxu1 %vm1698_vm4, %v2086_v17 }
 0x8ba   : > { %3527 = vmatpush3.bf16.xpose.msra.mxu1 %v2183_v18  ;;  %3530 = vmatprep.mubr.msk.bf16.mxu1 %vm1637_vm3, %v2166_v19 }
 0x8bb   : > { %3588 = vmatprep.subr.msk.bf16.mxu1 %vm1637_vm3, %v2170_v20 }
 0x8c2   : > { %3529 = vmatpush3.bf16.xpose.msra.mxu1 %v2180_v21 }
 0x8c9   : > { %3531 = vmatmul.mubr.msk.bf16.vlgmr.msra.gmra.mxu1 %vm1637_vm3, %v2168_v22 }
 0x979   : > { %v3524_v23 = vpop.f32.mrf.mxu1 }
 0x97b   : > { %v2135_v24 = vpop.f32.mrf.mxu1 }
 0x97d   : > { %v3525_v25 = vpop.f32.mrf.mxu1 }
 0x97f   : > { %v2138_v26 = vpop.f32.mrf.mxu1 }
 0x989   : > { %v3532_v27 = vpop.f32.mrf.mxu1 }
 0x98a   : > { %v2228_v31 = vadd.f32 %v3532_v27, %v4938_v7 }
 0x98b   : > { %v2219_v28 = vpop.f32.mrf.mxu1 }
 0x98c   : > { %v2220_v29 = vadd.f32 %v4938_v7, %v2219_v28  ;;  %v2239_v40 = vsel %vm1698_vm4, %v2228_v31, -inf  ;;  %v3319_v28 = vld [vmem:[%s925_s28] ss:$0 sm:$0xff] }
 0x98d   : > { %v3533_v30 = vpop.f32.mrf.mxu1 }
 0x98e   : > { %v2233_v32 = vsel %vm1698_vm4, %v2220_v29, -inf }
 0x98f   : > { %v2222_v33 = vpop.f32.mrf.mxu1  ;;  %2234 = vmax.xlane.f32.xlu0 %v2233_v32  ;;  %v3875_v32 = vld [vmem:[%s4768_s17 + $0x10] sm:$0xff] }
 0x990   : > { %v2223_v34 = vadd.f32 %v4938_v7, %v2222_v33 }
 0x992   : > { %v2236_v38 = vsel %vm1698_vm4, %v2223_v34, -inf }
 0x993   : > { %2237 = vmax.xlane.f32.xlu1 %v2236_v38  ;;  %2240 = vmax.xlane.f32.xlu0 %v2239_v40 }
 0xa18   : > { %v2235_v41 = vpop.xlane.xlu0 %2234 }
 0xa19   : > { %v2242_v42 = vsub.f32 %v2220_v29, %v2235_v41 }
 0xa1b   : > { %v2245_v43 = vmul.f32 1.442695, %v2242_v42 }
 0xa1c   : > { %v2238_v44 = vpop.xlane.xlu1 %2237  ;;  %v2241_v45 = vpop.xlane.xlu0 %2240 }
 0xa1d   : > { %3844 = vpow2.f32 %v2245_v43  ;;  %v2243_v46 = vsub.f32 %v2223_v34, %v2238_v44  ;;  %v2244_v47 = vsub.f32 %v2228_v31, %v2241_v45  ;;  %v3876_v34 = vld [vmem:[%s4768_s17 + $0x8] sm:$0xff] }
 0xa1f   : > { %v2247_v50 = vmul.f32 1.442695, %v2243_v46  ;;  %v2249_v51 = vmul.f32 1.442695, %v2244_v47 }
 0xa21   : > { %3846 = vpow2.f32 %v2247_v50 }
 0xa22   : > { %3848 = vpow2.f32 %v2249_v51 }
 0xa2a   : > { %v3845_v52 = vpop.eup %3844 }
 0xa2b   : > { %v2251_v7 = vsel %vm1698_vm4, %v3845_v52, 0.0 }
 0xa2c   : > { %2252 = vadd.xlane.f32.xlu0 %v2251_v7 }
 0xa2e   : > { %v3847_v53 = vpop.eup %3846 }
 0xa2f   : > { %v3849_v55 = vpop.eup %3848  ;;  %v2254_v56 = vsel %vm1698_vm4, %v3847_v53, 0.0 }
 0xa30   : > { %2255 = vadd.xlane.f32.xlu0 %v2254_v56  ;;  %v2257_v57 = vsel %vm1698_vm4, %v3849_v55, 0.0 }
 0xa31   : > { %2258 = vadd.xlane.f32.xlu1 %v2257_v57 }
 0xa42   : > { %2268 = vrot.lane.b32.xlu1 %v4900_v49, %s4333_s1 }
 0xa46   : > { %1971 = vrot.lane.b32.xlu1 %v4987_v36, %s4334_s9  ;;  %2270 = vrot.lane.b32.xlu0 %v4890_v37, %s4333_s1 }
 0xa4a   : > { %1973 = vrot.lane.b32.xlu1 %v4989_v39, %s4334_s9  ;;  %1975 = vrot.lane.b32.xlu0 %v4985_v35, %s4334_s9 }
 0xa4e   : > { %2152 = vrot.lane.b32.xlu1 %v2135_v24, %s4335_s11  ;;  %2154 = vrot.lane.b32.xlu0 %v2138_v26, %s4335_s11  ;;  %v3874_v26 = vld [vmem:[%s4768_s17] sm:$0xff] }
 0xa52   : > { %2156 = vrot.lane.b32.xlu1 %v3524_v23, %s4335_s11 }
 0xab5   : > { %v2253_v58 = vpop.xlane.xlu0 %2252 }
 0xab6   : > { %3850 = vrcp.f32 %v2253_v58 }
 0xab9   : > { %v2256_v59 = vpop.xlane.xlu0 %2255 }
 0xaba   : > { %v2259_v61 = vpop.xlane.xlu1 %2258  ;;  %3852 = vrcp.f32 %v2256_v59 }
 0xabb   : > { %3854 = vrcp.f32 %v2259_v61 }
 0xabd   : > { %v2271_v49 = vpop.permute.xlu0 %2270 }
 0xabe   : > { %v2269_v62 = vpop.permute.xlu1 %2268  ;;  %v2280_v36 = vsel %vm1742_vm2, %v2271_v49, 0  ;;  %3589 = vmatprep.subr.msk.bf16.mxu0 %vm1742_vm2, %v2271_v49 }
 0xabf   : > { %3535 = vmatpush3.bf16.msra.mxu0 %v2280_v36  ;;  %v3774_v36 = vld [vmem:[%s4758_s2 + $0x30] ss:$8 sps:$4 sm:$0xff]  }
 0xac0   : > { %3536 = vmatprep.subr.bf16.mxu0 %v2269_v62 }
 0xac1   : > { %v1976_v37 = vpop.permute.xlu0 %1975 }
 0xac2   : > { %v1972_v35 = vpop.permute.xlu1 %1971  ;;  %1983 = vst.msk [vmem:[#allocation2 + $0x10] sm:$0xff] %vm1980_vm5, %v1976_v37  ;;  %v3779_v37 = vld [vmem:[%s4758_s2 + $0x24] ss:$8 sps:$4 sm:$0xff]  }
 0xac3   : > { %1981 = vst.msk [vmem:[#allocation2] sm:$0xff] %vm1980_vm5, %v1972_v35  ;;  %3537 = vmatpush3.bf16.msra.mxu0 %v2269_v62  ;;  %v3851_v39 = vpop.eup %3850  ;;  %v3776_v62 = vld [vmem:[%s4758_s2 + $0x34] ss:$8 sps:$4 sm:$0xff]   ;;  %v3777_v35 = vld [vmem:[%s4758_s2 + $0x20] ss:$8 sps:$4 sm:$0xff]  }
 0xac4   : > { %v2261_v4 = vmul.f32 %v3851_v39, %v3845_v52  ;;  %3542 = vmatprep.subr.bf16.mxu0 %v3770_v11  ;;  %2585 = vmatprep.subr.bf16.mxu1 %v3776_v62  ;;  %v3782_v39 = vld [vmem:[%s4758_s2 + $0x14] ss:$8 sps:$4 sm:$0xff]  }
 0xac5   : > { %v2155_v0 = vpop.permute.xlu0 %2154  ;;  %2586 = vmatpush1.bf16.msra.mxu1 %v3774_v36 }
 0xac6   : > { %v1974_v1 = vpop.permute.xlu1 %1973  ;;  %2587 = vmatprep.subr.bf16.mxu1 %v3779_v37 }
 0xac7   : > { %v3853_v2 = vpop.eup %3852  ;;  %1982 = vst.msk [vmem:[#allocation2 + $0x8] sm:$0xff] %vm1980_vm5, %v1974_v1  ;;  %v3785_v1 = vld [vmem:[%s4758_s2 + $0x4] ss:$8 sps:$4 sm:$0xff]  }
 0xac8   : > { %v3855_v3 = vpop.eup %3854  ;;  %2163 = vst.msk [vmem:[#allocation2 + $0x8] sm:$0xff] %vm2161_vm6, %v2155_v0  ;;  %v2263_v5 = vmul.f32 %v3853_v2, %v3847_v53  ;;  %v3780_v0 = vld [vmem:[%s4758_s2 + $0x10] ss:$8 sps:$4 sm:$0xff]   ;;  %v3783_v2 = vld [vmem:[%s4758_s2] ss:$8 sps:$4 sm:$0xff]  }
 0xac9   : > { %v2265_v6 = vmul.f32 %v3855_v3, %v3849_v55  ;;  %2588 = vmatpush1.bf16.msra.mxu1 %v3777_v35  ;;  %v4337_v3 = vmov 0  }
 0xaca   : > { %v2153_v8 = vpop.permute.xlu1 %2152  ;;  %v2266_v9 = vpack.c.bf16 %v2263_v5, %v2261_v4  ;;  %2589 = vmatprep.subr.bf16.mxu1 %v3782_v39  ;;  %2609 = vmatprep.mubr.bf16.mxu1 %v4337_v3 }
 0xacb   : > { %2162 = vst.msk [vmem:[#allocation2] sm:$0xff] %vm2161_vm6, %v2153_v8  ;;  %v2267_v10 = vpack.c.bf16 %v2265_v6, %v2265_v6 }
 0xacc   : > { %3538 = vmatprep.mubr.msk.bf16.mxu0 %vm1698_vm4, %v2266_v9 }
 0xacd   : > { %3539 = vmatmul.mubr.msk.bf16.vlgmr.msra.gmra.mxu0 %vm1698_vm4, %v2267_v10  ;;  %2590 = vmatpush1.bf16.msra.mxu1 %v3780_v0 }
 0xace   : > { %v2157_v54 = vpop.permute.xlu1 %2156  ;;  %3543 = vmatpush3.bf16.msra.mxu0 %v3770_v11  ;;  %2591 = vmatprep.subr.bf16.mxu1 %v3785_v1 }
 0xacf   : > { %2164 = vst.msk [vmem:[#allocation2 + $0x10] sm:$0xff] %vm2161_vm6, %v2157_v54  ;;  %3544 = vmatprep.subr.bf16.mxu0 %v3771_v60 }
 0xad1   : > { %2592 = vmatpush1.bf16.msra.mxu1 %v3783_v2 }
 0xad2   : > { %3545 = vmatpush3.bf16.msra.mxu0 %v3771_v60 }
 0xad3   : > { %3546 = vmatprep.subr.bf16.mxu0 %v3772_v48 }
 0xad6   : > { %3547 = vmatpush3.bf16.msra.mxu0 %v3772_v48 }
 0xad7   : > { %3548 = vmatprep.subr.bf16.mxu0 %v3773_v63 }
 0xada   : > { %3549 = vmatpush3.bf16.msra.mxu0 %v3773_v63 }
 0xb8d   : > { %v3540_v12 = vpop.f32.mrf.mxu0 }
 0xb8f   : > { %v2316_v13 = vpop.f32.mrf.mxu0 }
 0xb90   : > { %2333 = vrot.lane.b32.xlu0 %v2316_v13, %s4336_s29 }
 0xb91   : > { %v3541_v14 = vpop.f32.mrf.mxu0 }
 0xb93   : > { %v2319_v15 = vpop.f32.mrf.mxu0 }
 0xb94   : > { %2337 = vrot.lane.b32.xlu0 %v3540_v12, %s4336_s29  ;;  %2335 = vrot.lane.b32.xlu1 %v2319_v15, %s4336_s29  ;;  %v3320_v12 = vld [vmem:[%s933_s22] ss:$0 sm:$0xff] }
 0xc02   : > { %v2334_v16 = vpop.permute.xlu0 %2333 }
 0xc03   : > { %2343 = vst.msk [vmem:[#allocation2] sm:$0xff] %vm2342_vm7, %v2334_v16  ;;  %v3321_v16 = vld [vmem:[%s941_s6] ss:$0 sm:$0xff] }
 0xc06   : > { %v2336_v17 = vpop.permute.xlu1 %2335  ;;  %v2338_v18 = vpop.permute.xlu0 %2337 }
 0xc07   : > { %2344 = vst.msk [vmem:[#allocation2 + $0x8] sm:$0xff] %vm2342_vm7, %v2336_v17  ;;  %2345 = vst.msk [vmem:[#allocation2 + $0x10] sm:$0xff] %vm2342_vm7, %v2338_v18 }
 0xc0a   : > { %v2346_v19 = vld [vmem:[#allocation2] sm:$0xff] }
 0xc0e   : > { %v2347_v20 = vld [vmem:[#allocation2 + $0x8] sm:$0xff]  ;;  %v2348_v21 = vld [vmem:[#allocation2 + $0x10] sm:$0xff] }
 0xc0f   : > { %v2349_v22 = vpack.c.bf16 %v2347_v20, %v2346_v19  ;;  %v2350_v23 = vpack.c.bf16 %v2348_v21, %v2348_v21 }
 0xc11   : > { %3550 = vmatprep.mubr.msk.bf16.mxu0 %vm1298_vm1, %v2349_v22 }
 0xc12   : > { %3551 = vmatmul.mubr.msk.bf16.vlgmr.msra.gmra.mxu0 %vm1298_vm1, %v2350_v23 }
 0xcd2   : > { %v3552_v24 = vpop.f32.mrf.mxu0 }
 0xcd3   : > { %v2439_v33 = vadd.f32 %v3875_v32, %v3552_v24  ;;  %v3791_v32 = vld [vmem:[%s4763_s14 + $0x28] sm:$0xff]  }
 0xcd4   : > { %v2423_v25 = vpop.f32.mrf.mxu0 }
 0xcd5   : > { %v2437_v27 = vadd.f32 %v3874_v26, %v2423_v25  ;;  %v5062_v42 = vadd.f32 %v3319_v28, %v2439_v33  ;;  %v3786_v26 = vld [vmem:[%s4763_s14 + $0x78] sm:$0xff]   ;;  %v3792_v33 = vld [vmem:[%s4763_s14 + $0x60] sm:$0xff]  }
 0xcd6   : > { %v3553_v29 = vpop.f32.mrf.mxu0  ;;  %3414 = vmatprep.subr.bf16.mxu0 %v3786_v26 }
 0xcd7   : > { %v5054_v30 = vadd.f32 %v3319_v28, %v2437_v27  ;;  %v2458_v44 = vsel %vm1298_vm1, %v5062_v42, 0.0  ;;  %v3787_v27 = vld [vmem:[%s4763_s14 + $0x38] sm:$0xff]   ;;  %v3789_v29 = vld [vmem:[%s4763_s14 + $0x30] sm:$0xff]  }
 0xcd8   : > { %v2426_v31 = vpop.f32.mrf.mxu0  ;;  %3415 = vmatpush3.bf16.msra.mxu0 %v3787_v27 }
 0xcd9   : > { %v2438_v38 = vadd.f32 %v3876_v34, %v2426_v31  ;;  %v2452_v40 = vsel %vm1298_vm1, %v5054_v30, 0.0  ;;  %v3790_v31 = vld [vmem:[%s4763_s14 + $0x68] sm:$0xff]   ;;  %v3793_v34 = vld [vmem:[%s4763_s14 + $0x20] sm:$0xff]  }
 0xcda   : > { %2453 = vadd.xlane.f32.xlu1 %v2452_v40  ;;  %v3795_v40 = vld [vmem:[%s4763_s14 + $0x18] sm:$0xff]  }
 0xcdb   : > { %v5060_v41 = vadd.f32 %v3319_v28, %v2438_v38  ;;  %v3788_v28 = vld [vmem:[%s4763_s14 + $0x70] sm:$0xff]   ;;  %v3794_v38 = vld [vmem:[%s4763_s14 + $0x58] sm:$0xff]  }
 0xcdc   : > { %3416 = vmatprep.subr.bf16.mxu0 %v3788_v28 }
 0xcdd   : > { %v2455_v43 = vsel %vm1298_vm1, %v5060_v41, 0.0  ;;  %3417 = vmatpush3.bf16.msra.mxu0 %v3789_v29 }
 0xcde   : > { %2456 = vadd.xlane.f32.xlu0 %v2455_v43  ;;  %3418 = vmatprep.subr.bf16.mxu0 %v3790_v31  ;;  %v3796_v43 = vld [vmem:[%s4763_s14 + $0x50] sm:$0xff]  }
 0xce1   : > { %3419 = vmatpush3.bf16.msra.mxu0 %v3791_v32 }
 0xce2   : > { %2459 = vadd.xlane.f32.xlu0 %v2458_v44  ;;  %3420 = vmatprep.subr.bf16.mxu0 %v3792_v33  ;;  %v3797_v44 = vld [vmem:[%s4763_s14 + $0x10] sm:$0xff]  }
 0xce5   : > { %3421 = vmatpush3.bf16.msra.mxu0 %v3793_v34 }
 0xce6   : > { %3422 = vmatprep.subr.bf16.mxu0 %v3794_v38 }
 0xce9   : > { %3423 = vmatpush3.bf16.msra.mxu0 %v3795_v40 }
 0xcea   : > { %3424 = vmatprep.subr.bf16.mxu0 %v3796_v43 }
 0xced   : > { %3425 = vmatpush3.bf16.msra.mxu0 %v3797_v44 }
 0xd63   : > { %v2454_v45 = vpop.xlane.xlu1 %2453 }
 0xd64   : > { %v2461_v46 = vmul.f32 0.015625, %v2454_v45  ;;  %v3798_v45 = vld [vmem:[%s4763_s14 + $0x48] sm:$0xff]  }
 0xd65   : > { %3426 = vmatprep.subr.bf16.mxu0 %v3798_v45 }
 0xd66   : > { %v2464_v47 = vsub.f32 %v5054_v30, %v2461_v46  ;;  %v3799_v46 = vld [vmem:[%s4763_s14 + $0x8] sm:$0xff]  }
 0xd67   : > { %v2457_v50 = vpop.xlane.xlu0 %2456  ;;  %3427 = vmatpush3.bf16.msra.mxu0 %v3799_v46 }
 0xd68   : > { %v2462_v51 = vmul.f32 0.015625, %v2457_v50  ;;  %v2467_v52 = vmul.f32 %v2464_v47, %v2464_v47  ;;  %v3801_v50 = vld [vmem:[%s4763_s14] sm:$0xff]  }
 0xd6a   : > { %v2465_v7 = vsub.f32 %v5060_v41, %v2462_v51  ;;  %v2470_v53 = vsel %vm1298_vm1, %v2467_v52, 0.0  ;;  %v2521_v51 = vlaneseq }
 0xd6b   : > { %2471 = vadd.xlane.f32.xlu0 %v2470_v53  ;;  %v2460_v55 = vpop.xlane.xlu0 %2459  ;;  %v2519_v53 = vld [vmem:[%s4779_s18] sm:$0x3] }
 0xd6c   : > { %v2463_v56 = vmul.f32 0.015625, %v2460_v55  ;;  %v2468_v57 = vmul.f32 %v2465_v7, %v2465_v7  ;;  %v2522_v52 = vshrl.u32 %v2521_v51, 7 }
 0xd6e   : > { %v2466_v58 = vsub.f32 %v5062_v42, %v2463_v56  ;;  %v2473_v59 = vsel %vm1298_vm1, %v2468_v57, 0.0  ;;  %v2527_v55 = vsub.s32 1, %v2522_v52 }
 0xd6f   : > { %2474 = vadd.xlane.f32.xlu1 %v2473_v59 }
 0xd70   : > { %v2469_v61 = vmul.f32 %v2466_v58, %v2466_v58  ;;  %v2528_v57 = vrot.slane %v2519_v53, %v2527_v55 }
 0xd72   : > { %v2476_v49 = vsel %vm1298_vm1, %v2469_v61, 0.0 }
 0xd73   : > { %2477 = vadd.xlane.f32.xlu0 %v2476_v49 }
 0xdf4   : > { %v2472_v4 = vpop.xlane.xlu0 %2471 }
 0xdf5   : > { %v2479_v5 = vmul.f32 0.015625, %v2472_v4 }
 0xdf7   : > { %v2482_v6 = vadd.f32 1e-06, %v2479_v5 }
 0xdf8   : > { %v2475_v8 = vpop.xlane.xlu1 %2474 }
 0xdf9   : > { %3856 = vrsqrt.f32 %v2482_v6  ;;  %v2480_v9 = vmul.f32 0.015625, %v2475_v8 }
 0xdfb   : > { %v2483_v10 = vadd.f32 1e-06, %v2480_v9 }
 0xdfc   : > { %v2478_v54 = vpop.xlane.xlu0 %2477 }
 0xdfd   : > { %3858 = vrsqrt.f32 %v2483_v10  ;;  %v2481_v11 = vmul.f32 0.015625, %v2478_v54 }
 0xdff   : > { %v2484_v60 = vadd.f32 1e-06, %v2481_v11 }
 0xe01   : > { %3860 = vrsqrt.f32 %v2484_v60 }
 0xe06   : > { %v3857_v48 = vpop.eup %3856 }
 0xe07   : > { %v2488_v63 = vmul.f32 %v3857_v48, %v2464_v47  ;;  %v3800_v47 = vld [vmem:[%s4763_s14 + $0x40] sm:$0xff]  }
 0xe08   : > { %3428 = vmatprep.subr.bf16.mxu0 %v3800_v47 }
 0xe09   : > { %v2497_v15 = vmul.f32 %v3320_v12, %v2488_v63  ;;  %3429 = vmatpush3.bf16.msra.mxu0 %v3801_v50 }
 0xe0a   : > { %v3859_v13 = vpop.eup %3858 }
 0xe0b   : > { %v2489_v14 = vmul.f32 %v3859_v13, %v2465_v7  ;;  %v2506_v19 = vadd.f32 %v3321_v16, %v2497_v15  ;;  %v2523_v7 = vsub.s32 0, %v2522_v52 }
 0xe0d   : > { %v2498_v17 = vmul.f32 %v3320_v12, %v2489_v14  ;;  %v2524_v56 = vrot.slane %v2519_v53, %v2523_v7 }
 0xe0e   : > { %v3861_v18 = vpop.eup %3860 }
 0xe0f   : > { %v2507_v20 = vadd.f32 %v3321_v16, %v2498_v17  ;;  %v2490_v21 = vmul.f32 %v3861_v18, %v2466_v58 }
 0xe11   : > { %v2509_v22 = vpack.c.bf16 %v2507_v20, %v2506_v19  ;;  %v2499_v23 = vmul.f32 %v3320_v12, %v2490_v21 }
 0xe13   : > { %3330 = vmatmul.mubr.msk.bf16.vlgmr.msra.gmra.mxu1 %vm1298_vm1, %v2509_v22  ;;  %v2508_v24 = vadd.f32 %v3321_v16, %v2499_v23 }
 0xe14   : > { %2619 = vmatprep.mubr.bf16.mxu1 %v4337_v3 }
 0xe15   : > { %v2510_v25 = vpack.c.bf16 %v2508_v24, %v2508_v24 }
 0xe1b   : > { %3331 = vmatmul.mubr.msk.bf16.gmra.mxu1 %vm1298_vm1, %v2510_v25 }
 0xed3   : > { %v2611_v58 = vpop.f32.mrf.mxu1 }
 0xed4   : > { %v2612_v59 = vadd.f32 %v2611_v58, %v2524_v56 }
 0xed5   : > { %v2613_v61 = vpop.f32.mrf.mxu1 }
 0xed6   : > { %v2634_v49 = vmul.f32 0.044715, %v2612_v59  ;;  %v2614_v62 = vadd.f32 %v2613_v61, %v2528_v57  ;;  %v2628_v52 = vmul.f32 0.5, %v2612_v59 }
 0xed7   : > { %v2615_v36 = vpop.f32.mrf.mxu1 }
 0xed8   : > { %v2640_v37 = vmul.f32 %v2634_v49, %v2612_v59  ;;  %v2635_v35 = vmul.f32 0.044715, %v2614_v62  ;;  %v2616_v39 = vadd.f32 %v2615_v36, %v2524_v56  ;;  %v2629_v47 = vmul.f32 0.5, %v2614_v62 }
 0xed9   : > { %v2617_v0 = vpop.f32.mrf.mxu1 }
 0xeda   : > { %v2646_v1 = vmul.f32 %v2640_v37, %v2612_v59  ;;  %v2641_v2 = vmul.f32 %v2635_v35, %v2614_v62  ;;  %v2636_v3 = vmul.f32 0.044715, %v2616_v39  ;;  %v2618_v4 = vadd.f32 %v2617_v0, %v2528_v57 }
 0xedb   : > { %v2621_v5 = vpop.f32.mrf.mxu1  ;;  %v2630_v45 = vmul.f32 0.5, %v2616_v39 }
 0xedc   : > { %v2652_v6 = vadd.f32 %v2646_v1, %v2612_v59  ;;  %v2647_v8 = vmul.f32 %v2641_v2, %v2614_v62  ;;  %v2642_v9 = vmul.f32 %v2636_v3, %v2616_v39  ;;  %v2637_v10 = vmul.f32 0.044715, %v2618_v4 }
 0xedd   : > { %v2622_v54 = vadd.f32 %v2621_v5, %v2524_v56  ;;  %v2623_v11 = vpop.f32.mrf.mxu1  ;;  %v2631_v50 = vmul.f32 0.5, %v2618_v4  ;;  %v3348_v5 = vld [vmem:[%s958_s23] ss:$0 sm:$0xff] }
 0xede   : > { %v2658_v60 = vmul.f32 0.7978846, %v2652_v6  ;;  %v2648_v48 = vmul.f32 %v2642_v9, %v2616_v39  ;;  %v2643_v63 = vmul.f32 %v2637_v10, %v2618_v4  ;;  %v2624_v12 = vadd.f32 %v2623_v11, %v2528_v57 }
 0xedf   : > { %v2638_v13 = vmul.f32 0.044715, %v2622_v54  ;;  %v2625_v14 = vpop.f32.mrf.mxu1  ;;  %v2653_v15 = vadd.f32 %v2647_v8, %v2614_v62 }
 0xee0   : > { %v2654_v16 = vadd.f32 %v2648_v48, %v2616_v39  ;;  %v2649_v17 = vmul.f32 %v2643_v63, %v2618_v4  ;;  %v2639_v18 = vmul.f32 0.044715, %v2624_v12  ;;  %3862 = vtanh.f32 %v2658_v60 }
 0xee1   : > { %v2644_v19 = vmul.f32 %v2638_v13, %v2622_v54  ;;  %v2626_v20 = vpop.f32.mrf.mxu1  ;;  %v2659_v21 = vmul.f32 0.7978846, %v2653_v15  ;;  %v2633_v49 = vmul.f32 0.5, %v2624_v12  ;;  %v2632_v39 = vmul.f32 0.5, %v2622_v54 }
 0xee2   : > { %v2660_v22 = vmul.f32 0.7978846, %v2654_v16  ;;  %v2645_v23 = vmul.f32 %v2639_v18, %v2624_v12  ;;  %v2655_v24 = vadd.f32 %v2649_v17, %v2618_v4 }
 0xee3   : > { %3864 = vtanh.f32 %v2659_v21  ;;  %v2650_v25 = vmul.f32 %v2644_v19, %v2622_v54 }
 0xee4   : > { %3866 = vtanh.f32 %v2660_v22  ;;  %v2661_v26 = vmul.f32 0.7978846, %v2655_v24  ;;  %v2651_v27 = vmul.f32 %v2645_v23, %v2624_v12 }
 0xee5   : > { %v2656_v28 = vadd.f32 %v2650_v25, %v2622_v54 }
 0xee6   : > { %3868 = vtanh.f32 %v2661_v26  ;;  %v2657_v29 = vadd.f32 %v2651_v27, %v2624_v12 }
 0xee7   : > { %v2662_v31 = vmul.f32 0.7978846, %v2656_v28 }
 0xee8   : > { %v2663_v32 = vmul.f32 0.7978846, %v2657_v29 }
 0xee9   : > { %3870 = vtanh.f32 %v2662_v31 }
 0xeea   : > { %3872 = vtanh.f32 %v2663_v32 }
 0xeed   : > { %v3863_v33 = vpop.eup %3862 }
 0xeee   : > { %v2670_v46 = vadd.f32 1.0, %v3863_v33 }
 0xef0   : > { %v3865_v34 = vpop.eup %3864  ;;  %v2676_v58 = vmul.f32 %v2670_v46, %v2628_v52 }
 0xef1   : > { %v3867_v38 = vpop.eup %3866  ;;  %v2671_v40 = vadd.f32 1.0, %v3865_v34 }
 0xef2   : > { %v2672_v43 = vadd.f32 1.0, %v3867_v38 }
 0xef3   : > { %v3869_v44 = vpop.eup %3868  ;;  %v2677_v55 = vmul.f32 %v2671_v40, %v2629_v47 }
 0xef4   : > { %v2673_v51 = vadd.f32 1.0, %v3869_v44  ;;  %v2678_v7 = vmul.f32 %v2672_v43, %v2630_v45 }
 0xef6   : > { %v3871_v53 = vpop.eup %3870  ;;  %v2679_v56 = vmul.f32 %v2673_v51, %v2631_v50  ;;  %v2682_v37 = vpack.c.bf16 %v2678_v7, %v2676_v58 }
 0xef7   : > { %v3873_v57 = vpop.eup %3872  ;;  %v2674_v35 = vadd.f32 1.0, %v3871_v53 }
 0xef8   : > { %v2683_v61 = vpack.c.bf16 %v2679_v56, %v2677_v55  ;;  %v2675_v36 = vadd.f32 1.0, %v3873_v57 }
 0xef9   : > { %v2680_v1 = vmul.f32 %v2674_v35, %v2632_v39 }
 0xefa   : > { %2846 = vmatprep.mubr.bf16.mxu0 %v2683_v61  ;;  %v2681_v0 = vmul.f32 %v2675_v36, %v2633_v49 }
 0xefb   : > { %2847 = vmatmul.mubr.bf16.vlgmr.msra.gmra.mxu0 %v2682_v37  ;;  %v2684_v59 = vpack.c.bf16 %v2680_v1, %v2680_v1 }
 0xefc   : > { %v2685_v62 = vpack.c.bf16 %v2681_v0, %v2681_v0 }
 0xefe   : > { %2854 = vmatprep.mubr.bf16.mxu0 %v2685_v62 }
 0xf03   : > { %2855 = vmatmul.mubr.bf16.gmra.mxu0 %v2684_v59 }
 0xfbb   : > { %v3430_v2 = vpop.f32.mrf.mxu0 }
 0xfbd   : > { %v3431_v3 = vpop.f32.mrf.mxu0 }
 0xfbe   : > { %v3432_v4 = vadd.f32 %v3431_v3, %v3430_v2 }
 0xfbf   : > { %v3433_v6 = vpop.f32.mrf.mxu0 }
 0xfc0   : > { %v2862_v8 = vadd.f32 %v3432_v4, %v5054_v30 }
 0xfc1   : > { %v3434_v9 = vpop.f32.mrf.mxu0 }
 0xfc2   : > { %v2872_v10 = vadd.f32 %v3348_v5, %v2862_v8  ;;  %v3435_v11 = vadd.f32 %v3434_v9, %v3433_v6 }
 0xfc3   : > { %v3436_v54 = vpop.f32.mrf.mxu0 }
 0xfc4   : > { %2875 = vst.msk [vmem:[%s4768_s17] sm:$0xff] %vm1298_vm1, %v2872_v10  ;;  %v2863_v60 = vadd.f32 %v3435_v11, %v5060_v41 }
 0xfc5   : > { %v3437_v48 = vpop.f32.mrf.mxu0 }
 0xfc6   : > { %v2873_v63 = vadd.f32 %v3348_v5, %v2863_v60  ;;  %v3438_v12 = vadd.f32 %v3437_v48, %v3436_v54 }
 0xfc7   : > { %v3439_v13 = vpop.f32.mrf.mxu0 }
 0xfc8   : > { %2876 = vst.msk [vmem:[%s4768_s17 + $0x8] sm:$0xff] %vm1298_vm1, %v2873_v63  ;;  %v2864_v14 = vadd.f32 %v3438_v12, %v5062_v42 }
 0xfc9   : > { %v3440_v15 = vpop.f32.mrf.mxu0 }
 0xfca   : > { %v2874_v16 = vadd.f32 %v3348_v5, %v2864_v14 }
 0xfcc   : > { %2877 = vst.msk [vmem:[%s4768_s17 + $0x10] sm:$0xff] %vm1298_vm1, %v2874_v16 }
 0xfcd PF: > { %s5247_s14 = sld [smem:[#allocation26_spill]]  ;;  %s5254_s24 = smov %s4303_s25 }
 0xfce   : > { %s5248_s1 = sld [smem:[#allocation21_spill]] }
 0xfcf   : > { %s5249_s22 = sld [smem:[#allocation22_spill]] }
 0xfd0   : > { %s5250_s23 = sld [smem:[#allocation29_spill]] }
 0xfd1   : > { %s5251_s2 = sld [smem:[#allocation25_spill]] }
 0xfd2   : > { %s5252_s19 = sld [smem:[#allocation27_spill]] }
 0xfd3   : > { %s32_s26 = sadd.s32 1, %s5247_s14   ;;  %s5253_s3 = sld [smem:[#allocation28_spill]] }
 0xfd4   : > { %p29_p3 = scmp.ge.s32.totalorder %s32_s26, 6  }
 0xfd6   :  { %31 = sbr.rel (!%p29_p3) target bundleno = 27 (0x1b), region = 279 }
 0xfd8   : > { %s5255_s25 = smov %s5252_s19 }
 0xfdb   :  { %2899 = vsyncpa [#allocation4], 1 }
 0xfdc   :  { %2901 = vsyncpa [#allocation4 + $0x1], 1 }
 0xfdd   :  { %2902 = vsyncpa [#allocation6], 1 }

// kernel: vit_forward.3
= control target key start
LH: loop header
LB: loop body
LE: loop exit
PB: predicated region body
PF: predicated region fallthrough
CT: control target
= control target key end

     0   :  { %s5117_s25 = smov 0   ;;  %s6644_s0 = inlined_call_operand.vmem [shape: f32[32,64], index: 0, kind: input, shape index: {}]   ;;  %s6645_s1 = inlined_call_operand.vmem [shape: f32[1,64], index: 1, kind: input, shape index: {}]   ;;  %s6646_s2 = inlined_call_operand.vmem [shape: f32[1,64], index: 2, kind: input, shape index: {}]   ;;  %s6647_s3 = inlined_call_operand.vmem [shape: bf16[64,128], index: 3, kind: input, shape index: {}]   ;;  %s6648_s4 = inlined_call_operand.vmem [shape: f32[1,128], index: 4, kind: input, shape index: {}]   ;;  %s6649_s5 = inlined_call_operand.vmem [shape: bf16[128,256], index: 5, kind: input, shape index: {}]   ;;  %s6650_s6 = inlined_call_operand.vmem [shape: f32[1,256], index: 6, kind: input, shape index: {}]   ;;  %s6651_s7 = inlined_call_operand.vmem [shape: bf16[256,512], index: 7, kind: input, shape index: {}]   ;;  %s6652_s8 = inlined_call_operand.vmem [shape: f32[1,512], index: 8, kind: input, shape index: {}]   ;;  %s6653_s9 = inlined_call_operand.vmem [shape: bf16[512,1024], index: 9, kind: input, shape index: {}]   ;;  %s6654_s10 = inlined_call_operand.vmem [shape: f32[1,1024], index: 10, kind: input, shape index: {}]   ;;  %s6655_s11 = inlined_call_operand.vmem [shape: bf16[1024,256], index: 11, kind: input, shape index: {}]   ;;  %s6656_s12 = inlined_call_operand.vmem [shape: f32[1,256], index: 12, kind: input, shape index: {}]   ;;  %s6657_s13 = inlined_call_operand.vmem [shape: f32[32,256], index: 13, kind: output, shape index: {}]  }
   0x1 LB: > { %s4203_s26 = sadd.s32 4294967295, %s5042_s25   ;;  %p4207_p0 = scmp.ge.s32.totalorder %s5042_s25, 1  ;;  %s5042_s25 = sphi %s5117_s25, %s23_s25  }
   0x2   : > { %p388_p1 = scmp.lt.s32.totalorder %s5042_s25, 3 }
   0x4   : > { %p389_p2 = pnand %p4207_p0, %p388_p1 }
   0x5   : > { %s4208_s27 = sshll.u32 (!%p389_p2), %s4203_s26, 1 }
   0x6   : > { %392 = sbr.rel (%p389_p2) target bundleno = 1546 (0x60a), region = 72  ;;  %p434_p3 = scmp.lt.s32.totalorder (!%p389_p2), %s4208_s27, 3 }
   0xb   : > { %s6659_s27 = smov (!%p434_p3, %s4208_s27), 3  ;;  %vm451_vm0 = vcmask 523264   ;;  %v4716_v14 = vld [vmem:[%s6647_s3 + $0x18] sm:$0xff]   ;;  %v5044_v15 = vmov 0.0   ;;  %vm5045_vm1 = vmmov 0   ;;  %v4717_v16 = vld [vmem:[%s6647_s3 + $0x10] sm:$0xff]  }
   0xc   : > { %s4209_s28 = sshll.u32 %s6659_s27, 3  ;;  %4693 = vmatprep.subr.bf16.mxu0 %v5044_v15  ;;  %4701 = vmatprep.mubr.msk.bf16.mxu0 %vm5045_vm1, %v5044_v15  ;;  %v4718_v17 = vld [vmem:[%s6647_s3 + $0x8] sm:$0xff]   ;;  %v4719_v18 = vld [vmem:[%s6647_s3] sm:$0xff]   ;;  %v4720_v19 = vld [vmem:[%s6649_s5 + $0x74] ss:$8 sps:$4 sm:$0xff]   ;;  %v5046_v52 = vmov 0  }
   0xd   : > { %s437_s14 = scalar_lea.vmem %s6644_s0, %s4209_s28  ;;  %4694 = vmatpush3.bf16.msra.mxu0 %v4716_v14  ;;  %v4722_v20 = vld [vmem:[%s6649_s5 + $0x70] ss:$8 sps:$4 sm:$0xff]   ;;  %v4723_v21 = vld [vmem:[%s6649_s5 + $0x64] ss:$8 sps:$4 sm:$0xff]   ;;  %690 = vmatprep.subr.bf16.mxu1 %v4720_v19  ;;  %v4725_v22 = vld [vmem:[%s6649_s5 + $0x60] ss:$8 sps:$4 sm:$0xff]  }
   0xe   : > { %v447_v0 = vld [vmem:[%s437_s14] sm:$0xff]  ;;  %v448_v1 = vld [vmem:[%s437_s14 + $0x8] sm:$0xff]  ;;  %4695 = vmatprep.subr.bf16.mxu0 %v5044_v15  ;;  %691 = vmatpush1.bf16.msra.mxu1 %v4722_v20  ;;  %v4726_v23 = vld [vmem:[%s6649_s5 + $0x54] ss:$8 sps:$4 sm:$0xff]   ;;  %s4687_s20 = sshll.u32 %s6659_s27, 4 }
   0xf   : > { %v452_v2 = vsel %vm451_vm0, %v447_v0, 0.0  ;;  %v455_v3 = vsel %vm451_vm0, %v448_v1, 0.0  ;;  %692 = vmatprep.subr.bf16.mxu1 %v4723_v21  ;;  %v4728_v24 = vld [vmem:[%s6649_s5 + $0x50] ss:$8 sps:$4 sm:$0xff]   ;;  %v4729_v25 = vld [vmem:[%s6649_s5 + $0x44] ss:$8 sps:$4 sm:$0xff]   ;;  %722 = vmatprep.mubr.bf16.mxu1 %v5046_v52  ;;  %s444_s23 = scalar_lea.vmem %s6657_s13, %s4687_s20 }
  0x10   : > { %453 = vadd.xlane.f32.xlu0 %v452_v2  ;;  %v4731_v26 = vld [vmem:[%s6649_s5 + $0x40] ss:$8 sps:$4 sm:$0xff]   ;;  %v4732_v27 = vld [vmem:[%s6649_s5 + $0x34] ss:$8 sps:$4 sm:$0xff]   ;;  %v4734_v28 = vld [vmem:[%s6649_s5 + $0x30] ss:$8 sps:$4 sm:$0xff]  }
  0x11   : > { %4696 = vmatpush3.bf16.msra.mxu0 %v4717_v16  ;;  %v4735_v29 = vld [vmem:[%s6649_s5 + $0x24] ss:$8 sps:$4 sm:$0xff]   ;;  %v4213_v38 = vld [vmem:[%s6645_s1] ss:$0 sm:$0xff]  ;;  %v4738_v48 = vld [vmem:[%s6649_s5 + $0x14] ss:$8 sps:$4 sm:$0xff]  }
  0x12   : > { %4697 = vmatprep.subr.bf16.mxu0 %v5044_v15  ;;  %693 = vmatpush1.bf16.msra.mxu1 %v4725_v22  ;;  %v4214_v42 = vld [vmem:[%s6646_s2] ss:$0 sm:$0xff]  ;;  %v4740_v49 = vld [vmem:[%s6649_s5 + $0x10] ss:$8 sps:$4 sm:$0xff]   ;;  %v4741_v50 = vld [vmem:[%s6649_s5 + $0x4] ss:$8 sps:$4 sm:$0xff]  }
  0x13   : > { %694 = vmatprep.subr.bf16.mxu1 %v4726_v23  ;;  %v4737_v47 = vld [vmem:[%s6649_s5 + $0x20] ss:$8 sps:$4 sm:$0xff]   ;;  %v4746_v54 = vld [vmem:[%s6651_s7 + $0xe4] ss:$16 sps:$4 sm:$0xff]   ;;  %v4749_v55 = vld [vmem:[%s6651_s7 + $0xec] ss:$16 sps:$4 sm:$0xff]  }
  0x14   : > { %456 = vadd.xlane.f32.xlu0 %v455_v3  ;;  %v4743_v51 = vld [vmem:[%s6649_s5] ss:$8 sps:$4 sm:$0xff]   ;;  %v4752_v56 = vld [vmem:[%s6651_s7 + $0xc4] ss:$16 sps:$4 sm:$0xff]   ;;  %v4827_v52 = vld [vmem:[%s6651_s7 + $0x14c] ss:$16 sps:$4 sm:$0xff]  }
  0x15   : > { %4698 = vmatpush3.bf16.msra.mxu0 %v4718_v17  ;;  %v4744_v53 = vld [vmem:[%s6651_s7 + $0xe0] ss:$16 sps:$4 sm:$0xff]   ;;  %v4758_v58 = vld [vmem:[%s6651_s7 + $0xa4] ss:$16 sps:$4 sm:$0xff]  }
  0x16   : > { %4699 = vmatprep.subr.bf16.mxu0 %v5044_v15  ;;  %695 = vmatpush1.bf16.msra.mxu1 %v4728_v24  ;;  %v4750_v57 = vld [vmem:[%s6651_s7 + $0xc0] ss:$16 sps:$4 sm:$0xff]   ;;  %v4764_v60 = vld [vmem:[%s6651_s7 + $0x84] ss:$16 sps:$4 sm:$0xff]  }
  0x17   : > { %696 = vmatprep.subr.bf16.mxu1 %v4729_v25  ;;  %v4756_v59 = vld [vmem:[%s6651_s7 + $0xa0] ss:$16 sps:$4 sm:$0xff]   ;;  %v4770_v62 = vld [vmem:[%s6651_s7 + $0x64] ss:$16 sps:$4 sm:$0xff]   ;;  %v4747_v25 = vld [vmem:[%s6651_s7 + $0xe8] ss:$16 sps:$4 sm:$0xff]  }
  0x18   : > { %v4762_v61 = vld [vmem:[%s6651_s7 + $0x80] ss:$16 sps:$4 sm:$0xff]   ;;  %v4782_v2 = vld [vmem:[%s6651_s7 + $0x24] ss:$16 sps:$4 sm:$0xff]  }
  0x19   : > { %4700 = vmatpush3.bf16.msra.mxu0 %v4719_v18  ;;  %v4768_v63 = vld [vmem:[%s6651_s7 + $0x60] ss:$16 sps:$4 sm:$0xff]   ;;  %v4818_v14 = vld [vmem:[%s6651_s7 + $0x164] ss:$16 sps:$4 sm:$0xff]  }
  0x1a   : > { %697 = vmatpush1.bf16.msra.mxu1 %v4731_v26  ;;  %1145 = vmatprep.subr.bf16.mxu0 %v4746_v54  ;;  %v4780_v3 = vld [vmem:[%s6651_s7 + $0x20] ss:$16 sps:$4 sm:$0xff]   ;;  %v4825_v54 = vld [vmem:[%s6651_s7 + $0x148] ss:$16 sps:$4 sm:$0xff]  }
  0x1b   : > { %698 = vmatprep.subr.bf16.mxu1 %v4732_v27  ;;  %v4816_v15 = vld [vmem:[%s6651_s7 + $0x160] ss:$16 sps:$4 sm:$0xff]   ;;  %v4755_v27 = vld [vmem:[%s6651_s7 + $0xcc] ss:$16 sps:$4 sm:$0xff]  }
  0x1c   : > { %v4215_v16 = vld [vmem:[%s6648_s4] ss:$0 sm:$0xff] }
  0x1e   : > { %699 = vmatpush1.bf16.msra.mxu1 %v4734_v28  ;;  %v4753_v28 = vld [vmem:[%s6651_s7 + $0xc8] ss:$16 sps:$4 sm:$0xff]  }
  0x1f   : > { %700 = vmatprep.subr.bf16.mxu1 %v4735_v29  ;;  %v4761_v29 = vld [vmem:[%s6651_s7 + $0xac] ss:$16 sps:$4 sm:$0xff]  }
  0x22   : > { %701 = vmatpush1.bf16.msra.mxu1 %v4737_v47  ;;  %v4815_v47 = vld [vmem:[%s6651_s7 + $0x18c] ss:$16 sps:$4 sm:$0xff]  }
  0x23   : > { %702 = vmatprep.subr.bf16.mxu1 %v4738_v48  ;;  %v4813_v48 = vld [vmem:[%s6651_s7 + $0x188] ss:$16 sps:$4 sm:$0xff]  }
  0x26   : > { %703 = vmatpush1.bf16.msra.mxu1 %v4740_v49  ;;  %v4821_v49 = vld [vmem:[%s6651_s7 + $0x16c] ss:$16 sps:$4 sm:$0xff]  }
  0x27   : > { %704 = vmatprep.subr.bf16.mxu1 %v4741_v50  ;;  %v4819_v50 = vld [vmem:[%s6651_s7 + $0x168] ss:$16 sps:$4 sm:$0xff]  }
  0x2a   : > { %705 = vmatpush1.bf16.msra.mxu1 %v4743_v51  ;;  %v4824_v51 = vld [vmem:[%s6651_s7 + $0x144] ss:$16 sps:$4 sm:$0xff]  }
  0x2b   : > { %1188 = vmatprep.subr.bf16.mxu1 %v4749_v55  ;;  %v4830_v55 = vld [vmem:[%s6651_s7 + $0x124] ss:$16 sps:$4 sm:$0xff]  }
  0x99   : > { %v454_v4 = vpop.xlane.xlu0 %453 }
  0x9a   : > { %v459_v5 = vmul.f32 0.015625, %v454_v4  ;;  %v4788_v4 = vld [vmem:[%s6651_s7 + $0x4] ss:$16 sps:$4 sm:$0xff]  }
  0x9c   : > { %v461_v6 = vsub.f32 %v447_v0, %v459_v5  ;;  %v4776_v0 = vld [vmem:[%s6651_s7 + $0x44] ss:$16 sps:$4 sm:$0xff]   ;;  %v4786_v5 = vld [vmem:[%s6651_s7] ss:$16 sps:$4 sm:$0xff]  }
  0x9d   : > { %v457_v7 = vpop.xlane.xlu0 %456 }
  0x9e   : > { %v460_v8 = vmul.f32 0.015625, %v457_v7  ;;  %v463_v9 = vmul.f32 %v461_v6, %v461_v6  ;;  %v4792_v7 = vld [vmem:[%s6651_s7 + $0x1e0] ss:$16 sps:$4 sm:$0xff]  }
  0xa0   : > { %v462_v10 = vsub.f32 %v448_v1, %v460_v8  ;;  %v465_v11 = vsel %vm451_vm0, %v463_v9, 0.0  ;;  %v4774_v1 = vld [vmem:[%s6651_s7 + $0x40] ss:$16 sps:$4 sm:$0xff]   ;;  %v4800_v8 = vld [vmem:[%s6651_s7 + $0x1c4] ss:$16 sps:$4 sm:$0xff]  }
  0xa1   : > { %466 = vadd.xlane.f32.xlu1 %v465_v11  ;;  %v4798_v9 = vld [vmem:[%s6651_s7 + $0x1c0] ss:$16 sps:$4 sm:$0xff]  }
  0xa2   : > { %v464_v12 = vmul.f32 %v462_v10, %v462_v10  ;;  %v4804_v11 = vld [vmem:[%s6651_s7 + $0x1a0] ss:$16 sps:$4 sm:$0xff]  }
  0xa4   : > { %v468_v13 = vsel %vm451_vm0, %v464_v12, 0.0  ;;  %v4812_v12 = vld [vmem:[%s6651_s7 + $0x184] ss:$16 sps:$4 sm:$0xff]  }
  0xa5   : > { %469 = vadd.xlane.f32.xlu1 %v468_v13  ;;  %v4810_v13 = vld [vmem:[%s6651_s7 + $0x180] ss:$16 sps:$4 sm:$0xff]  }
 0x12a   : > { %v467_v30 = vpop.xlane.xlu1 %466 }
 0x12b   : > { %v471_v31 = vmul.f32 0.015625, %v467_v30  ;;  %v4759_v30 = vld [vmem:[%s6651_s7 + $0xa8] ss:$16 sps:$4 sm:$0xff]  }
 0x12d   : > { %v473_v32 = vadd.f32 1e-06, %v471_v31  ;;  %v4767_v31 = vld [vmem:[%s6651_s7 + $0x8c] ss:$16 sps:$4 sm:$0xff]  }
 0x12e   : > { %v470_v33 = vpop.xlane.xlu1 %469 }
 0x12f   : > { %5032 = vrsqrt.f32 %v473_v32  ;;  %v472_v34 = vmul.f32 0.015625, %v470_v33  ;;  %v4765_v32 = vld [vmem:[%s6651_s7 + $0x88] ss:$16 sps:$4 sm:$0xff]   ;;  %v4773_v33 = vld [vmem:[%s6651_s7 + $0x6c] ss:$16 sps:$4 sm:$0xff]  }
 0x131   : > { %v474_v35 = vadd.f32 1e-06, %v472_v34  ;;  %v4771_v34 = vld [vmem:[%s6651_s7 + $0x68] ss:$16 sps:$4 sm:$0xff]  }
 0x133   : > { %5034 = vrsqrt.f32 %v474_v35  ;;  %v4779_v35 = vld [vmem:[%s6651_s7 + $0x4c] ss:$16 sps:$4 sm:$0xff]  }
 0x13c   : > { %v5033_v36 = vpop.eup %5032 }
 0x13d   : > { %v477_v37 = vmul.f32 %v5033_v36, %v461_v6  ;;  %v4794_v6 = vld [vmem:[%s6651_s7 + $0x1e4] ss:$16 sps:$4 sm:$0xff]   ;;  %v4777_v36 = vld [vmem:[%s6651_s7 + $0x48] ss:$16 sps:$4 sm:$0xff]  }
 0x13f   : > { %v485_v41 = vmul.f32 %v4213_v38, %v477_v37  ;;  %v4785_v37 = vld [vmem:[%s6651_s7 + $0x2c] ss:$16 sps:$4 sm:$0xff]  }
 0x140   : > { %v5035_v39 = vpop.eup %5034 }
 0x141   : > { %v478_v40 = vmul.f32 %v5035_v39, %v462_v10  ;;  %v493_v44 = vadd.f32 %v4214_v42, %v485_v41  ;;  %v4806_v10 = vld [vmem:[%s6651_s7 + $0x1a4] ss:$16 sps:$4 sm:$0xff]   ;;  %v4791_v39 = vld [vmem:[%s6651_s7 + $0xc] ss:$16 sps:$4 sm:$0xff]  }
 0x142   : > { %v4797_v41 = vld [vmem:[%s6651_s7 + $0x1ec] ss:$16 sps:$4 sm:$0xff]  }
 0x143   : > { %v486_v43 = vmul.f32 %v4213_v38, %v478_v40  ;;  %v4783_v38 = vld [vmem:[%s6651_s7 + $0x28] ss:$16 sps:$4 sm:$0xff]  }
 0x144   : > { %v4789_v40 = vld [vmem:[%s6651_s7 + $0x8] ss:$16 sps:$4 sm:$0xff]  }
 0x145   : > { %v494_v45 = vadd.f32 %v4214_v42, %v486_v43  ;;  %v4795_v42 = vld [vmem:[%s6651_s7 + $0x1e8] ss:$16 sps:$4 sm:$0xff]   ;;  %v4803_v43 = vld [vmem:[%s6651_s7 + $0x1cc] ss:$16 sps:$4 sm:$0xff]  }
 0x147   : > { %v495_v46 = vpack.c.bf16 %v494_v45, %v493_v44  ;;  %v4801_v44 = vld [vmem:[%s6651_s7 + $0x1c8] ss:$16 sps:$4 sm:$0xff]   ;;  %v4809_v45 = vld [vmem:[%s6651_s7 + $0x1ac] ss:$16 sps:$4 sm:$0xff]  }
 0x149   : > { %4702 = vmatmul.mubr.msk.bf16.vlgmr.msra.gmra.mxu0 %vm451_vm0, %v495_v46  ;;  %v4807_v46 = vld [vmem:[%s6651_s7 + $0x1a8] ss:$16 sps:$4 sm:$0xff]  }
 0x14a   : > { %1146 = vmatpush1.bf16.msra.mxu0 %v4744_v53  ;;  %v4822_v53 = vld [vmem:[%s6651_s7 + $0x140] ss:$16 sps:$4 sm:$0xff]  }
 0x14b   : > { %1147 = vmatprep.subr.bf16.mxu0 %v4752_v56  ;;  %v4833_v56 = vld [vmem:[%s6651_s7 + $0x12c] ss:$16 sps:$4 sm:$0xff]  }
 0x14e   : > { %1148 = vmatpush1.bf16.msra.mxu0 %v4750_v57  ;;  %v4828_v57 = vld [vmem:[%s6651_s7 + $0x120] ss:$16 sps:$4 sm:$0xff]  }
 0x14f   : > { %1149 = vmatprep.subr.bf16.mxu0 %v4758_v58  ;;  %v4831_v58 = vld [vmem:[%s6651_s7 + $0x128] ss:$16 sps:$4 sm:$0xff]  }
 0x152   : > { %1150 = vmatpush1.bf16.msra.mxu0 %v4756_v59  ;;  %v4836_v59 = vld [vmem:[%s6651_s7 + $0x104] ss:$16 sps:$4 sm:$0xff]  }
 0x153   : > { %1151 = vmatprep.subr.bf16.mxu0 %v4764_v60  ;;  %v4839_v60 = vld [vmem:[%s6651_s7 + $0x10c] ss:$16 sps:$4 sm:$0xff]  }
 0x156   : > { %1152 = vmatpush1.bf16.msra.mxu0 %v4762_v61  ;;  %v4834_v61 = vld [vmem:[%s6651_s7 + $0x100] ss:$16 sps:$4 sm:$0xff]  }
 0x157   : > { %1153 = vmatprep.subr.bf16.mxu0 %v4770_v62  ;;  %v4837_v62 = vld [vmem:[%s6651_s7 + $0x108] ss:$16 sps:$4 sm:$0xff]  }
 0x15a   : > { %1154 = vmatpush1.bf16.msra.mxu0 %v4768_v63  ;;  %v1299_v63 = vld [vmem:[%s6653_s9 + $0x1c0] sm:$0xff] }
 0x15b   : > { %1155 = vmatprep.subr.bf16.mxu0 %v4776_v0  ;;  %v1303_v0 = vld [vmem:[%s6653_s9 + $0x1e0] sm:$0xff] }
 0x15e   : > { %1156 = vmatpush1.bf16.msra.mxu0 %v4774_v1  ;;  %v1427_v1 = vld [vmem:[%s6653_s9 + $0x5c0] sm:$0xff] }
 0x15f   : > { %1157 = vmatprep.subr.bf16.mxu0 %v4782_v2  ;;  %v4357_v2 = vcombine.low %v1299_v63, %v1303_v0 }
 0x162   : > { %1158 = vmatpush1.bf16.msra.mxu0 %v4780_v3  ;;  %v4358_v3 = vcombine.high %v1299_v63, %v1303_v0 }
 0x163   : > { %1159 = vmatprep.subr.bf16.mxu0 %v4788_v4  ;;  %v1431_v4 = vld [vmem:[%s6653_s9 + $0x5e0] sm:$0xff] }
 0x166   : > { %1160 = vmatpush1.bf16.msra.mxu0 %v4786_v5  ;;  %v4485_v5 = vcombine.low %v1427_v1, %v1431_v4 }
 0x167   : > { %1161 = vmatprep.subr.bf16.mxu0 %v4794_v6  ;;  %v4486_v6 = vcombine.high %v1427_v1, %v1431_v4  ;;  %v1379_v4 = vld [vmem:[%s6653_s9 + $0x440] sm:$0xff] }
 0x16a   : > { %1162 = vmatpush2.bf16.msra.mxu0 %v4792_v7  ;;  %v600_v7 = vlaneseq }
 0x16b   : > { %1163 = vmatprep.subr.bf16.mxu0 %v4800_v8 }
 0x16c   : > { %v5409_v8 = vshrl.u32 %v600_v7, 7 }
 0x16e   : > { %1164 = vmatpush2.bf16.msra.mxu0 %v4798_v9  ;;  %v5412_v9 = vsub.s32 1, %v5409_v8 }
 0x16f   : > { %1165 = vmatprep.subr.bf16.mxu0 %v4806_v10  ;;  %v5415_v10 = vsub.s32 0, %v5409_v8 }
 0x172   : > { %1166 = vmatpush2.bf16.msra.mxu0 %v4804_v11  ;;  %v598_v11 = vld [vmem:[%s6650_s6] sm:$0x3] }
 0x173   : > { %1167 = vmatprep.subr.bf16.mxu0 %v4812_v12 }
 0x176   : > { %1168 = vmatpush2.bf16.msra.mxu0 %v4810_v13  ;;  %v607_v13 = vrot.slane %v598_v11, %v5412_v9 }
 0x177   : > { %1169 = vmatprep.subr.bf16.mxu0 %v4818_v14  ;;  %v603_v14 = vrot.slane %v598_v11, %v5415_v10 }
 0x17a   : > { %1170 = vmatpush2.bf16.msra.mxu0 %v4816_v15 }
 0x17b   : > { %1171 = vmatprep.subr.bf16.mxu0 %v4824_v51  ;;  %v1271_v51 = vld [vmem:[%s6653_s9 + $0xe0] sm:$0xff] }
 0x17e   : > { %1172 = vmatpush2.bf16.msra.mxu0 %v4822_v53  ;;  %v1399_v53 = vld [vmem:[%s6653_s9 + $0x4e0] sm:$0xff] }
 0x17f   : > { %1173 = vmatprep.subr.bf16.mxu0 %v4830_v55 }
 0x182   : > { %1174 = vmatpush2.bf16.msra.mxu0 %v4828_v57 }
 0x183   : > { %1175 = vmatprep.subr.bf16.mxu0 %v4836_v59  ;;  %v1263_v59 = vld [vmem:[%s6653_s9 + $0xa0] sm:$0xff] }
 0x186   : > { %1176 = vmatpush2.bf16.msra.mxu0 %v4834_v61  ;;  %v1391_v61 = vld [vmem:[%s6653_s9 + $0x4a0] sm:$0xff] }
 0x187   : > { %2821 = vmatprep.subr.bf16.mxu0 %v4358_v3  ;;  %v1255_v3 = vld [vmem:[%s6653_s9 + $0x60] sm:$0xff] }
 0x209   : > { %v572_v17 = vpop.f32.mrf.mxu0 }
 0x20a   : > { %v573_v19 = vadd.f32 %v4215_v16, %v572_v17 }
 0x20b   : > { %v4703_v18 = vpop.f32.mrf.mxu0 }
 0x20c   : > { %v579_v23 = vmax.f32 %v573_v19, 0.0 }
 0x20d   : > { %v575_v20 = vpop.f32.mrf.mxu0 }
 0x20e   : > { %v576_v21 = vadd.f32 %v4215_v16, %v575_v20 }
 0x20f   : > { %v4704_v22 = vpop.f32.mrf.mxu0 }
 0x210   : > { %v580_v24 = vmax.f32 %v576_v21, 0.0 }
 0x212   : > { %v581_v26 = vpack.c.bf16 %v580_v24, %v579_v23  ;;  %v1291_v23 = vld [vmem:[%s6653_s9 + $0x180] sm:$0xff] }
 0x214   : > { %723 = vmatmul.mubr.bf16.vlgmr.msra.gmra.mxu1 %v581_v26  ;;  %v1295_v26 = vld [vmem:[%s6653_s9 + $0x1a0] sm:$0xff] }
 0x215   : > { %1189 = vmatpush1.bf16.msra.mxu1 %v4747_v25 }
 0x216   : > { %1190 = vmatprep.subr.bf16.mxu1 %v4755_v27  ;;  %v1419_v27 = vld [vmem:[%s6653_s9 + $0x580] sm:$0xff] }
 0x219   : > { %1191 = vmatpush1.bf16.msra.mxu1 %v4753_v28  ;;  %v1423_v28 = vld [vmem:[%s6653_s9 + $0x5a0] sm:$0xff] }
 0x21a   : > { %1192 = vmatprep.subr.bf16.mxu1 %v4761_v29 }
 0x21d   : > { %1193 = vmatpush1.bf16.msra.mxu1 %v4759_v30 }
 0x21e   : > { %1194 = vmatprep.subr.bf16.mxu1 %v4767_v31 }
 0x221   : > { %1195 = vmatpush1.bf16.msra.mxu1 %v4765_v32  ;;  %v4350_v32 = vcombine.high %v1291_v23, %v1295_v26 }
 0x222   : > { %1196 = vmatprep.subr.bf16.mxu1 %v4773_v33  ;;  %v4478_v33 = vcombine.high %v1419_v27, %v1423_v28 }
 0x225   : > { %1197 = vmatpush1.bf16.msra.mxu1 %v4771_v34  ;;  %v1283_v34 = vld [vmem:[%s6653_s9 + $0x140] sm:$0xff] }
 0x226   : > { %1198 = vmatprep.subr.bf16.mxu1 %v4779_v35  ;;  %v1287_v35 = vld [vmem:[%s6653_s9 + $0x160] sm:$0xff] }
 0x229   : > { %1199 = vmatpush1.bf16.msra.mxu1 %v4777_v36  ;;  %v1411_v36 = vld [vmem:[%s6653_s9 + $0x540] sm:$0xff] }
 0x22a   : > { %1200 = vmatprep.subr.bf16.mxu1 %v4785_v37  ;;  %v1415_v37 = vld [vmem:[%s6653_s9 + $0x560] sm:$0xff] }
 0x22d   : > { %1201 = vmatpush1.bf16.msra.mxu1 %v4783_v38  ;;  %v4349_v38 = vcombine.low %v1291_v23, %v1295_v26  ;;  %v1491_v23 = vld [vmem:[%s6653_s9 + $0x7c0] sm:$0xff] }
 0x22e   : > { %1202 = vmatprep.subr.bf16.mxu1 %v4791_v39  ;;  %v4477_v39 = vcombine.low %v1419_v27, %v1423_v28 }
 0x231   : > { %1203 = vmatpush1.bf16.msra.mxu1 %v4789_v40  ;;  %v4342_v40 = vcombine.high %v1283_v34, %v1287_v35 }
 0x232   : > { %1204 = vmatprep.subr.bf16.mxu1 %v4797_v41  ;;  %v4470_v41 = vcombine.high %v1411_v36, %v1415_v37 }
 0x235   : > { %1205 = vmatpush2.bf16.msra.mxu1 %v4795_v42  ;;  %v1275_v42 = vld [vmem:[%s6653_s9 + $0x100] sm:$0xff] }
 0x236   : > { %1206 = vmatprep.subr.bf16.mxu1 %v4803_v43  ;;  %v1279_v43 = vld [vmem:[%s6653_s9 + $0x120] sm:$0xff] }
 0x239   : > { %1207 = vmatpush2.bf16.msra.mxu1 %v4801_v44  ;;  %v1403_v44 = vld [vmem:[%s6653_s9 + $0x500] sm:$0xff] }
 0x23a   : > { %1208 = vmatprep.subr.bf16.mxu1 %v4809_v45  ;;  %v1407_v45 = vld [vmem:[%s6653_s9 + $0x520] sm:$0xff] }
 0x23b   : > { %v4461_v55 = vcombine.low %v1403_v44, %v1407_v45 }
 0x23d   : > { %1209 = vmatpush2.bf16.msra.mxu1 %v4807_v46  ;;  %v4341_v46 = vcombine.low %v1283_v34, %v1287_v35 }
 0x23e   : > { %1210 = vmatprep.subr.bf16.mxu1 %v4815_v47  ;;  %v4469_v47 = vcombine.low %v1411_v36, %v1415_v37  ;;  %v1347_v37 = vld [vmem:[%s6653_s9 + $0x340] sm:$0xff] }
 0x241   : > { %1211 = vmatpush2.bf16.msra.mxu1 %v4813_v48  ;;  %v4334_v48 = vcombine.high %v1275_v42, %v1279_v43 }
 0x242   : > { %1212 = vmatprep.subr.bf16.mxu1 %v4821_v49  ;;  %v4462_v49 = vcombine.high %v1403_v44, %v1407_v45  ;;  %v1339_v45 = vld [vmem:[%s6653_s9 + $0x300] sm:$0xff] }
 0x245   : > { %1213 = vmatpush2.bf16.msra.mxu1 %v4819_v50  ;;  %v1267_v50 = vld [vmem:[%s6653_s9 + $0xc0] sm:$0xff] }
 0x246   : > { %1214 = vmatprep.subr.bf16.mxu1 %v4827_v52  ;;  %v1395_v52 = vld [vmem:[%s6653_s9 + $0x4c0] sm:$0xff] }
 0x247   : > { %v4454_v57 = vcombine.high %v1395_v52, %v1399_v53  ;;  %v4453_v63 = vcombine.low %v1395_v52, %v1399_v53  ;;  %v1331_v53 = vld [vmem:[%s6653_s9 + $0x2c0] sm:$0xff] }
 0x249   : > { %1215 = vmatpush2.bf16.msra.mxu1 %v4825_v54  ;;  %v4333_v54 = vcombine.low %v1275_v42, %v1279_v43 }
 0x24a   : > { %1216 = vmatprep.subr.bf16.mxu1 %v4833_v56  ;;  %v4326_v56 = vcombine.high %v1267_v50, %v1271_v51 }
 0x24d   : > { %1217 = vmatpush2.bf16.msra.mxu1 %v4831_v58  ;;  %v1259_v58 = vld [vmem:[%s6653_s9 + $0x80] sm:$0xff] }
 0x24e   : > { %1218 = vmatprep.subr.bf16.mxu1 %v4839_v60  ;;  %v1387_v60 = vld [vmem:[%s6653_s9 + $0x480] sm:$0xff]  ;;  %v4318_v0 = vcombine.high %v1259_v58, %v1263_v59 }
 0x24f   : > { %v4446_v1 = vcombine.high %v1387_v60, %v1391_v61  ;;  %v4445_v7 = vcombine.low %v1387_v60, %v1391_v61 }
 0x251   : > { %1219 = vmatpush2.bf16.msra.mxu1 %v4837_v62  ;;  %v4325_v62 = vcombine.low %v1267_v50, %v1271_v51 }
 0x252   : > { %2864 = vmatprep.subr.bf16.mxu1 %v4486_v6  ;;  %v4317_v6 = vcombine.low %v1259_v58, %v1263_v59 }
 0x2d4   : > { %v724_v12 = vpop.f32.mrf.mxu1 }
 0x2d5   : > { %v725_v19 = vadd.f32 %v724_v12, %v603_v14 }
 0x2d6   : > { %v726_v15 = vpop.f32.mrf.mxu1 }
 0x2d7   : > { %v727_v17 = vadd.f32 %v726_v15, %v607_v13  ;;  %v733_v29 = vmax.f32 %v725_v19, 0.0  ;;  %v1371_v15 = vld [vmem:[%s6653_s9 + $0x400] sm:$0xff] }
 0x2d8   : > { %v728_v16 = vpop.f32.mrf.mxu1 }
 0x2d9   : > { %v729_v18 = vadd.f32 %v728_v16, %v603_v14  ;;  %v734_v24 = vmax.f32 %v727_v17, 0.0  ;;  %v1247_v14 = vld [vmem:[%s6653_s9 + $0x20] sm:$0xff] }
 0x2da   : > { %v730_v20 = vpop.f32.mrf.mxu1  ;;  %v1375_v16 = vld [vmem:[%s6653_s9 + $0x420] sm:$0xff] }
 0x2db   : > { %v731_v21 = vadd.f32 %v730_v20, %v607_v13  ;;  %v735_v22 = vmax.f32 %v729_v18, 0.0  ;;  %v1243_v13 = vld [vmem:[%s6653_s9] sm:$0xff]  ;;  %v4430_v20 = vcombine.high %v1371_v15, %v1375_v16  ;;  %v4429_v26 = vcombine.low %v1371_v15, %v1375_v16 }
 0x2dc   : > { %v4302_v19 = vcombine.high %v1243_v13, %v1247_v14 }
 0x2dd   : > { %v736_v25 = vmax.f32 %v731_v21, 0.0  ;;  %v737_v31 = vpack.c.bf16 %v735_v22, %v733_v29  ;;  %v1363_v21 = vld [vmem:[%s6653_s9 + $0x3c0] sm:$0xff] }
 0x2de   : > { %v1367_v22 = vld [vmem:[%s6653_s9 + $0x3e0] sm:$0xff] }
 0x2df   : > { %v738_v30 = vpack.c.bf16 %v736_v25, %v734_v24  ;;  %v1495_v24 = vld [vmem:[%s6653_s9 + $0x7e0] sm:$0xff]  ;;  %v4301_v25 = vcombine.low %v1243_v13, %v1247_v14  ;;  %v4422_v27 = vcombine.high %v1363_v21, %v1367_v22 }
 0x2e0   : > { %v4550_v28 = vcombine.high %v1491_v23, %v1495_v24  ;;  %v1355_v29 = vld [vmem:[%s6653_s9 + $0x380] sm:$0xff]  ;;  %v4549_v34 = vcombine.low %v1491_v23, %v1495_v24 }
 0x2e1   : > { %1177 = vmatprep.mubr.bf16.mxu0 %v738_v30  ;;  %1220 = vmatprep.mubr.bf16.mxu1 %v738_v30  ;;  %v1359_v30 = vld [vmem:[%s6653_s9 + $0x3a0] sm:$0xff] }
 0x2e2   : > { %1178 = vmatmul.mubr.bf16.vlgmr.msra.gmra.mxu0 %v737_v31  ;;  %1221 = vmatmul.mubr.bf16.vlgmr.msra.gmra.mxu1 %v737_v31  ;;  %v1483_v31 = vld [vmem:[%s6653_s9 + $0x780] sm:$0xff]  ;;  %v4414_v35 = vcombine.high %v1355_v29, %v1359_v30 }
 0x2e3   : > { %2822 = vmatpush1.bf16.msra.mxu0 %v4357_v2  ;;  %2865 = vmatpush1.bf16.msra.mxu1 %v4485_v5  ;;  %v1251_v2 = vld [vmem:[%s6653_s9 + $0x40] sm:$0xff] }
 0x2e4   : > { %2823 = vmatprep.subr.bf16.mxu0 %v4350_v32  ;;  %2866 = vmatprep.subr.bf16.mxu1 %v4478_v33  ;;  %v1383_v5 = vld [vmem:[%s6653_s9 + $0x460] sm:$0xff]  ;;  %v4310_v11 = vcombine.high %v1251_v2, %v1255_v3  ;;  %v4309_v17 = vcombine.low %v1251_v2, %v1255_v3  ;;  %v4421_v33 = vcombine.low %v1363_v21, %v1367_v22 }
 0x2e5   : > { %v4438_v12 = vcombine.high %v1379_v4, %v1383_v5  ;;  %v4437_v18 = vcombine.low %v1379_v4, %v1383_v5  ;;  %v1487_v32 = vld [vmem:[%s6653_s9 + $0x7a0] sm:$0xff] }
 0x2e6   : > { %v4542_v36 = vcombine.high %v1483_v31, %v1487_v32  ;;  %v4541_v42 = vcombine.low %v1483_v31, %v1487_v32  ;;  %v1455_v3 = vld [vmem:[%s6653_s9 + $0x6a0] sm:$0xff] }
 0x2e7   : > { %2824 = vmatpush1.bf16.msra.mxu0 %v4349_v38  ;;  %2867 = vmatpush1.bf16.msra.mxu1 %v4477_v39  ;;  %v1351_v38 = vld [vmem:[%s6653_s9 + $0x360] sm:$0xff] }
 0x2e8   : > { %2825 = vmatprep.subr.bf16.mxu0 %v4342_v40  ;;  %2868 = vmatprep.subr.bf16.mxu1 %v4470_v41  ;;  %v1475_v39 = vld [vmem:[%s6653_s9 + $0x740] sm:$0xff]  ;;  %v4413_v41 = vcombine.low %v1355_v29, %v1359_v30  ;;  %v4406_v43 = vcombine.high %v1347_v37, %v1351_v38  ;;  %v1432_v30 = vld [vmem:[%s6653_s9 + $0x5e8] sm:$0xff] }
 0x2e9   : > { %v1479_v40 = vld [vmem:[%s6653_s9 + $0x760] sm:$0xff] }
 0x2ea   : > { %v4534_v44 = vcombine.high %v1475_v39, %v1479_v40  ;;  %v4533_v50 = vcombine.low %v1475_v39, %v1479_v40  ;;  %v1447_v14 = vld [vmem:[%s6653_s9 + $0x660] sm:$0xff] }
 0x2eb   : > { %2826 = vmatpush1.bf16.msra.mxu0 %v4341_v46  ;;  %2869 = vmatpush1.bf16.msra.mxu1 %v4469_v47  ;;  %v1343_v46 = vld [vmem:[%s6653_s9 + $0x320] sm:$0xff] }
 0x2ec   : > { %2827 = vmatprep.subr.bf16.mxu0 %v4334_v48  ;;  %2870 = vmatprep.subr.bf16.mxu1 %v4462_v49  ;;  %v1467_v47 = vld [vmem:[%s6653_s9 + $0x700] sm:$0xff]  ;;  %v4405_v49 = vcombine.low %v1347_v37, %v1351_v38  ;;  %v4398_v51 = vcombine.high %v1339_v45, %v1343_v46 }
 0x2ed   : > { %v1471_v48 = vld [vmem:[%s6653_s9 + $0x720] sm:$0xff] }
 0x2ee   : > { %v4526_v52 = vcombine.high %v1467_v47, %v1471_v48  ;;  %v4525_v58 = vcombine.low %v1467_v47, %v1471_v48  ;;  %v1439_v22 = vld [vmem:[%s6653_s9 + $0x620] sm:$0xff] }
 0x2ef   : > { %2828 = vmatpush1.bf16.msra.mxu0 %v4333_v54  ;;  %2871 = vmatpush1.bf16.msra.mxu1 %v4461_v55  ;;  %v1335_v54 = vld [vmem:[%s6653_s9 + $0x2e0] sm:$0xff] }
 0x2f0   : > { %2829 = vmatprep.subr.bf16.mxu0 %v4326_v56  ;;  %2872 = vmatprep.subr.bf16.mxu1 %v4454_v57  ;;  %v1459_v55 = vld [vmem:[%s6653_s9 + $0x6c0] sm:$0xff]  ;;  %v4397_v57 = vcombine.low %v1339_v45, %v1343_v46  ;;  %v4390_v59 = vcombine.high %v1331_v53, %v1335_v54  ;;  %v4389_v61 = vcombine.low %v1331_v53, %v1335_v54 }
 0x2f1   : > { %v1463_v56 = vld [vmem:[%s6653_s9 + $0x6e0] sm:$0xff] }
 0x2f2   : > { %v4518_v60 = vcombine.high %v1459_v55, %v1463_v56 }
 0x2f3   : > { %2830 = vmatpush1.bf16.msra.mxu0 %v4325_v62  ;;  %2873 = vmatpush1.bf16.msra.mxu1 %v4453_v63  ;;  %v4517_v62 = vcombine.low %v1459_v55, %v1463_v56  ;;  %v1323_v63 = vld [vmem:[%s6653_s9 + $0x280] sm:$0xff] }
 0x2f4   : > { %2831 = vmatprep.subr.bf16.mxu0 %v4318_v0  ;;  %2874 = vmatprep.subr.bf16.mxu1 %v4446_v1  ;;  %v1327_v0 = vld [vmem:[%s6653_s9 + $0x2a0] sm:$0xff] }
 0x2f5   : > { %v1451_v1 = vld [vmem:[%s6653_s9 + $0x680] sm:$0xff]  ;;  %v4382_v2 = vcombine.high %v1323_v63, %v1327_v0  ;;  %v4381_v4 = vcombine.low %v1323_v63, %v1327_v0  ;;  %v1292_v63 = vld [vmem:[%s6653_s9 + $0x188] sm:$0xff] }
 0x2f6   : > { %v4509_v5 = vcombine.low %v1451_v1, %v1455_v3 }
 0x2f7   : > { %2832 = vmatpush1.bf16.msra.mxu0 %v4317_v6  ;;  %2875 = vmatpush1.bf16.msra.mxu1 %v4445_v7  ;;  %v4510_v6 = vcombine.high %v1451_v1, %v1455_v3  ;;  %v1315_v7 = vld [vmem:[%s6653_s9 + $0x240] sm:$0xff]  ;;  %v1420_v3 = vld [vmem:[%s6653_s9 + $0x588] sm:$0xff] }
 0x2f8   : > { %2833 = vmatprep.subr.bf16.mxu0 %v4310_v11  ;;  %2876 = vmatprep.subr.bf16.mxu1 %v4438_v12  ;;  %v1319_v11 = vld [vmem:[%s6653_s9 + $0x260] sm:$0xff] }
 0x2f9   : > { %v1443_v12 = vld [vmem:[%s6653_s9 + $0x640] sm:$0xff]  ;;  %v4374_v13 = vcombine.high %v1315_v7, %v1319_v11  ;;  %v4373_v15 = vcombine.low %v1315_v7, %v1319_v11 }
 0x2fa   : > { %v4501_v16 = vcombine.low %v1443_v12, %v1447_v14 }
 0x2fb   : > { %2834 = vmatpush1.bf16.msra.mxu0 %v4309_v17  ;;  %2877 = vmatpush1.bf16.msra.mxu1 %v4437_v18  ;;  %v4502_v17 = vcombine.high %v1443_v12, %v1447_v14  ;;  %v1307_v18 = vld [vmem:[%s6653_s9 + $0x200] sm:$0xff]  ;;  %v1284_v12 = vld [vmem:[%s6653_s9 + $0x148] sm:$0xff] }
 0x2fc   : > { %2835 = vmatprep.subr.bf16.mxu0 %v4302_v19  ;;  %2878 = vmatprep.subr.bf16.mxu1 %v4430_v20  ;;  %v1311_v19 = vld [vmem:[%s6653_s9 + $0x220] sm:$0xff] }
 0x2fd   : > { %v1435_v20 = vld [vmem:[%s6653_s9 + $0x600] sm:$0xff]  ;;  %v4366_v21 = vcombine.high %v1307_v18, %v1311_v19  ;;  %v4365_v23 = vcombine.low %v1307_v18, %v1311_v19 }
 0x2fe   : > { %v4493_v24 = vcombine.low %v1435_v20, %v1439_v22 }
 0x2ff   : > { %2836 = vmatpush1.bf16.msra.mxu0 %v4301_v25  ;;  %2879 = vmatpush1.bf16.msra.mxu1 %v4429_v26  ;;  %v4494_v25 = vcombine.high %v1435_v20, %v1439_v22  ;;  %v1300_v26 = vld [vmem:[%s6653_s9 + $0x1c8] sm:$0xff] }
 0x300   : > { %2837 = vmatprep.subr.bf16.mxu0 %v4422_v27  ;;  %2880 = vmatprep.subr.bf16.mxu1 %v4550_v28  ;;  %v1304_v27 = vld [vmem:[%s6653_s9 + $0x1e8] sm:$0xff] }
 0x301   : > { %v1428_v28 = vld [vmem:[%s6653_s9 + $0x5c8] sm:$0xff]  ;;  %v4360_v29 = vcombine.high %v1300_v26, %v1304_v27  ;;  %v4359_v31 = vcombine.low %v1300_v26, %v1304_v27 }
 0x302   : > { %v4487_v32 = vcombine.low %v1428_v28, %v1432_v30  ;;  %v1276_v22 = vld [vmem:[%s6653_s9 + $0x108] sm:$0xff] }
 0x303   : > { %2838 = vmatpush2.bf16.msra.mxu0 %v4421_v33  ;;  %2881 = vmatpush2.bf16.msra.mxu1 %v4549_v34  ;;  %v4488_v33 = vcombine.high %v1428_v28, %v1432_v30  ;;  %v819_v34 = vsub.s32 3, %v5409_v8  ;;  %v1268_v30 = vld [vmem:[%s6653_s9 + $0xc8] sm:$0xff] }
 0x304   : > { %2839 = vmatprep.subr.bf16.mxu0 %v4414_v35  ;;  %2882 = vmatprep.subr.bf16.mxu1 %v4542_v36  ;;  %v815_v35 = vsub.s32 2, %v5409_v8  ;;  %v803_v36 = vld [vmem:[%s6652_s8] sm:$0xf] }
 0x305   : > { %v812_v39 = vrot.slane %v803_v36, %v5412_v9  ;;  %v820_v40 = vrot.slane %v803_v36, %v819_v34 }
 0x307   : > { %2840 = vmatpush2.bf16.msra.mxu0 %v4413_v41  ;;  %2883 = vmatpush2.bf16.msra.mxu1 %v4541_v42  ;;  %v808_v41 = vrot.slane %v803_v36, %v5415_v10  ;;  %v816_v42 = vrot.slane %v803_v36, %v815_v35 }
 0x308   : > { %2841 = vmatprep.subr.bf16.mxu0 %v4406_v43  ;;  %2884 = vmatprep.subr.bf16.mxu1 %v4534_v44 }
 0x30b   : > { %2842 = vmatpush2.bf16.msra.mxu0 %v4405_v49  ;;  %2885 = vmatpush2.bf16.msra.mxu1 %v4533_v50 }
 0x30c   : > { %2843 = vmatprep.subr.bf16.mxu0 %v4398_v51  ;;  %2886 = vmatprep.subr.bf16.mxu1 %v4526_v52 }
 0x30f   : > { %2844 = vmatpush2.bf16.msra.mxu0 %v4397_v57  ;;  %2887 = vmatpush2.bf16.msra.mxu1 %v4525_v58 }
 0x310   : > { %2845 = vmatprep.subr.bf16.mxu0 %v4390_v59  ;;  %2888 = vmatprep.subr.bf16.mxu1 %v4518_v60 }
 0x313   : > { %2846 = vmatpush2.bf16.msra.mxu0 %v4389_v61  ;;  %2889 = vmatpush2.bf16.msra.mxu1 %v4517_v62 }
 0x314   : > { %2847 = vmatprep.subr.bf16.mxu0 %v4382_v2  ;;  %2890 = vmatprep.subr.bf16.mxu1 %v4510_v6  ;;  %v1296_v2 = vld [vmem:[%s6653_s9 + $0x1a8] sm:$0xff] }
 0x315   : > { %v4351_v18 = vcombine.low %v1292_v63, %v1296_v2 }
 0x317   : > { %2848 = vmatpush2.bf16.msra.mxu0 %v4381_v4  ;;  %2891 = vmatpush2.bf16.msra.mxu1 %v4509_v5  ;;  %v1424_v4 = vld [vmem:[%s6653_s9 + $0x5a8] sm:$0xff] }
 0x318   : > { %2849 = vmatprep.subr.bf16.mxu0 %v4374_v13  ;;  %2892 = vmatprep.subr.bf16.mxu1 %v4502_v17  ;;  %v4352_v13 = vcombine.high %v1292_v63, %v1296_v2  ;;  %v4480_v14 = vcombine.high %v1420_v3, %v1424_v4  ;;  %v1416_v17 = vld [vmem:[%s6653_s9 + $0x568] sm:$0xff]  ;;  %v4479_v19 = vcombine.low %v1420_v3, %v1424_v4 }
 0x319   : > { %v1492_v2 = vld [vmem:[%s6653_s9 + $0x7c8] sm:$0xff] }
 0x31a   : > { %v1496_v3 = vld [vmem:[%s6653_s9 + $0x7e8] sm:$0xff] }
 0x31b   : > { %2850 = vmatpush2.bf16.msra.mxu0 %v4373_v15  ;;  %2893 = vmatpush2.bf16.msra.mxu1 %v4501_v16  ;;  %v1288_v15 = vld [vmem:[%s6653_s9 + $0x168] sm:$0xff] }
 0x31c   : > { %2851 = vmatprep.subr.bf16.mxu0 %v4366_v21  ;;  %2894 = vmatprep.subr.bf16.mxu1 %v4494_v25  ;;  %v1412_v16 = vld [vmem:[%s6653_s9 + $0x548] sm:$0xff]  ;;  %v4344_v20 = vcombine.high %v1284_v12, %v1288_v15  ;;  %v4343_v26 = vcombine.low %v1284_v12, %v1288_v15 }
 0x31d   : > { %v4472_v21 = vcombine.high %v1412_v16, %v1416_v17  ;;  %v1408_v25 = vld [vmem:[%s6653_s9 + $0x528] sm:$0xff]  ;;  %v4471_v27 = vcombine.low %v1412_v16, %v1416_v17 }
 0x31e   : > { %v1356_v15 = vld [vmem:[%s6653_s9 + $0x388] sm:$0xff] }
 0x31f   : > { %2852 = vmatpush2.bf16.msra.mxu0 %v4365_v23  ;;  %2895 = vmatpush2.bf16.msra.mxu1 %v4493_v24  ;;  %v1280_v23 = vld [vmem:[%s6653_s9 + $0x128] sm:$0xff] }
 0x320   : > { %2907 = vmatprep.subr.bf16.mxu0 %v4360_v29  ;;  %2950 = vmatprep.subr.bf16.mxu1 %v4488_v33  ;;  %v1404_v24 = vld [vmem:[%s6653_s9 + $0x508] sm:$0xff]  ;;  %v4336_v28 = vcombine.high %v1276_v22, %v1280_v23  ;;  %v4335_v36 = vcombine.low %v1276_v22, %v1280_v23 }
 0x321   : > { %v4464_v29 = vcombine.high %v1404_v24, %v1408_v25  ;;  %v1400_v33 = vld [vmem:[%s6653_s9 + $0x4e8] sm:$0xff] }
 0x322   : > { %v1360_v16 = vld [vmem:[%s6653_s9 + $0x3a8] sm:$0xff] }
 0x323   : > { %v1484_v17 = vld [vmem:[%s6653_s9 + $0x788] sm:$0xff] }
 0x324   : > { %v1348_v23 = vld [vmem:[%s6653_s9 + $0x348] sm:$0xff] }
 0x3a2   : > { %v1179_v37 = vpop.f32.mrf.mxu0  ;;  %v1222_v38 = vpop.f32.mrf.mxu1 }
 0x3a3   : > { %v1180_v51 = vadd.f32 %v1179_v37, %v808_v41  ;;  %v1223_v52 = vadd.f32 %v1222_v38, %v816_v42  ;;  %v4463_v37 = vcombine.low %v1404_v24, %v1408_v25  ;;  %v1352_v24 = vld [vmem:[%s6653_s9 + $0x368] sm:$0xff] }
 0x3a4   : > { %v1181_v43 = vpop.f32.mrf.mxu0  ;;  %v1224_v44 = vpop.f32.mrf.mxu1  ;;  %v1476_v25 = vld [vmem:[%s6653_s9 + $0x748] sm:$0xff] }
 0x3a5   : > { %v1182_v47 = vadd.f32 %v1181_v43, %v812_v39  ;;  %v1225_v48 = vadd.f32 %v1224_v44, %v820_v40  ;;  %v1231_v0 = vmax.f32 %v1180_v51, 0.0  ;;  %v1233_v1 = vmax.f32 %v1223_v52, 0.0  ;;  %v1392_v43 = vld [vmem:[%s6653_s9 + $0x4a8] sm:$0xff] }
 0x3a6   : > { %v1183_v45 = vpop.f32.mrf.mxu0  ;;  %v1226_v46 = vpop.f32.mrf.mxu1  ;;  %v1384_v51 = vld [vmem:[%s6653_s9 + $0x468] sm:$0xff] }
 0x3a7   : > { %v1184_v49 = vadd.f32 %v1183_v45, %v808_v41  ;;  %v1227_v50 = vadd.f32 %v1226_v46, %v816_v42  ;;  %v1232_v59 = vmax.f32 %v1182_v47, 0.0  ;;  %v1234_v60 = vmax.f32 %v1225_v48, 0.0  ;;  %v1264_v41 = vld [vmem:[%s6653_s9 + $0xa8] sm:$0xff] }
 0x3a8   : > { %v1185_v53 = vpop.f32.mrf.mxu0  ;;  %v1228_v54 = vpop.f32.mrf.mxu1  ;;  %v1388_v42 = vld [vmem:[%s6653_s9 + $0x488] sm:$0xff] }
 0x3a9   : > { %v1186_v55 = vadd.f32 %v1185_v53, %v812_v39  ;;  %v1229_v56 = vadd.f32 %v1228_v54, %v820_v40  ;;  %v1235_v57 = vmax.f32 %v1184_v49, 0.0  ;;  %v1237_v58 = vmax.f32 %v1227_v50, 0.0  ;;  %v1260_v40 = vld [vmem:[%s6653_s9 + $0x88] sm:$0xff] }
 0x3aa   : > { %v4320_v46 = vcombine.high %v1260_v40, %v1264_v41  ;;  %v4448_v47 = vcombine.high %v1388_v42, %v1392_v43  ;;  %v1252_v48 = vld [vmem:[%s6653_s9 + $0x48] sm:$0xff]  ;;  %v4319_v52 = vcombine.low %v1260_v40, %v1264_v41  ;;  %v4447_v53 = vcombine.low %v1388_v42, %v1392_v43 }
 0x3ab   : > { %v1236_v61 = vmax.f32 %v1186_v55, 0.0  ;;  %v1238_v62 = vmax.f32 %v1229_v56, 0.0  ;;  %v5641_v7 = vpack.c.bf16 %v1235_v57, %v1231_v0  ;;  %v5643_v11 = vpack.c.bf16 %v1237_v58, %v1233_v1  ;;  %v1256_v49 = vld [vmem:[%s6653_s9 + $0x68] sm:$0xff] }
 0x3ac   : > { %v1380_v50 = vld [vmem:[%s6653_s9 + $0x448] sm:$0xff]  ;;  %v4312_v54 = vcombine.high %v1252_v48, %v1256_v49 }
 0x3ad   : > { %v5637_v5 = vpack.c.bf16 %v1236_v61, %v1232_v59  ;;  %v5639_v6 = vpack.c.bf16 %v1238_v62, %v1234_v60  ;;  %v4440_v55 = vcombine.high %v1380_v50, %v1384_v51  ;;  %v1244_v56 = vld [vmem:[%s6653_s9 + $0x8] sm:$0xff]  ;;  %v4311_v60 = vcombine.low %v1252_v48, %v1256_v49 }
 0x3ae   : > { %v1248_v57 = vld [vmem:[%s6653_s9 + $0x28] sm:$0xff]  ;;  %v4439_v61 = vcombine.low %v1380_v50, %v1384_v51 }
 0x3af   : > { %2853 = vmatprep.mubr.bf16.mxu0 %v5637_v5  ;;  %2896 = vmatprep.mubr.bf16.mxu1 %v5639_v6  ;;  %v1372_v58 = vld [vmem:[%s6653_s9 + $0x408] sm:$0xff]  ;;  %v4304_v62 = vcombine.high %v1244_v56, %v1248_v57  ;;  %v4303_v4 = vcombine.low %v1244_v56, %v1248_v57 }
 0x3b0   : > { %2854 = vmatmul.mubr.bf16.vlgmr.msra.gmra.mxu0 %v5641_v7  ;;  %2897 = vmatmul.mubr.bf16.vlgmr.msra.gmra.mxu1 %v5643_v11  ;;  %v1376_v59 = vld [vmem:[%s6653_s9 + $0x428] sm:$0xff] }
 0x3b1   : > { %2908 = vmatpush1.bf16.msra.mxu0 %v4359_v31  ;;  %2951 = vmatpush1.bf16.msra.mxu1 %v4487_v32  ;;  %v1272_v31 = vld [vmem:[%s6653_s9 + $0xe8] sm:$0xff]  ;;  %v4432_v63 = vcombine.high %v1372_v58, %v1376_v59  ;;  %v4431_v12 = vcombine.low %v1372_v58, %v1376_v59 }
 0x3b2   : > { %2939 = vmatprep.mubr.bf16.mxu0 %v5637_v5  ;;  %2982 = vmatprep.mubr.bf16.mxu1 %v5639_v6  ;;  %v1396_v32 = vld [vmem:[%s6653_s9 + $0x4c8] sm:$0xff]  ;;  %v4328_v38 = vcombine.high %v1268_v30, %v1272_v31  ;;  %v4327_v44 = vcombine.low %v1268_v30, %v1272_v31 }
 0x3b3   : > { %2909 = vmatprep.subr.bf16.mxu0 %v4352_v13  ;;  %2952 = vmatprep.subr.bf16.mxu1 %v4480_v14  ;;  %v4456_v39 = vcombine.high %v1396_v32, %v1400_v33  ;;  %v4455_v45 = vcombine.low %v1396_v32, %v1400_v33  ;;  %v1364_v0 = vld [vmem:[%s6653_s9 + $0x3c8] sm:$0xff]  ;;  %v4552_v14 = vcombine.high %v1492_v2, %v1496_v3 }
 0x3b4   : > { %v1368_v1 = vld [vmem:[%s6653_s9 + $0x3e8] sm:$0xff] }
 0x3b5   : > { %2910 = vmatpush1.bf16.msra.mxu0 %v4351_v18  ;;  %2953 = vmatpush1.bf16.msra.mxu1 %v4479_v19  ;;  %v4424_v13 = vcombine.high %v1364_v0, %v1368_v1  ;;  %v1488_v18 = vld [vmem:[%s6653_s9 + $0x7a8] sm:$0xff]  ;;  %v4423_v19 = vcombine.low %v1364_v0, %v1368_v1 }
 0x3b6   : > { %2911 = vmatprep.subr.bf16.mxu0 %v4344_v20  ;;  %2954 = vmatprep.subr.bf16.mxu1 %v4472_v21  ;;  %v4551_v20 = vcombine.low %v1492_v2, %v1496_v3  ;;  %v4416_v21 = vcombine.high %v1356_v15, %v1360_v16  ;;  %v4544_v22 = vcombine.high %v1484_v17, %v1488_v18  ;;  %v1340_v31 = vld [vmem:[%s6653_s9 + $0x308] sm:$0xff] }
 0x3b7   : > { %v1344_v32 = vld [vmem:[%s6653_s9 + $0x328] sm:$0xff] }
 0x3b8   : > { %v1468_v33 = vld [vmem:[%s6653_s9 + $0x708] sm:$0xff] }
 0x3b9   : > { %2912 = vmatpush1.bf16.msra.mxu0 %v4343_v26  ;;  %2955 = vmatpush1.bf16.msra.mxu1 %v4471_v27  ;;  %v1480_v26 = vld [vmem:[%s6653_s9 + $0x768] sm:$0xff]  ;;  %v4415_v27 = vcombine.low %v1356_v15, %v1360_v16  ;;  %v1301_v16 = vld [vmem:[%s6653_s9 + $0x1d0] sm:$0xff] }
 0x3ba   : > { %2913 = vmatprep.subr.bf16.mxu0 %v4336_v28  ;;  %2956 = vmatprep.subr.bf16.mxu1 %v4464_v29  ;;  %v4543_v28 = vcombine.low %v1484_v17, %v1488_v18  ;;  %v4408_v29 = vcombine.high %v1348_v23, %v1352_v24  ;;  %v4536_v30 = vcombine.high %v1476_v25, %v1480_v26  ;;  %v1332_v41 = vld [vmem:[%s6653_s9 + $0x2c8] sm:$0xff]  ;;  %v1305_v17 = vld [vmem:[%s6653_s9 + $0x1f0] sm:$0xff] }
 0x3bb   : > { %v1336_v42 = vld [vmem:[%s6653_s9 + $0x2e8] sm:$0xff]  ;;  %v1429_v18 = vld [vmem:[%s6653_s9 + $0x5d0] sm:$0xff] }
 0x3bc   : > { %v1460_v43 = vld [vmem:[%s6653_s9 + $0x6c8] sm:$0xff] }
 0x3bd   : > { %2914 = vmatpush1.bf16.msra.mxu0 %v4335_v36  ;;  %2957 = vmatpush1.bf16.msra.mxu1 %v4463_v37  ;;  %v1472_v36 = vld [vmem:[%s6653_s9 + $0x728] sm:$0xff]  ;;  %v4407_v37 = vcombine.low %v1348_v23, %v1352_v24  ;;  %v1293_v24 = vld [vmem:[%s6653_s9 + $0x190] sm:$0xff] }
 0x3be   : > { %2915 = vmatprep.subr.bf16.mxu0 %v4328_v38  ;;  %2958 = vmatprep.subr.bf16.mxu1 %v4456_v39  ;;  %v4535_v38 = vcombine.low %v1476_v25, %v1480_v26  ;;  %v4400_v39 = vcombine.high %v1340_v31, %v1344_v32  ;;  %v4528_v40 = vcombine.high %v1468_v33, %v1472_v36  ;;  %v1324_v49 = vld [vmem:[%s6653_s9 + $0x288] sm:$0xff]  ;;  %v1297_v25 = vld [vmem:[%s6653_s9 + $0x1b0] sm:$0xff] }
 0x3bf   : > { %v1328_v50 = vld [vmem:[%s6653_s9 + $0x2a8] sm:$0xff]  ;;  %v1421_v26 = vld [vmem:[%s6653_s9 + $0x590] sm:$0xff] }
 0x3c0   : > { %v1452_v51 = vld [vmem:[%s6653_s9 + $0x688] sm:$0xff] }
 0x3c1   : > { %2916 = vmatpush1.bf16.msra.mxu0 %v4327_v44  ;;  %2959 = vmatpush1.bf16.msra.mxu1 %v4455_v45  ;;  %v1464_v44 = vld [vmem:[%s6653_s9 + $0x6e8] sm:$0xff]  ;;  %v4399_v45 = vcombine.low %v1340_v31, %v1344_v32  ;;  %v1285_v32 = vld [vmem:[%s6653_s9 + $0x150] sm:$0xff] }
 0x3c2   : > { %2917 = vmatprep.subr.bf16.mxu0 %v4320_v46  ;;  %2960 = vmatprep.subr.bf16.mxu1 %v4448_v47  ;;  %v4527_v46 = vcombine.low %v1468_v33, %v1472_v36  ;;  %v4392_v47 = vcombine.high %v1332_v41, %v1336_v42  ;;  %v4520_v48 = vcombine.high %v1460_v43, %v1464_v44  ;;  %v1316_v57 = vld [vmem:[%s6653_s9 + $0x248] sm:$0xff]  ;;  %v1289_v33 = vld [vmem:[%s6653_s9 + $0x170] sm:$0xff] }
 0x3c3   : > { %v1320_v58 = vld [vmem:[%s6653_s9 + $0x268] sm:$0xff]  ;;  %v1413_v36 = vld [vmem:[%s6653_s9 + $0x550] sm:$0xff] }
 0x3c4   : > { %v1444_v59 = vld [vmem:[%s6653_s9 + $0x648] sm:$0xff] }
 0x3c5   : > { %2918 = vmatpush1.bf16.msra.mxu0 %v4319_v52  ;;  %2961 = vmatpush1.bf16.msra.mxu1 %v4447_v53  ;;  %v1456_v52 = vld [vmem:[%s6653_s9 + $0x6a8] sm:$0xff]  ;;  %v4391_v53 = vcombine.low %v1332_v41, %v1336_v42  ;;  %v1277_v42 = vld [vmem:[%s6653_s9 + $0x110] sm:$0xff] }
 0x3c6   : > { %2919 = vmatprep.subr.bf16.mxu0 %v4312_v54  ;;  %2962 = vmatprep.subr.bf16.mxu1 %v4440_v55  ;;  %v4519_v54 = vcombine.low %v1460_v43, %v1464_v44  ;;  %v4384_v55 = vcombine.high %v1324_v49, %v1328_v50  ;;  %v4512_v56 = vcombine.high %v1452_v51, %v1456_v52  ;;  %v1308_v1 = vld [vmem:[%s6653_s9 + $0x208] sm:$0xff]  ;;  %v1281_v43 = vld [vmem:[%s6653_s9 + $0x130] sm:$0xff] }
 0x3c7   : > { %v1312_v2 = vld [vmem:[%s6653_s9 + $0x228] sm:$0xff]  ;;  %v1405_v44 = vld [vmem:[%s6653_s9 + $0x510] sm:$0xff] }
 0x3c8   : > { %v1436_v3 = vld [vmem:[%s6653_s9 + $0x608] sm:$0xff] }
 0x3c9   : > { %2920 = vmatpush1.bf16.msra.mxu0 %v4311_v60  ;;  %2963 = vmatpush1.bf16.msra.mxu1 %v4439_v61  ;;  %v1448_v60 = vld [vmem:[%s6653_s9 + $0x668] sm:$0xff]  ;;  %v4383_v61 = vcombine.low %v1324_v49, %v1328_v50  ;;  %v1269_v50 = vld [vmem:[%s6653_s9 + $0xd0] sm:$0xff] }
 0x3ca   : > { %2921 = vmatprep.subr.bf16.mxu0 %v4304_v62  ;;  %2964 = vmatprep.subr.bf16.mxu1 %v4432_v63  ;;  %v4511_v62 = vcombine.low %v1452_v51, %v1456_v52  ;;  %v4376_v63 = vcombine.high %v1316_v57, %v1320_v58  ;;  %v4504_v0 = vcombine.high %v1444_v59, %v1448_v60  ;;  %v1273_v51 = vld [vmem:[%s6653_s9 + $0xf0] sm:$0xff] }
 0x3cb   : > { %v1397_v52 = vld [vmem:[%s6653_s9 + $0x4d0] sm:$0xff] }
 0x3cd   : > { %2922 = vmatpush1.bf16.msra.mxu0 %v4303_v4  ;;  %2965 = vmatpush1.bf16.msra.mxu1 %v4431_v12  ;;  %v1440_v4 = vld [vmem:[%s6653_s9 + $0x628] sm:$0xff]  ;;  %v4375_v12 = vcombine.low %v1316_v57, %v1320_v58  ;;  %v1261_v58 = vld [vmem:[%s6653_s9 + $0x90] sm:$0xff] }
 0x3ce   : > { %2923 = vmatprep.subr.bf16.mxu0 %v4424_v13  ;;  %2966 = vmatprep.subr.bf16.mxu1 %v4552_v14  ;;  %v4503_v13 = vcombine.low %v1444_v59, %v1448_v60  ;;  %v4368_v14 = vcombine.high %v1308_v1, %v1312_v2  ;;  %v4496_v15 = vcombine.high %v1436_v3, %v1440_v4  ;;  %v1265_v59 = vld [vmem:[%s6653_s9 + $0xb0] sm:$0xff] }
 0x3cf   : > { %v1389_v60 = vld [vmem:[%s6653_s9 + $0x490] sm:$0xff] }
 0x3d1   : > { %2924 = vmatpush2.bf16.msra.mxu0 %v4423_v19  ;;  %2967 = vmatpush2.bf16.msra.mxu1 %v4551_v20  ;;  %v1433_v19 = vld [vmem:[%s6653_s9 + $0x5f0] sm:$0xff]  ;;  %v4367_v20 = vcombine.low %v1308_v1, %v1312_v2 }
 0x3d2   : > { %2925 = vmatprep.subr.bf16.mxu0 %v4416_v21  ;;  %2968 = vmatprep.subr.bf16.mxu1 %v4544_v22  ;;  %v4495_v21 = vcombine.low %v1436_v3, %v1440_v4  ;;  %v4362_v22 = vcombine.high %v1301_v16, %v1305_v17  ;;  %v4490_v23 = vcombine.high %v1429_v18, %v1433_v19  ;;  %v1253_v2 = vld [vmem:[%s6653_s9 + $0x50] sm:$0xff] }
 0x3d3   : > { %v1257_v3 = vld [vmem:[%s6653_s9 + $0x70] sm:$0xff] }
 0x3d4   : > { %v1381_v4 = vld [vmem:[%s6653_s9 + $0x450] sm:$0xff] }
 0x3d5   : > { %2926 = vmatpush2.bf16.msra.mxu0 %v4415_v27  ;;  %2969 = vmatpush2.bf16.msra.mxu1 %v4543_v28  ;;  %v1425_v27 = vld [vmem:[%s6653_s9 + $0x5b0] sm:$0xff]  ;;  %v4361_v28 = vcombine.low %v1301_v16, %v1305_v17 }
 0x3d6   : > { %2927 = vmatprep.subr.bf16.mxu0 %v4408_v29  ;;  %2970 = vmatprep.subr.bf16.mxu1 %v4536_v30  ;;  %v4489_v29 = vcombine.low %v1429_v18, %v1433_v19  ;;  %v4354_v30 = vcombine.high %v1293_v24, %v1297_v25  ;;  %v4482_v31 = vcombine.high %v1421_v26, %v1425_v27  ;;  %v1245_v17 = vld [vmem:[%s6653_s9 + $0x10] sm:$0xff] }
 0x3d7   : > { %v1249_v18 = vld [vmem:[%s6653_s9 + $0x30] sm:$0xff] }
 0x3d8   : > { %v1373_v19 = vld [vmem:[%s6653_s9 + $0x410] sm:$0xff] }
 0x3d9   : > { %2928 = vmatpush2.bf16.msra.mxu0 %v4407_v37  ;;  %2971 = vmatpush2.bf16.msra.mxu1 %v4535_v38  ;;  %v1417_v37 = vld [vmem:[%s6653_s9 + $0x570] sm:$0xff]  ;;  %v4353_v38 = vcombine.low %v1293_v24, %v1297_v25 }
 0x3da   : > { %2929 = vmatprep.subr.bf16.mxu0 %v4400_v39  ;;  %2972 = vmatprep.subr.bf16.mxu1 %v4528_v40  ;;  %v4481_v39 = vcombine.low %v1421_v26, %v1425_v27  ;;  %v4346_v40 = vcombine.high %v1285_v32, %v1289_v33  ;;  %v4474_v41 = vcombine.high %v1413_v36, %v1417_v37  ;;  %v1365_v25 = vld [vmem:[%s6653_s9 + $0x3d0] sm:$0xff] }
 0x3db   : > { %v1369_v26 = vld [vmem:[%s6653_s9 + $0x3f0] sm:$0xff] }
 0x3dc   : > { %v1493_v27 = vld [vmem:[%s6653_s9 + $0x7d0] sm:$0xff] }
 0x3dd   : > { %2930 = vmatpush2.bf16.msra.mxu0 %v4399_v45  ;;  %2973 = vmatpush2.bf16.msra.mxu1 %v4527_v46  ;;  %v1409_v45 = vld [vmem:[%s6653_s9 + $0x530] sm:$0xff]  ;;  %v4345_v46 = vcombine.low %v1285_v32, %v1289_v33 }
 0x3de   : > { %2931 = vmatprep.subr.bf16.mxu0 %v4392_v47  ;;  %2974 = vmatprep.subr.bf16.mxu1 %v4520_v48  ;;  %v4473_v47 = vcombine.low %v1413_v36, %v1417_v37  ;;  %v4338_v48 = vcombine.high %v1277_v42, %v1281_v43  ;;  %v4466_v49 = vcombine.high %v1405_v44, %v1409_v45  ;;  %v1357_v33 = vld [vmem:[%s6653_s9 + $0x390] sm:$0xff] }
 0x3df   : > { %v1361_v36 = vld [vmem:[%s6653_s9 + $0x3b0] sm:$0xff] }
 0x3e0   : > { %v1485_v37 = vld [vmem:[%s6653_s9 + $0x790] sm:$0xff] }
 0x3e1   : > { %2932 = vmatpush2.bf16.msra.mxu0 %v4391_v53  ;;  %2975 = vmatpush2.bf16.msra.mxu1 %v4519_v54  ;;  %v1401_v53 = vld [vmem:[%s6653_s9 + $0x4f0] sm:$0xff]  ;;  %v4337_v54 = vcombine.low %v1277_v42, %v1281_v43 }
 0x3e2   : > { %2933 = vmatprep.subr.bf16.mxu0 %v4384_v55  ;;  %2976 = vmatprep.subr.bf16.mxu1 %v4512_v56  ;;  %v4465_v55 = vcombine.low %v1405_v44, %v1409_v45  ;;  %v4330_v56 = vcombine.high %v1269_v50, %v1273_v51  ;;  %v4458_v57 = vcombine.high %v1397_v52, %v1401_v53  ;;  %v1349_v43 = vld [vmem:[%s6653_s9 + $0x350] sm:$0xff] }
 0x3e3   : > { %v1353_v44 = vld [vmem:[%s6653_s9 + $0x370] sm:$0xff] }
 0x3e4   : > { %v1477_v45 = vld [vmem:[%s6653_s9 + $0x750] sm:$0xff] }
 0x3e5   : > { %2934 = vmatpush2.bf16.msra.mxu0 %v4383_v61  ;;  %2977 = vmatpush2.bf16.msra.mxu1 %v4511_v62  ;;  %v1393_v61 = vld [vmem:[%s6653_s9 + $0x4b0] sm:$0xff]  ;;  %v4329_v62 = vcombine.low %v1269_v50, %v1273_v51 }
 0x3e6   : > { %2935 = vmatprep.subr.bf16.mxu0 %v4376_v63  ;;  %2978 = vmatprep.subr.bf16.mxu1 %v4504_v0  ;;  %v4457_v63 = vcombine.low %v1397_v52, %v1401_v53  ;;  %v4322_v0 = vcombine.high %v1261_v58, %v1265_v59  ;;  %v4450_v1 = vcombine.high %v1389_v60, %v1393_v61  ;;  %v1341_v51 = vld [vmem:[%s6653_s9 + $0x310] sm:$0xff] }
 0x3e7   : > { %v1345_v52 = vld [vmem:[%s6653_s9 + $0x330] sm:$0xff] }
 0x3e8   : > { %v1469_v53 = vld [vmem:[%s6653_s9 + $0x710] sm:$0xff] }
 0x3e9   : > { %2936 = vmatpush2.bf16.msra.mxu0 %v4375_v12  ;;  %2979 = vmatpush2.bf16.msra.mxu1 %v4503_v13  ;;  %v1385_v12 = vld [vmem:[%s6653_s9 + $0x470] sm:$0xff]  ;;  %v4321_v13 = vcombine.low %v1261_v58, %v1265_v59 }
 0x3ea   : > { %2937 = vmatprep.subr.bf16.mxu0 %v4368_v14  ;;  %2980 = vmatprep.subr.bf16.mxu1 %v4496_v15  ;;  %v4449_v14 = vcombine.low %v1389_v60, %v1393_v61  ;;  %v4314_v15 = vcombine.high %v1253_v2, %v1257_v3  ;;  %v4442_v16 = vcombine.high %v1381_v4, %v1385_v12  ;;  %v1333_v59 = vld [vmem:[%s6653_s9 + $0x2d0] sm:$0xff] }
 0x3eb   : > { %v1337_v60 = vld [vmem:[%s6653_s9 + $0x2f0] sm:$0xff] }
 0x3ec   : > { %v1461_v61 = vld [vmem:[%s6653_s9 + $0x6d0] sm:$0xff] }
 0x3ed   : > { %2938 = vmatpush2.bf16.msra.mxu0 %v4367_v20  ;;  %2981 = vmatpush2.bf16.msra.mxu1 %v4495_v21  ;;  %v1377_v20 = vld [vmem:[%s6653_s9 + $0x430] sm:$0xff]  ;;  %v4313_v21 = vcombine.low %v1253_v2, %v1257_v3 }
 0x3ee   : > { %2993 = vmatprep.subr.bf16.mxu0 %v4362_v22  ;;  %3036 = vmatprep.subr.bf16.mxu1 %v4490_v23  ;;  %v4441_v22 = vcombine.low %v1381_v4, %v1385_v12  ;;  %v4306_v23 = vcombine.high %v1245_v17, %v1249_v18  ;;  %v4434_v24 = vcombine.high %v1373_v19, %v1377_v20  ;;  %v1325_v3 = vld [vmem:[%s6653_s9 + $0x290] sm:$0xff] }
 0x3ef   : > { %v1329_v4 = vld [vmem:[%s6653_s9 + $0x2b0] sm:$0xff] }
 0x3f0   : > { %2940 = vmatmul.mubr.bf16.vlgmr.msra.gmra.mxu0 %v5641_v7  ;;  %2983 = vmatmul.mubr.bf16.vlgmr.msra.gmra.mxu1 %v5643_v11  ;;  %v1453_v12 = vld [vmem:[%s6653_s9 + $0x690] sm:$0xff] }
 0x3f1   : > { %2994 = vmatpush1.bf16.msra.mxu0 %v4361_v28  ;;  %3025 = vmatprep.mubr.bf16.mxu0 %v5637_v5  ;;  %v1497_v28 = vld [vmem:[%s6653_s9 + $0x7f0] sm:$0xff] }
 0x3f2   : > { %3037 = vmatpush1.bf16.msra.mxu1 %v4489_v29  ;;  %3068 = vmatprep.mubr.bf16.mxu1 %v5639_v6  ;;  %v4305_v29 = vcombine.low %v1245_v17, %v1249_v18  ;;  %v4554_v32 = vcombine.high %v1493_v27, %v1497_v28  ;;  %v1317_v18 = vld [vmem:[%s6653_s9 + $0x250] sm:$0xff] }
 0x3f3   : > { %2995 = vmatprep.subr.bf16.mxu0 %v4354_v30  ;;  %3038 = vmatprep.subr.bf16.mxu1 %v4482_v31  ;;  %v4433_v30 = vcombine.low %v1373_v19, %v1377_v20  ;;  %v4426_v31 = vcombine.high %v1365_v25, %v1369_v26  ;;  %v1321_v19 = vld [vmem:[%s6653_s9 + $0x270] sm:$0xff] }
 0x3f4   : > { %v1445_v20 = vld [vmem:[%s6653_s9 + $0x650] sm:$0xff] }
 0x3f5   : > { %2996 = vmatpush1.bf16.msra.mxu0 %v4353_v38  ;;  %v1489_v38 = vld [vmem:[%s6653_s9 + $0x7b0] sm:$0xff] }
 0x3f6   : > { %3039 = vmatpush1.bf16.msra.mxu1 %v4481_v39  ;;  %2997 = vmatprep.subr.bf16.mxu0 %v4346_v40  ;;  %v4425_v39 = vcombine.low %v1365_v25, %v1369_v26  ;;  %v4553_v40 = vcombine.low %v1493_v27, %v1497_v28  ;;  %v4546_v42 = vcombine.high %v1485_v37, %v1489_v38  ;;  %v1309_v26 = vld [vmem:[%s6653_s9 + $0x210] sm:$0xff] }
 0x3f7   : > { %3040 = vmatprep.subr.bf16.mxu1 %v4474_v41  ;;  %v4418_v41 = vcombine.high %v1357_v33, %v1361_v36  ;;  %v1313_v27 = vld [vmem:[%s6653_s9 + $0x230] sm:$0xff] }
 0x3f8   : > { %v1437_v28 = vld [vmem:[%s6653_s9 + $0x610] sm:$0xff] }
 0x3f9   : > { %2998 = vmatpush1.bf16.msra.mxu0 %v4345_v46  ;;  %v1481_v46 = vld [vmem:[%s6653_s9 + $0x770] sm:$0xff] }
 0x3fa   : > { %3041 = vmatpush1.bf16.msra.mxu1 %v4473_v47  ;;  %2999 = vmatprep.subr.bf16.mxu0 %v4338_v48  ;;  %v4417_v47 = vcombine.low %v1357_v33, %v1361_v36  ;;  %v4545_v48 = vcombine.low %v1485_v37, %v1489_v38  ;;  %v4538_v50 = vcombine.high %v1477_v45, %v1481_v46  ;;  %v1302_v36 = vld [vmem:[%s6653_s9 + $0x1d8] sm:$0xff] }
 0x3fb   : > { %3042 = vmatprep.subr.bf16.mxu1 %v4466_v49  ;;  %v4410_v49 = vcombine.high %v1349_v43, %v1353_v44  ;;  %v1306_v37 = vld [vmem:[%s6653_s9 + $0x1f8] sm:$0xff] }
 0x3fc   : > { %v1430_v38 = vld [vmem:[%s6653_s9 + $0x5d8] sm:$0xff] }
 0x3fd   : > { %3000 = vmatpush1.bf16.msra.mxu0 %v4337_v54  ;;  %v1473_v54 = vld [vmem:[%s6653_s9 + $0x730] sm:$0xff] }
 0x3fe   : > { %3043 = vmatpush1.bf16.msra.mxu1 %v4465_v55  ;;  %3001 = vmatprep.subr.bf16.mxu0 %v4330_v56  ;;  %v4409_v55 = vcombine.low %v1349_v43, %v1353_v44  ;;  %v4537_v56 = vcombine.low %v1477_v45, %v1481_v46  ;;  %v4530_v58 = vcombine.high %v1469_v53, %v1473_v54  ;;  %v1294_v44 = vld [vmem:[%s6653_s9 + $0x198] sm:$0xff] }
 0x3ff   : > { %3044 = vmatprep.subr.bf16.mxu1 %v4458_v57  ;;  %v4402_v57 = vcombine.high %v1341_v51, %v1345_v52  ;;  %v1298_v45 = vld [vmem:[%s6653_s9 + $0x1b8] sm:$0xff]  ;;  %v4363_v46 = vcombine.low %v1302_v36, %v1306_v37 }
 0x401   : > { %3002 = vmatpush1.bf16.msra.mxu0 %v4329_v62  ;;  %v1465_v62 = vld [vmem:[%s6653_s9 + $0x6f0] sm:$0xff] }
 0x402   : > { %3045 = vmatpush1.bf16.msra.mxu1 %v4457_v63  ;;  %3003 = vmatprep.subr.bf16.mxu0 %v4322_v0  ;;  %v4401_v63 = vcombine.low %v1341_v51, %v1345_v52  ;;  %v4529_v0 = vcombine.low %v1469_v53, %v1473_v54  ;;  %v4522_v2 = vcombine.high %v1461_v61, %v1465_v62  ;;  %v1286_v51 = vld [vmem:[%s6653_s9 + $0x158] sm:$0xff] }
 0x403   : > { %3046 = vmatprep.subr.bf16.mxu1 %v4450_v1  ;;  %v4394_v1 = vcombine.high %v1333_v59, %v1337_v60  ;;  %v1290_v52 = vld [vmem:[%s6653_s9 + $0x178] sm:$0xff] }
 0x404   : > { %v1414_v54 = vld [vmem:[%s6653_s9 + $0x558] sm:$0xff] }
 0x405   : > { %3004 = vmatpush1.bf16.msra.mxu0 %v4321_v13  ;;  %v1457_v13 = vld [vmem:[%s6653_s9 + $0x6b0] sm:$0xff] }
 0x406   : > { %3047 = vmatpush1.bf16.msra.mxu1 %v4449_v14  ;;  %3005 = vmatprep.subr.bf16.mxu0 %v4314_v15  ;;  %v4393_v14 = vcombine.low %v1333_v59, %v1337_v60  ;;  %v4521_v15 = vcombine.low %v1461_v61, %v1465_v62  ;;  %v4514_v17 = vcombine.high %v1453_v12, %v1457_v13  ;;  %v1278_v60 = vld [vmem:[%s6653_s9 + $0x118] sm:$0xff] }
 0x407   : > { %3048 = vmatprep.subr.bf16.mxu1 %v4442_v16  ;;  %v4386_v16 = vcombine.high %v1325_v3, %v1329_v4  ;;  %v1282_v61 = vld [vmem:[%s6653_s9 + $0x138] sm:$0xff] }
 0x408   : > { %v1410_v62 = vld [vmem:[%s6653_s9 + $0x538] sm:$0xff] }
 0x409   : > { %3006 = vmatpush1.bf16.msra.mxu0 %v4313_v21  ;;  %v1449_v21 = vld [vmem:[%s6653_s9 + $0x670] sm:$0xff] }
 0x40a   : > { %3049 = vmatpush1.bf16.msra.mxu1 %v4441_v22  ;;  %3007 = vmatprep.subr.bf16.mxu0 %v4306_v23  ;;  %v4385_v22 = vcombine.low %v1325_v3, %v1329_v4  ;;  %v4513_v23 = vcombine.low %v1453_v12, %v1457_v13  ;;  %v4506_v25 = vcombine.high %v1445_v20, %v1449_v21  ;;  %v1274_v3 = vld [vmem:[%s6653_s9 + $0xf8] sm:$0xff] }
 0x40b   : > { %3050 = vmatprep.subr.bf16.mxu1 %v4434_v24  ;;  %v4378_v24 = vcombine.high %v1317_v18, %v1321_v19  ;;  %v1398_v4 = vld [vmem:[%s6653_s9 + $0x4d8] sm:$0xff]  ;;  %v4339_v13 = vcombine.low %v1278_v60, %v1282_v61 }
 0x40c   : > { %v1402_v12 = vld [vmem:[%s6653_s9 + $0x4f8] sm:$0xff] }
 0x40d   : > { %3008 = vmatpush1.bf16.msra.mxu0 %v4305_v29  ;;  %v1441_v29 = vld [vmem:[%s6653_s9 + $0x630] sm:$0xff] }
 0x40e   : > { %3051 = vmatpush1.bf16.msra.mxu1 %v4433_v30  ;;  %3009 = vmatprep.subr.bf16.mxu0 %v4426_v31  ;;  %v4377_v30 = vcombine.low %v1317_v18, %v1321_v19  ;;  %v4505_v31 = vcombine.low %v1445_v20, %v1449_v21  ;;  %v4498_v33 = vcombine.high %v1437_v28, %v1441_v29  ;;  %v1266_v18 = vld [vmem:[%s6653_s9 + $0xb8] sm:$0xff] }
 0x40f   : > { %3052 = vmatprep.subr.bf16.mxu1 %v4554_v32  ;;  %v4370_v32 = vcombine.high %v1309_v26, %v1313_v27  ;;  %v1390_v19 = vld [vmem:[%s6653_s9 + $0x498] sm:$0xff] }
 0x410   : > { %v1394_v20 = vld [vmem:[%s6653_s9 + $0x4b8] sm:$0xff] }
 0x411   : > { %3010 = vmatpush2.bf16.msra.mxu0 %v4425_v39  ;;  %v1434_v39 = vld [vmem:[%s6653_s9 + $0x5f8] sm:$0xff] }
 0x412   : > { %3053 = vmatpush2.bf16.msra.mxu1 %v4553_v40  ;;  %3011 = vmatprep.subr.bf16.mxu0 %v4418_v41  ;;  %v4369_v40 = vcombine.low %v1309_v26, %v1313_v27  ;;  %v4497_v41 = vcombine.low %v1437_v28, %v1441_v29  ;;  %v4492_v43 = vcombine.high %v1430_v38, %v1434_v39  ;;  %v1258_v26 = vld [vmem:[%s6653_s9 + $0x78] sm:$0xff] }
 0x413   : > { %3054 = vmatprep.subr.bf16.mxu1 %v4546_v42  ;;  %v4364_v42 = vcombine.high %v1302_v36, %v1306_v37  ;;  %v1382_v27 = vld [vmem:[%s6653_s9 + $0x458] sm:$0xff] }
 0x414   : > { %v1386_v28 = vld [vmem:[%s6653_s9 + $0x478] sm:$0xff] }
 0x415   : > { %3012 = vmatpush2.bf16.msra.mxu0 %v4417_v47  ;;  %v1422_v47 = vld [vmem:[%s6653_s9 + $0x598] sm:$0xff] }
 0x416   : > { %3055 = vmatpush2.bf16.msra.mxu1 %v4545_v48  ;;  %3013 = vmatprep.subr.bf16.mxu0 %v4410_v49  ;;  %v1426_v48 = vld [vmem:[%s6653_s9 + $0x5b8] sm:$0xff]  ;;  %v4491_v49 = vcombine.low %v1430_v38, %v1434_v39 }
 0x417   : > { %3056 = vmatprep.subr.bf16.mxu1 %v4538_v50  ;;  %v4356_v50 = vcombine.high %v1294_v44, %v1298_v45  ;;  %v4484_v53 = vcombine.high %v1422_v47, %v1426_v48  ;;  %v1250_v36 = vld [vmem:[%s6653_s9 + $0x38] sm:$0xff] }
 0x418   : > { %v1374_v37 = vld [vmem:[%s6653_s9 + $0x418] sm:$0xff] }
 0x419   : > { %3014 = vmatpush2.bf16.msra.mxu0 %v4409_v55  ;;  %v1418_v55 = vld [vmem:[%s6653_s9 + $0x578] sm:$0xff] }
 0x41a   : > { %3057 = vmatpush2.bf16.msra.mxu1 %v4537_v56  ;;  %3015 = vmatprep.subr.bf16.mxu0 %v4402_v57  ;;  %v4355_v56 = vcombine.low %v1294_v44, %v1298_v45  ;;  %v4483_v57 = vcombine.low %v1422_v47, %v1426_v48  ;;  %v4476_v59 = vcombine.high %v1414_v54, %v1418_v55  ;;  %v1378_v38 = vld [vmem:[%s6653_s9 + $0x438] sm:$0xff] }
 0x41b   : > { %3058 = vmatprep.subr.bf16.mxu1 %v4530_v58  ;;  %v4348_v58 = vcombine.high %v1286_v51, %v1290_v52  ;;  %v1370_v44 = vld [vmem:[%s6653_s9 + $0x3f8] sm:$0xff]  ;;  %v4435_v48 = vcombine.low %v1374_v37, %v1378_v38 }
 0x41c   : > { %v1494_v45 = vld [vmem:[%s6653_s9 + $0x7d8] sm:$0xff] }
 0x41d   : > { %3016 = vmatpush2.bf16.msra.mxu0 %v4401_v63  ;;  %v4475_v63 = vcombine.low %v1414_v54, %v1418_v55  ;;  %v1490_v54 = vld [vmem:[%s6653_s9 + $0x7b8] sm:$0xff] }
 0x41e   : > { %3059 = vmatpush2.bf16.msra.mxu1 %v4529_v0  ;;  %3017 = vmatprep.subr.bf16.mxu0 %v4394_v1  ;;  %v4340_v0 = vcombine.high %v1278_v60, %v1282_v61  ;;  %v1354_v60 = vld [vmem:[%s6653_s9 + $0x378] sm:$0xff] }
 0x41f   : > { %3060 = vmatprep.subr.bf16.mxu1 %v4522_v2  ;;  %v1270_v2 = vld [vmem:[%s6653_s9 + $0xd8] sm:$0xff] }
 0x420   : > { %v4331_v21 = vcombine.low %v1270_v2, %v1274_v3  ;;  %v1478_v61 = vld [vmem:[%s6653_s9 + $0x758] sm:$0xff] }
 0x421   : > { %3018 = vmatpush2.bf16.msra.mxu0 %v4393_v14 }
 0x422   : > { %3061 = vmatpush2.bf16.msra.mxu1 %v4521_v15  ;;  %3019 = vmatprep.subr.bf16.mxu0 %v4386_v16  ;;  %v4332_v15 = vcombine.high %v1270_v2, %v1274_v3  ;;  %v4460_v16 = vcombine.high %v1398_v4, %v1402_v12  ;;  %v1346_v2 = vld [vmem:[%s6653_s9 + $0x338] sm:$0xff] }
 0x423   : > { %3062 = vmatprep.subr.bf16.mxu1 %v4514_v17  ;;  %v1262_v17 = vld [vmem:[%s6653_s9 + $0x98] sm:$0xff] }
 0x424   : > { %v4323_v29 = vcombine.low %v1262_v17, %v1266_v18  ;;  %v1470_v3 = vld [vmem:[%s6653_s9 + $0x718] sm:$0xff] }
 0x425   : > { %3020 = vmatpush2.bf16.msra.mxu0 %v4385_v22  ;;  %v4459_v22 = vcombine.low %v1398_v4, %v1402_v12  ;;  %v1474_v4 = vld [vmem:[%s6653_s9 + $0x738] sm:$0xff] }
 0x426   : > { %3063 = vmatpush2.bf16.msra.mxu1 %v4513_v23  ;;  %3021 = vmatprep.subr.bf16.mxu0 %v4378_v24  ;;  %v4324_v23 = vcombine.high %v1262_v17, %v1266_v18  ;;  %v4452_v24 = vcombine.high %v1390_v19, %v1394_v20  ;;  %v1338_v17 = vld [vmem:[%s6653_s9 + $0x2f8] sm:$0xff] }
 0x427   : > { %3064 = vmatprep.subr.bf16.mxu1 %v4506_v25  ;;  %v1254_v25 = vld [vmem:[%s6653_s9 + $0x58] sm:$0xff] }
 0x428   : > { %v4315_v39 = vcombine.low %v1254_v25, %v1258_v26  ;;  %v1462_v18 = vld [vmem:[%s6653_s9 + $0x6d8] sm:$0xff] }
 0x429   : > { %3022 = vmatpush2.bf16.msra.mxu0 %v4377_v30  ;;  %v4451_v30 = vcombine.low %v1390_v19, %v1394_v20  ;;  %v1466_v19 = vld [vmem:[%s6653_s9 + $0x6f8] sm:$0xff] }
 0x42a   : > { %3065 = vmatpush2.bf16.msra.mxu1 %v4505_v31  ;;  %3023 = vmatprep.subr.bf16.mxu0 %v4370_v32  ;;  %v4316_v31 = vcombine.high %v1254_v25, %v1258_v26  ;;  %v4444_v32 = vcombine.high %v1382_v27, %v1386_v28  ;;  %v1330_v25 = vld [vmem:[%s6653_s9 + $0x2b8] sm:$0xff] }
 0x42b   : > { %3066 = vmatprep.subr.bf16.mxu1 %v4498_v33  ;;  %v1246_v33 = vld [vmem:[%s6653_s9 + $0x18] sm:$0xff] }
 0x42c   : > { %v4307_v47 = vcombine.low %v1246_v33, %v1250_v36  ;;  %v1454_v26 = vld [vmem:[%s6653_s9 + $0x698] sm:$0xff] }
 0x42d   : > { %3024 = vmatpush2.bf16.msra.mxu0 %v4369_v40  ;;  %v4443_v40 = vcombine.low %v1382_v27, %v1386_v28  ;;  %v1458_v27 = vld [vmem:[%s6653_s9 + $0x6b8] sm:$0xff] }
 0x42e   : > { %3067 = vmatpush2.bf16.msra.mxu1 %v4497_v41  ;;  %3079 = vmatprep.subr.bf16.mxu0 %v4364_v42  ;;  %v4308_v41 = vcombine.high %v1246_v33, %v1250_v36  ;;  %v4436_v42 = vcombine.high %v1374_v37, %v1378_v38  ;;  %v1322_v33 = vld [vmem:[%s6653_s9 + $0x278] sm:$0xff] }
 0x42f   : > { %3122 = vmatprep.subr.bf16.mxu1 %v4492_v43  ;;  %v1366_v43 = vld [vmem:[%s6653_s9 + $0x3d8] sm:$0xff] }
 0x430   : > { %3026 = vmatmul.mubr.bf16.vlgmr.msra.gmra.mxu0 %v5641_v7  ;;  %v4427_v55 = vcombine.low %v1366_v43, %v1370_v44  ;;  %v1446_v36 = vld [vmem:[%s6653_s9 + $0x658] sm:$0xff] }
 0x431   : > { %3069 = vmatmul.mubr.bf16.vlgmr.msra.gmra.mxu1 %v5643_v11  ;;  %3080 = vmatpush1.bf16.msra.mxu0 %v4363_v46  ;;  %v1498_v46 = vld [vmem:[%s6653_s9 + $0x7f8] sm:$0xff] }
 0x432   : > { %3111 = vmatprep.mubr.bf16.mxu0 %v5637_v5  ;;  %3123 = vmatpush1.bf16.msra.mxu1 %v4491_v49  ;;  %v1406_v5 = vld [vmem:[%s6653_s9 + $0x518] sm:$0xff]  ;;  %v4428_v49 = vcombine.high %v1366_v43, %v1370_v44 }
 0x433   : > { %3154 = vmatprep.mubr.bf16.mxu1 %v5639_v6  ;;  %3081 = vmatprep.subr.bf16.mxu0 %v4356_v50  ;;  %v4347_v6 = vcombine.low %v1286_v51, %v1290_v52  ;;  %v4468_v1 = vcombine.high %v1406_v5, %v1410_v62  ;;  %v4467_v14 = vcombine.low %v1406_v5, %v1410_v62  ;;  %v1358_v51 = vld [vmem:[%s6653_s9 + $0x398] sm:$0xff] }
 0x434   : > { %3124 = vmatprep.subr.bf16.mxu1 %v4484_v53  ;;  %v4556_v50 = vcombine.high %v1494_v45, %v1498_v46  ;;  %v1362_v52 = vld [vmem:[%s6653_s9 + $0x3b8] sm:$0xff] }
 0x435   : > { %3082 = vmatpush1.bf16.msra.mxu0 %v4355_v56  ;;  %v1486_v53 = vld [vmem:[%s6653_s9 + $0x798] sm:$0xff]  ;;  %v4555_v56 = vcombine.low %v1494_v45, %v1498_v46  ;;  %v4419_v62 = vcombine.low %v1358_v51, %v1362_v52 }
 0x436   : > { %3125 = vmatpush1.bf16.msra.mxu1 %v4483_v57  ;;  %3083 = vmatprep.subr.bf16.mxu0 %v4348_v58  ;;  %v4420_v57 = vcombine.high %v1358_v51, %v1362_v52  ;;  %v4548_v58 = vcombine.high %v1486_v53, %v1490_v54  ;;  %v1482_v5 = vld [vmem:[%s6653_s9 + $0x778] sm:$0xff] }
 0x437   : > { %3126 = vmatprep.subr.bf16.mxu1 %v4476_v59  ;;  %v1350_v59 = vld [vmem:[%s6653_s9 + $0x358] sm:$0xff] }
 0x438   : > { %v4411_v12 = vcombine.low %v1350_v59, %v1354_v60  ;;  %v1450_v37 = vld [vmem:[%s6653_s9 + $0x678] sm:$0xff] }
 0x439   : > { %3084 = vmatpush1.bf16.msra.mxu0 %v4347_v6  ;;  %v4547_v6 = vcombine.low %v1486_v53, %v1490_v54  ;;  %v1314_v43 = vld [vmem:[%s6653_s9 + $0x238] sm:$0xff] }
 0x43a   : > { %3127 = vmatpush1.bf16.msra.mxu1 %v4475_v63  ;;  %3085 = vmatprep.subr.bf16.mxu0 %v4340_v0  ;;  %v4412_v63 = vcombine.high %v1350_v59, %v1354_v60  ;;  %v4540_v0 = vcombine.high %v1478_v61, %v1482_v5  ;;  %v1438_v44 = vld [vmem:[%s6653_s9 + $0x618] sm:$0xff]  ;;  %v4863_v59 = vld [vmem:[%s6655_s11 + $0x164] ss:$8 sps:$4 sm:$0xff]  }
 0x43b   : > { %3128 = vmatprep.subr.bf16.mxu1 %v4468_v1  ;;  %v1342_v1 = vld [vmem:[%s6653_s9 + $0x318] sm:$0xff] }
 0x43c   : > { %v4403_v20 = vcombine.low %v1342_v1, %v1346_v2  ;;  %v1442_v45 = vld [vmem:[%s6653_s9 + $0x638] sm:$0xff] }
 0x43d   : > { %3086 = vmatpush1.bf16.msra.mxu0 %v4339_v13  ;;  %v4539_v13 = vcombine.low %v1478_v61, %v1482_v5  ;;  %v4499_v51 = vcombine.low %v1438_v44, %v1442_v45  ;;  %v4842_v52 = vld [vmem:[%s6655_s11 + $0x74] ss:$8 sps:$4 sm:$0xff]   ;;  %v4840_v54 = vld [vmem:[%s6655_s11 + $0x70] ss:$8 sps:$4 sm:$0xff]   ;;  %v4843_v5 = vld [vmem:[%s6655_s11 + $0x60] ss:$8 sps:$4 sm:$0xff]  }
 0x43e   : > { %3129 = vmatpush1.bf16.msra.mxu1 %v4467_v14  ;;  %3087 = vmatprep.subr.bf16.mxu0 %v4332_v15  ;;  %v4404_v14 = vcombine.high %v1342_v1, %v1346_v2  ;;  %v4532_v15 = vcombine.high %v1470_v3, %v1474_v4  ;;  %v4857_v53 = vld [vmem:[%s6655_s11 + $0x174] ss:$8 sps:$4 sm:$0xff]  }
 0x43f   : > { %3130 = vmatprep.subr.bf16.mxu1 %v4460_v16  ;;  %v1334_v16 = vld [vmem:[%s6653_s9 + $0x2d8] sm:$0xff] }
 0x440   : > { %v4395_v28 = vcombine.low %v1334_v16, %v1338_v17 }
 0x441   : > { %3088 = vmatpush1.bf16.msra.mxu0 %v4331_v21  ;;  %v4531_v21 = vcombine.low %v1470_v3, %v1474_v4  ;;  %v4846_v3 = vld [vmem:[%s6655_s11 + $0x50] ss:$8 sps:$4 sm:$0xff]  }
 0x442   : > { %3131 = vmatpush1.bf16.msra.mxu1 %v4459_v22  ;;  %3089 = vmatprep.subr.bf16.mxu0 %v4324_v23  ;;  %v4396_v22 = vcombine.high %v1334_v16, %v1338_v17  ;;  %v4524_v23 = vcombine.high %v1462_v18, %v1466_v19  ;;  %v4875_v16 = vld [vmem:[%s6655_s11 + $0x144] ss:$8 sps:$4 sm:$0xff]  }
 0x443   : > { %3132 = vmatprep.subr.bf16.mxu1 %v4452_v24  ;;  %v1326_v24 = vld [vmem:[%s6653_s9 + $0x298] sm:$0xff] }
 0x444   : > { %v4387_v38 = vcombine.low %v1326_v24, %v1330_v25 }
 0x445   : > { %3090 = vmatpush1.bf16.msra.mxu0 %v4323_v29  ;;  %v4523_v29 = vcombine.low %v1462_v18, %v1466_v19  ;;  %v4849_v19 = vld [vmem:[%s6655_s11 + $0x40] ss:$8 sps:$4 sm:$0xff]  }
 0x446   : > { %3133 = vmatpush1.bf16.msra.mxu1 %v4451_v30  ;;  %3091 = vmatprep.subr.bf16.mxu0 %v4316_v31  ;;  %v4388_v30 = vcombine.high %v1326_v24, %v1330_v25  ;;  %v4516_v31 = vcombine.high %v1454_v26, %v1458_v27  ;;  %v4881_v24 = vld [vmem:[%s6655_s11 + $0x134] ss:$8 sps:$4 sm:$0xff]  }
 0x447   : > { %3134 = vmatprep.subr.bf16.mxu1 %v4444_v32  ;;  %v1318_v32 = vld [vmem:[%s6653_s9 + $0x258] sm:$0xff] }
 0x448   : > { %v4379_v46 = vcombine.low %v1318_v32, %v1322_v33 }
 0x449   : > { %3092 = vmatpush1.bf16.msra.mxu0 %v4315_v39  ;;  %v4515_v39 = vcombine.low %v1454_v26, %v1458_v27  ;;  %v4852_v26 = vld [vmem:[%s6655_s11 + $0x30] ss:$8 sps:$4 sm:$0xff]   ;;  %v4860_v27 = vld [vmem:[%s6655_s11 + $0x24] ss:$8 sps:$4 sm:$0xff]  }
 0x44a   : > { %3135 = vmatpush1.bf16.msra.mxu1 %v4443_v40  ;;  %3093 = vmatprep.subr.bf16.mxu0 %v4308_v41  ;;  %v4380_v40 = vcombine.high %v1318_v32, %v1322_v33  ;;  %v4508_v41 = vcombine.high %v1446_v36, %v1450_v37  ;;  %v4885_v32 = vld [vmem:[%s6655_s11 + $0x120] ss:$8 sps:$4 sm:$0xff]   ;;  %v4893_v33 = vld [vmem:[%s6655_s11 + $0x114] ss:$8 sps:$4 sm:$0xff]  }
 0x44b   : > { %3136 = vmatprep.subr.bf16.mxu1 %v4436_v42  ;;  %v1310_v42 = vld [vmem:[%s6653_s9 + $0x218] sm:$0xff] }
 0x44d   : > { %3094 = vmatpush1.bf16.msra.mxu0 %v4307_v47  ;;  %v4507_v47 = vcombine.low %v1446_v36, %v1450_v37  ;;  %v4864_v36 = vld [vmem:[%s6655_s11 + $0x10] ss:$8 sps:$4 sm:$0xff]   ;;  %v4872_v37 = vld [vmem:[%s6655_s11 + $0x4] ss:$8 sps:$4 sm:$0xff]  }
 0x44e   : > { %3137 = vmatpush1.bf16.msra.mxu1 %v4435_v48  ;;  %3095 = vmatprep.subr.bf16.mxu0 %v4428_v49  ;;  %v4372_v48 = vcombine.high %v1310_v42, %v1314_v43  ;;  %v4500_v49 = vcombine.high %v1438_v44, %v1442_v45  ;;  %v4876_v44 = vld [vmem:[%s6655_s11 + $0xf0] ss:$8 sps:$4 sm:$0xff]   ;;  %v4884_v45 = vld [vmem:[%s6655_s11 + $0xe4] ss:$8 sps:$4 sm:$0xff]  }
 0x44f   : > { %3138 = vmatprep.subr.bf16.mxu1 %v4556_v50  ;;  %v4371_v50 = vcombine.low %v1310_v42, %v1314_v43  ;;  %v4897_v42 = vld [vmem:[%s6655_s11 + $0x100] ss:$8 sps:$4 sm:$0xff]   ;;  %v4905_v43 = vld [vmem:[%s6655_s11 + $0x1f4] ss:$8 sps:$4 sm:$0xff]  }
 0x451   : > { %3096 = vmatpush2.bf16.msra.mxu0 %v4427_v55  ;;  %v6223_v55 = vld [vmem:[%s6654_s10] sm:$0xff] }
 0x452   : > { %3139 = vmatpush2.bf16.msra.mxu1 %v4555_v56  ;;  %3097 = vmatprep.subr.bf16.mxu0 %v4420_v57  ;;  %v4845_v56 = vld [vmem:[%s6655_s11 + $0x64] ss:$8 sps:$4 sm:$0xff]   ;;  %v4855_v57 = vld [vmem:[%s6655_s11 + $0x170] ss:$8 sps:$4 sm:$0xff]  }
 0x453   : > { %3140 = vmatprep.subr.bf16.mxu1 %v4548_v58  ;;  %v1508_v58 = vrot.slane %v6223_v55, %v5412_v9 }
 0x455   : > { %3098 = vmatpush2.bf16.msra.mxu0 %v4419_v62 }
 0x456   : > { %3141 = vmatpush2.bf16.msra.mxu1 %v4547_v6  ;;  %3099 = vmatprep.subr.bf16.mxu0 %v4412_v63  ;;  %v4848_v63 = vld [vmem:[%s6655_s11 + $0x54] ss:$8 sps:$4 sm:$0xff]  }
 0x457   : > { %3142 = vmatprep.subr.bf16.mxu1 %v4540_v0 }
 0x459   : > { %3100 = vmatpush2.bf16.msra.mxu0 %v4411_v12  ;;  %v4851_v12 = vld [vmem:[%s6655_s11 + $0x44] ss:$8 sps:$4 sm:$0xff]  }
 0x45a   : > { %3143 = vmatpush2.bf16.msra.mxu1 %v4539_v13  ;;  %3101 = vmatprep.subr.bf16.mxu0 %v4404_v14  ;;  %v4867_v13 = vld [vmem:[%s6655_s11 + $0x150] ss:$8 sps:$4 sm:$0xff]  }
 0x45b   : > { %3144 = vmatprep.subr.bf16.mxu1 %v4532_v15 }
 0x45d   : > { %3102 = vmatpush2.bf16.msra.mxu0 %v4403_v20  ;;  %v4854_v20 = vld [vmem:[%s6655_s11 + $0x34] ss:$8 sps:$4 sm:$0xff]  }
 0x45e   : > { %3145 = vmatpush2.bf16.msra.mxu1 %v4531_v21  ;;  %3103 = vmatprep.subr.bf16.mxu0 %v4396_v22  ;;  %v4873_v21 = vld [vmem:[%s6655_s11 + $0x140] ss:$8 sps:$4 sm:$0xff]  }
 0x45f   : > { %3146 = vmatprep.subr.bf16.mxu1 %v4524_v23 }
 0x461   : > { %3104 = vmatpush2.bf16.msra.mxu0 %v4395_v28  ;;  %v4879_v28 = vld [vmem:[%s6655_s11 + $0x130] ss:$8 sps:$4 sm:$0xff]  }
 0x462   : > { %3147 = vmatpush2.bf16.msra.mxu1 %v4523_v29  ;;  %3105 = vmatprep.subr.bf16.mxu0 %v4388_v30  ;;  %v4887_v29 = vld [vmem:[%s6655_s11 + $0x124] ss:$8 sps:$4 sm:$0xff]   ;;  %v4858_v30 = vld [vmem:[%s6655_s11 + $0x20] ss:$8 sps:$4 sm:$0xff]  }
 0x463   : > { %3148 = vmatprep.subr.bf16.mxu1 %v4516_v31  ;;  %v4866_v31 = vld [vmem:[%s6655_s11 + $0x14] ss:$8 sps:$4 sm:$0xff]  }
 0x465   : > { %3106 = vmatpush2.bf16.msra.mxu0 %v4387_v38  ;;  %v4891_v38 = vld [vmem:[%s6655_s11 + $0x110] ss:$8 sps:$4 sm:$0xff]  }
 0x466   : > { %3149 = vmatpush2.bf16.msra.mxu1 %v4515_v39  ;;  %3107 = vmatprep.subr.bf16.mxu0 %v4380_v40  ;;  %v4899_v39 = vld [vmem:[%s6655_s11 + $0x104] ss:$8 sps:$4 sm:$0xff]   ;;  %v4870_v40 = vld [vmem:[%s6655_s11] ss:$8 sps:$4 sm:$0xff]  }
 0x467   : > { %3150 = vmatprep.subr.bf16.mxu1 %v4508_v41  ;;  %v4878_v41 = vld [vmem:[%s6655_s11 + $0xf4] ss:$8 sps:$4 sm:$0xff]  }
 0x469   : > { %3108 = vmatpush2.bf16.msra.mxu0 %v4379_v46  ;;  %v4903_v46 = vld [vmem:[%s6655_s11 + $0x1f0] ss:$8 sps:$4 sm:$0xff]  }
 0x46a   : > { %3151 = vmatpush2.bf16.msra.mxu1 %v4507_v47  ;;  %3109 = vmatprep.subr.bf16.mxu0 %v4372_v48  ;;  %v4911_v47 = vld [vmem:[%s6655_s11 + $0x1e4] ss:$8 sps:$4 sm:$0xff]   ;;  %v4882_v48 = vld [vmem:[%s6655_s11 + $0xe0] ss:$8 sps:$4 sm:$0xff]  }
 0x46b   : > { %3152 = vmatprep.subr.bf16.mxu1 %v4500_v49  ;;  %v4890_v49 = vld [vmem:[%s6655_s11 + $0xd4] ss:$8 sps:$4 sm:$0xff]  }
 0x46d   : > { %3110 = vmatpush2.bf16.msra.mxu0 %v4371_v50  ;;  %v4909_v50 = vld [vmem:[%s6655_s11 + $0x1e0] ss:$8 sps:$4 sm:$0xff]  }
 0x46e   : > { %3153 = vmatpush2.bf16.msra.mxu1 %v4499_v51  ;;  %3969 = vmatprep.subr.bf16.mxu0 %v4842_v52  ;;  %v4917_v51 = vld [vmem:[%s6655_s11 + $0x1d4] ss:$8 sps:$4 sm:$0xff]   ;;  %v4888_v52 = vld [vmem:[%s6655_s11 + $0xd0] ss:$8 sps:$4 sm:$0xff]  }
 0x46f   : > { %4012 = vmatprep.subr.bf16.mxu1 %v4857_v53  ;;  %v4896_v53 = vld [vmem:[%s6655_s11 + $0xc4] ss:$8 sps:$4 sm:$0xff]  }
 0x470   : > { %3112 = vmatmul.mubr.bf16.vlgmr.msra.gmra.mxu0 %v5641_v7  ;;  %v6237_v60 = vpop.f32.mrf.mxu0  ;;  %v6239_v61 = vpop.f32.mrf.mxu1  ;;  %v4861_v7 = vld [vmem:[%s6655_s11 + $0x160] ss:$8 sps:$4 sm:$0xff]  }
 0x471   : > { %3155 = vmatmul.mubr.bf16.vlgmr.msra.gmra.mxu1 %v5643_v11  ;;  %3970 = vmatpush1.bf16.msra.mxu0 %v4840_v54  ;;  %v4869_v11 = vld [vmem:[%s6655_s11 + $0x154] ss:$8 sps:$4 sm:$0xff]   ;;  %v4915_v54 = vld [vmem:[%s6655_s11 + $0x1d0] ss:$8 sps:$4 sm:$0xff]  }
 0x472   : > { %v2857_v62 = vpop.f32.mrf.mxu0  ;;  %v2900_v6 = vpop.f32.mrf.mxu1  ;;  %3971 = vmatprep.subr.bf16.mxu0 %v4845_v56  ;;  %4013 = vmatpush1.bf16.msra.mxu1 %v4855_v57  ;;  %v4923_v56 = vld [vmem:[%s6655_s11 + $0x1c4] ss:$8 sps:$4 sm:$0xff]   ;;  %v4894_v57 = vld [vmem:[%s6655_s11 + $0xc0] ss:$8 sps:$4 sm:$0xff]  }
 0x473   : > { %v2858_v0 = vadd.f32 %v2857_v62, %v1508_v58  ;;  %4014 = vmatprep.subr.bf16.mxu1 %v4863_v59  ;;  %v4921_v59 = vld [vmem:[%s6655_s11 + $0x1c0] ss:$8 sps:$4 sm:$0xff]   ;;  %v4900_v62 = vld [vmem:[%s6655_s11 + $0xb0] ss:$8 sps:$4 sm:$0xff]  }
 0x474   : > { %v6254_v1 = vpop.f32.mrf.mxu0  ;;  %v6256_v2 = vpop.f32.mrf.mxu1 }
 0x475   : > { %3972 = vmatpush1.bf16.msra.mxu0 %v4843_v5  ;;  %v2901_v14 = vadd.f32 %v2900_v6, %v2858_v0  ;;  %v4926_v5 = vld [vmem:[%s6655_s11 + $0x1b4] ss:$8 sps:$4 sm:$0xff]   ;;  %v4908_v6 = vld [vmem:[%s6655_s11 + $0xa4] ss:$8 sps:$4 sm:$0xff]   ;;  %v1504_v0 = vrot.slane %v6223_v55, %v5415_v10 }
 0x476   : > { %v2861_v4 = vpop.f32.mrf.mxu0  ;;  %3973 = vmatprep.subr.bf16.mxu0 %v4848_v63  ;;  %4015 = vmatpush1.bf16.msra.mxu1 %v4861_v7  ;;  %v2904_v17 = vpop.f32.mrf.mxu1  ;;  %v4924_v63 = vld [vmem:[%s6655_s11 + $0x1b0] ss:$8 sps:$4 sm:$0xff]   ;;  %v4929_v7 = vld [vmem:[%s6655_s11 + $0x1a4] ss:$8 sps:$4 sm:$0xff]  }
 0x477   : > { %v2862_v15 = vadd.f32 %v2861_v4, %v1508_v58  ;;  %4016 = vmatprep.subr.bf16.mxu1 %v4869_v11  ;;  %v3166_v22 = vmax.f32 %v2901_v14, 0.0  ;;  %v4902_v58 = vld [vmem:[%s6655_s11 + $0xb4] ss:$8 sps:$4 sm:$0xff]   ;;  %v4906_v11 = vld [vmem:[%s6655_s11 + $0xa0] ss:$8 sps:$4 sm:$0xff]   ;;  %v2856_v14 = vadd.f32 %v6237_v60, %v1504_v0 }
 0x478   : > { %v4914_v4 = vld [vmem:[%s6655_s11 + $0x94] ss:$8 sps:$4 sm:$0xff]   ;;  %v4935_v60 = vld [vmem:[%s6655_s11 + $0x184] ss:$8 sps:$4 sm:$0xff]  }
 0x479   : > { %v2905_v18 = vadd.f32 %v2904_v17, %v2862_v15  ;;  %3974 = vmatpush1.bf16.msra.mxu0 %v4846_v3  ;;  %v2860_v3 = vadd.f32 %v6254_v1, %v1504_v0  ;;  %v4912_v1 = vld [vmem:[%s6655_s11 + $0x90] ss:$8 sps:$4 sm:$0xff]  }
 0x47a   : > { %3975 = vmatprep.subr.bf16.mxu0 %v4851_v12  ;;  %4017 = vmatpush1.bf16.msra.mxu1 %v4867_v13  ;;  %v4927_v12 = vld [vmem:[%s6655_s11 + $0x1a0] ss:$8 sps:$4 sm:$0xff]   ;;  %v4932_v13 = vld [vmem:[%s6655_s11 + $0x194] ss:$8 sps:$4 sm:$0xff]   ;;  %v4930_v17 = vld [vmem:[%s6655_s11 + $0x190] ss:$8 sps:$4 sm:$0xff]  }
 0x47b   : > { %v3174_v23 = vmax.f32 %v2905_v18, 0.0  ;;  %4018 = vmatprep.subr.bf16.mxu1 %v4875_v16  ;;  %v2903_v15 = vadd.f32 %v6256_v2, %v2860_v3  ;;  %v4920_v16 = vld [vmem:[%s6655_s11 + $0x84] ss:$8 sps:$4 sm:$0xff]   ;;  %v2899_v18 = vadd.f32 %v6239_v61, %v2856_v14  ;;  %v4918_v2 = vld [vmem:[%s6655_s11 + $0x80] ss:$8 sps:$4 sm:$0xff]  }
 0x47c   : > { %v4986_v61 = vld [vmem:[%s6655_s11 + $0x374] ss:$8 sps:$4 sm:$0xff]   ;;  %v4954_v0 = vld [vmem:[%s6655_s11 + $0x210] ss:$8 sps:$4 sm:$0xff]   ;;  %v4959_v3 = vld [vmem:[%s6655_s11 + $0x204] ss:$8 sps:$4 sm:$0xff]  }
 0x47d   : > { %v3182_v25 = vpack.c.bf16 %v3174_v23, %v3166_v22  ;;  %3976 = vmatpush1.bf16.msra.mxu0 %v4849_v19  ;;  %v3173_v19 = vmax.f32 %v2903_v15, 0.0  ;;  %v3165_v22 = vmax.f32 %v2899_v18, 0.0  ;;  %v4936_v23 = vld [vmem:[%s6655_s11 + $0x270] ss:$8 sps:$4 sm:$0xff]   ;;  %v4962_v14 = vld [vmem:[%s6655_s11 + $0x2f4] ss:$8 sps:$4 sm:$0xff]  }
 0x47e   : > { %3977 = vmatprep.subr.bf16.mxu0 %v4854_v20  ;;  %4019 = vmatpush1.bf16.msra.mxu1 %v4873_v21  ;;  %v4933_v20 = vld [vmem:[%s6655_s11 + $0x180] ss:$8 sps:$4 sm:$0xff]   ;;  %v4938_v21 = vld [vmem:[%s6655_s11 + $0x274] ss:$8 sps:$4 sm:$0xff]   ;;  %v4960_v15 = vld [vmem:[%s6655_s11 + $0x2f0] ss:$8 sps:$4 sm:$0xff]  }
 0x47f   : > { %4001 = vmatprep.mubr.bf16.mxu0 %v3182_v25  ;;  %4020 = vmatprep.subr.bf16.mxu1 %v4881_v24  ;;  %v3181_v24 = vpack.c.bf16 %v3173_v19, %v3165_v22  ;;  %v4941_v25 = vld [vmem:[%s6655_s11 + $0x264] ss:$8 sps:$4 sm:$0xff]   ;;  %v4963_v18 = vld [vmem:[%s6655_s11 + $0x2e0] ss:$8 sps:$4 sm:$0xff]   ;;  %v4968_v19 = vld [vmem:[%s6655_s11 + $0x2d4] ss:$8 sps:$4 sm:$0xff]  }
 0x480   : > { %v4971_v22 = vld [vmem:[%s6655_s11 + $0x2c4] ss:$8 sps:$4 sm:$0xff]  }
 0x481   : > { %3978 = vmatpush1.bf16.msra.mxu0 %v4852_v26  ;;  %v1516_v26 = vrot.slane %v6223_v55, %v819_v34  ;;  %v4944_v34 = vld [vmem:[%s6655_s11 + $0x254] ss:$8 sps:$4 sm:$0xff]  }
 0x482   : > { %3979 = vmatprep.subr.bf16.mxu0 %v4860_v27  ;;  %4021 = vmatpush1.bf16.msra.mxu1 %v4879_v28  ;;  %v1512_v27 = vrot.slane %v6223_v55, %v815_v35 }
 0x483   : > { %4022 = vmatprep.subr.bf16.mxu1 %v4887_v29 }
 0x485   : > { %3980 = vmatpush1.bf16.msra.mxu0 %v4858_v30  ;;  %v4939_v30 = vld [vmem:[%s6655_s11 + $0x260] ss:$8 sps:$4 sm:$0xff]  }
 0x486   : > { %3981 = vmatprep.subr.bf16.mxu0 %v4866_v31  ;;  %4023 = vmatpush1.bf16.msra.mxu1 %v4885_v32 }
 0x487   : > { %4024 = vmatprep.subr.bf16.mxu1 %v4893_v33 }
 0x489   : > { %3982 = vmatpush1.bf16.msra.mxu0 %v4864_v36 }
 0x48a   : > { %3983 = vmatprep.subr.bf16.mxu0 %v4872_v37  ;;  %4025 = vmatpush1.bf16.msra.mxu1 %v4891_v38 }
 0x48b   : > { %4026 = vmatprep.subr.bf16.mxu1 %v4899_v39  ;;  %v4942_v39 = vld [vmem:[%s6655_s11 + $0x250] ss:$8 sps:$4 sm:$0xff]  }
 0x48d   : > { %3984 = vmatpush1.bf16.msra.mxu0 %v4870_v40 }
 0x48e   : > { %3985 = vmatprep.subr.bf16.mxu0 %v4878_v41  ;;  %4027 = vmatpush1.bf16.msra.mxu1 %v4897_v42  ;;  %v4947_v41 = vld [vmem:[%s6655_s11 + $0x244] ss:$8 sps:$4 sm:$0xff]  }
 0x48f   : > { %4028 = vmatprep.subr.bf16.mxu1 %v4905_v43 }
 0x491   : > { %3986 = vmatpush2.bf16.msra.mxu0 %v4876_v44 }
 0x492   : > { %3987 = vmatprep.subr.bf16.mxu0 %v4884_v45  ;;  %4029 = vmatpush2.bf16.msra.mxu1 %v4903_v46 }
 0x493   : > { %4030 = vmatprep.subr.bf16.mxu1 %v4911_v47 }
 0x495   : > { %3988 = vmatpush2.bf16.msra.mxu0 %v4882_v48  ;;  %v4945_v48 = vld [vmem:[%s6655_s11 + $0x240] ss:$8 sps:$4 sm:$0xff]  }
 0x496   : > { %3989 = vmatprep.subr.bf16.mxu0 %v4890_v49  ;;  %4031 = vmatpush2.bf16.msra.mxu1 %v4909_v50  ;;  %v4950_v50 = vld [vmem:[%s6655_s11 + $0x234] ss:$8 sps:$4 sm:$0xff]  }
 0x497   : > { %4032 = vmatprep.subr.bf16.mxu1 %v4917_v51 }
 0x499   : > { %3990 = vmatpush2.bf16.msra.mxu0 %v4888_v52 }
 0x49a   : > { %3991 = vmatprep.subr.bf16.mxu0 %v4896_v53  ;;  %4033 = vmatpush2.bf16.msra.mxu1 %v4915_v54 }
 0x49b   : > { %4034 = vmatprep.subr.bf16.mxu1 %v4923_v56  ;;  %v4948_v56 = vld [vmem:[%s6655_s11 + $0x230] ss:$8 sps:$4 sm:$0xff]  }
 0x49d   : > { %3992 = vmatpush2.bf16.msra.mxu0 %v4894_v57  ;;  %v4984_v57 = vld [vmem:[%s6655_s11 + $0x370] ss:$8 sps:$4 sm:$0xff]  }
 0x49e   : > { %3993 = vmatprep.subr.bf16.mxu0 %v4902_v58  ;;  %4035 = vmatpush2.bf16.msra.mxu1 %v4921_v59  ;;  %v4953_v59 = vld [vmem:[%s6655_s11 + $0x224] ss:$8 sps:$4 sm:$0xff]  }
 0x49f   : > { %4036 = vmatprep.subr.bf16.mxu1 %v4926_v5  ;;  %v4989_v5 = vld [vmem:[%s6655_s11 + $0x364] ss:$8 sps:$4 sm:$0xff]  }
 0x4a1   : > { %3994 = vmatpush2.bf16.msra.mxu0 %v4900_v62  ;;  %v4951_v62 = vld [vmem:[%s6655_s11 + $0x220] ss:$8 sps:$4 sm:$0xff]  }
 0x4a2   : > { %3995 = vmatprep.subr.bf16.mxu0 %v4908_v6  ;;  %4037 = vmatpush2.bf16.msra.mxu1 %v4924_v63  ;;  %v4987_v6 = vld [vmem:[%s6655_s11 + $0x360] ss:$8 sps:$4 sm:$0xff]   ;;  %v4956_v63 = vld [vmem:[%s6655_s11 + $0x214] ss:$8 sps:$4 sm:$0xff]  }
 0x4a3   : > { %4038 = vmatprep.subr.bf16.mxu1 %v4929_v7  ;;  %v4992_v7 = vld [vmem:[%s6655_s11 + $0x354] ss:$8 sps:$4 sm:$0xff]  }
 0x4a5   : > { %3996 = vmatpush2.bf16.msra.mxu0 %v4906_v11  ;;  %v4990_v11 = vld [vmem:[%s6655_s11 + $0x350] ss:$8 sps:$4 sm:$0xff]  }
 0x4a6   : > { %3997 = vmatprep.subr.bf16.mxu0 %v4914_v4  ;;  %4039 = vmatpush2.bf16.msra.mxu1 %v4927_v12  ;;  %v4995_v4 = vld [vmem:[%s6655_s11 + $0x344] ss:$8 sps:$4 sm:$0xff]   ;;  %v4957_v12 = vld [vmem:[%s6655_s11 + $0x200] ss:$8 sps:$4 sm:$0xff]  }
 0x4a7   : > { %4040 = vmatprep.subr.bf16.mxu1 %v4932_v13  ;;  %v4993_v13 = vld [vmem:[%s6655_s11 + $0x340] ss:$8 sps:$4 sm:$0xff]  }
 0x4a9   : > { %3998 = vmatpush2.bf16.msra.mxu0 %v4912_v1  ;;  %v4998_v1 = vld [vmem:[%s6655_s11 + $0x334] ss:$8 sps:$4 sm:$0xff]  }
 0x4aa   : > { %3999 = vmatprep.subr.bf16.mxu0 %v4920_v16  ;;  %4041 = vmatpush2.bf16.msra.mxu1 %v4930_v17  ;;  %v4996_v16 = vld [vmem:[%s6655_s11 + $0x330] ss:$8 sps:$4 sm:$0xff]   ;;  %v4965_v17 = vld [vmem:[%s6655_s11 + $0x2e4] ss:$8 sps:$4 sm:$0xff]  }
 0x4ab   : > { %4042 = vmatprep.subr.bf16.mxu1 %v4935_v60  ;;  %v5001_v60 = vld [vmem:[%s6655_s11 + $0x324] ss:$8 sps:$4 sm:$0xff]  }
 0x4ad   : > { %4000 = vmatpush2.bf16.msra.mxu0 %v4918_v2  ;;  %v4999_v2 = vld [vmem:[%s6655_s11 + $0x320] ss:$8 sps:$4 sm:$0xff]  }
 0x4ae   : > { %4043 = vmatpush2.bf16.msra.mxu1 %v4933_v20  ;;  %4055 = vmatprep.subr.bf16.mxu0 %v4938_v21  ;;  %v5004_v20 = vld [vmem:[%s6655_s11 + $0x314] ss:$8 sps:$4 sm:$0xff]   ;;  %v4966_v21 = vld [vmem:[%s6655_s11 + $0x2d0] ss:$8 sps:$4 sm:$0xff]  }
 0x4af   : > { %4098 = vmatprep.subr.bf16.mxu1 %v4986_v61  ;;  %v5002_v61 = vld [vmem:[%s6655_s11 + $0x310] ss:$8 sps:$4 sm:$0xff]  }
 0x4b0   : > { %v2941_v28 = vpop.f32.mrf.mxu0  ;;  %v2984_v29 = vpop.f32.mrf.mxu1  ;;  %4002 = vmatmul.mubr.bf16.vlgmr.msra.gmra.mxu0 %v3181_v24  ;;  %v4969_v24 = vld [vmem:[%s6655_s11 + $0x2c0] ss:$8 sps:$4 sm:$0xff]  }
 0x4b1   : > { %4056 = vmatpush1.bf16.msra.mxu0 %v4936_v23  ;;  %v2942_v36 = vadd.f32 %v2941_v28, %v1512_v27  ;;  %v5007_v23 = vld [vmem:[%s6655_s11 + $0x304] ss:$8 sps:$4 sm:$0xff]   ;;  %v4972_v28 = vld [vmem:[%s6655_s11 + $0x2b0] ss:$8 sps:$4 sm:$0xff]  }
 0x4b2   : > { %v2943_v31 = vpop.f32.mrf.mxu0  ;;  %v2986_v32 = vpop.f32.mrf.mxu1  ;;  %4057 = vmatprep.subr.bf16.mxu0 %v4941_v25  ;;  %v5005_v25 = vld [vmem:[%s6655_s11 + $0x300] ss:$8 sps:$4 sm:$0xff]  }
 0x4b3   : > { %v2944_v33 = vadd.f32 %v2943_v31, %v1516_v26  ;;  %v2985_v45 = vadd.f32 %v2984_v29, %v2942_v36  ;;  %v5008_v29 = vld [vmem:[%s6655_s11 + $0x3f0] ss:$8 sps:$4 sm:$0xff]   ;;  %v5013_v31 = vld [vmem:[%s6655_s11 + $0x3e4] ss:$8 sps:$4 sm:$0xff]   ;;  %v5016_v36 = vld [vmem:[%s6655_s11 + $0x3d4] ss:$8 sps:$4 sm:$0xff]  }
 0x4b4   : > { %v2945_v37 = vpop.f32.mrf.mxu0  ;;  %v2988_v38 = vpop.f32.mrf.mxu1 }
 0x4b5   : > { %v2946_v35 = vadd.f32 %v2945_v37, %v1512_v27  ;;  %4058 = vmatpush1.bf16.msra.mxu0 %v4939_v30  ;;  %v2987_v42 = vadd.f32 %v2986_v32, %v2944_v33  ;;  %v3167_v53 = vmax.f32 %v2985_v45, 0.0  ;;  %v5010_v27 = vld [vmem:[%s6655_s11 + $0x3f4] ss:$8 sps:$4 sm:$0xff]   ;;  %v4977_v30 = vld [vmem:[%s6655_s11 + $0x2a4] ss:$8 sps:$4 sm:$0xff]  }
 0x4b6   : > { %v2947_v40 = vpop.f32.mrf.mxu0  ;;  %4059 = vmatprep.subr.bf16.mxu0 %v4944_v34  ;;  %v2990_v46 = vpop.f32.mrf.mxu1  ;;  %v4975_v32 = vld [vmem:[%s6655_s11 + $0x2a0] ss:$8 sps:$4 sm:$0xff]   ;;  %v4980_v33 = vld [vmem:[%s6655_s11 + $0x294] ss:$8 sps:$4 sm:$0xff]   ;;  %v4978_v37 = vld [vmem:[%s6655_s11 + $0x290] ss:$8 sps:$4 sm:$0xff]  }
 0x4b7   : > { %v2989_v43 = vadd.f32 %v2988_v38, %v2946_v35  ;;  %v2948_v44 = vadd.f32 %v2947_v40, %v1516_v26  ;;  %v3168_v51 = vmax.f32 %v2987_v42, 0.0  ;;  %v4974_v26 = vld [vmem:[%s6655_s11 + $0x2b4] ss:$8 sps:$4 sm:$0xff]   ;;  %v5011_v34 = vld [vmem:[%s6655_s11 + $0x3e0] ss:$8 sps:$4 sm:$0xff]  }
 0x4b8   : > { %v5014_v38 = vld [vmem:[%s6655_s11 + $0x3d0] ss:$8 sps:$4 sm:$0xff]   ;;  %v4983_v35 = vld [vmem:[%s6655_s11 + $0x284] ss:$8 sps:$4 sm:$0xff]   ;;  %v4981_v40 = vld [vmem:[%s6655_s11 + $0x280] ss:$8 sps:$4 sm:$0xff]  }
 0x4b9   : > { %v2991_v47 = vadd.f32 %v2990_v46, %v2948_v44  ;;  %4060 = vmatpush1.bf16.msra.mxu0 %v4942_v39  ;;  %v3175_v49 = vmax.f32 %v2989_v43, 0.0  ;;  %v5019_v39 = vld [vmem:[%s6655_s11 + $0x3c4] ss:$8 sps:$4 sm:$0xff]   ;;  %v5022_v42 = vld [vmem:[%s6655_s11 + $0x3b4] ss:$8 sps:$4 sm:$0xff]   ;;  %v1523_v43 = vsub.s32 5, %v5409_v8 }
 0x4ba   : > { %4061 = vmatprep.subr.bf16.mxu0 %v4947_v41  ;;  %v5017_v41 = vld [vmem:[%s6655_s11 + $0x3c0] ss:$8 sps:$4 sm:$0xff]   ;;  %v1519_v44 = vsub.s32 4, %v5409_v8  ;;  %v5020_v45 = vld [vmem:[%s6655_s11 + $0x3b0] ss:$8 sps:$4 sm:$0xff]  }
 0x4bb   : > { %v3176_v52 = vmax.f32 %v2991_v47, 0.0  ;;  %v3183_v58 = vpack.c.bf16 %v3175_v49, %v3167_v53  ;;  %v5025_v46 = vld [vmem:[%s6655_s11 + $0x3a4] ss:$8 sps:$4 sm:$0xff]   ;;  %v1524_v47 = vrot.slane %v6223_v55, %v1523_v43  ;;  %v5028_v53 = vld [vmem:[%s6655_s11 + $0x394] ss:$8 sps:$4 sm:$0xff]  }
 0x4bd   : > { %v3184_v54 = vpack.c.bf16 %v3176_v52, %v3168_v51  ;;  %4062 = vmatpush1.bf16.msra.mxu0 %v4945_v48  ;;  %v1520_v48 = vrot.slane %v6223_v55, %v1519_v44  ;;  %v5023_v51 = vld [vmem:[%s6655_s11 + $0x3a0] ss:$8 sps:$4 sm:$0xff]  }
 0x4be   : > { %4063 = vmatprep.subr.bf16.mxu0 %v4950_v50  ;;  %v3317_v44 = vld [vmem:[%s6656_s12] sm:$0x3] }
 0x4bf   : > { %4044 = vmatprep.mubr.bf16.mxu1 %v3184_v54 }
 0x4c0   : > { %4045 = vmatmul.mubr.bf16.vlgmr.msra.gmra.mxu1 %v3183_v58 }
 0x4c1   : > { %4064 = vmatpush1.bf16.msra.mxu0 %v4948_v56  ;;  %4099 = vmatpush1.bf16.msra.mxu1 %v4984_v57 }
 0x4c2   : > { %4065 = vmatprep.subr.bf16.mxu0 %v4953_v59  ;;  %4100 = vmatprep.subr.bf16.mxu1 %v4989_v5 }
 0x4c5   : > { %4066 = vmatpush1.bf16.msra.mxu0 %v4951_v62  ;;  %4101 = vmatpush1.bf16.msra.mxu1 %v4987_v6  ;;  %v5026_v62 = vld [vmem:[%s6655_s11 + $0x390] ss:$8 sps:$4 sm:$0xff]  }
 0x4c6   : > { %4067 = vmatprep.subr.bf16.mxu0 %v4956_v63  ;;  %4102 = vmatprep.subr.bf16.mxu1 %v4992_v7  ;;  %v5031_v63 = vld [vmem:[%s6655_s11 + $0x384] ss:$8 sps:$4 sm:$0xff]  }
 0x4c9   : > { %4068 = vmatpush1.bf16.msra.mxu0 %v4954_v0  ;;  %4103 = vmatpush1.bf16.msra.mxu1 %v4990_v11 }
 0x4ca   : > { %4069 = vmatprep.subr.bf16.mxu0 %v4959_v3  ;;  %4104 = vmatprep.subr.bf16.mxu1 %v4995_v4 }
 0x4cd   : > { %4070 = vmatpush1.bf16.msra.mxu0 %v4957_v12  ;;  %4105 = vmatpush1.bf16.msra.mxu1 %v4993_v13  ;;  %v5029_v13 = vld [vmem:[%s6655_s11 + $0x380] ss:$8 sps:$4 sm:$0xff]  }
 0x4ce   : > { %4071 = vmatprep.subr.bf16.mxu0 %v4962_v14  ;;  %4106 = vmatprep.subr.bf16.mxu1 %v4998_v1 }
 0x4d1   : > { %4072 = vmatpush2.bf16.msra.mxu0 %v4960_v15  ;;  %4107 = vmatpush1.bf16.msra.mxu1 %v4996_v16 }
 0x4d2   : > { %4073 = vmatprep.subr.bf16.mxu0 %v4965_v17  ;;  %4108 = vmatprep.subr.bf16.mxu1 %v5001_v60 }
 0x4d5   : > { %4074 = vmatpush2.bf16.msra.mxu0 %v4963_v18  ;;  %4109 = vmatpush1.bf16.msra.mxu1 %v4999_v2  ;;  %v1531_v18 = vsub.s32 7, %v5409_v8  ;;  %v1527_v2 = vsub.s32 6, %v5409_v8 }
 0x4d6   : > { %4075 = vmatprep.subr.bf16.mxu0 %v4968_v19  ;;  %4110 = vmatprep.subr.bf16.mxu1 %v5004_v20 }
 0x4d7   : > { %v1532_v19 = vrot.slane %v6223_v55, %v1531_v18  ;;  %v1528_v20 = vrot.slane %v6223_v55, %v1527_v2 }
 0x4d9   : > { %4076 = vmatpush2.bf16.msra.mxu0 %v4966_v21  ;;  %4111 = vmatpush1.bf16.msra.mxu1 %v5002_v61 }
 0x4da   : > { %4077 = vmatprep.subr.bf16.mxu0 %v4971_v22  ;;  %4112 = vmatprep.subr.bf16.mxu1 %v5007_v23 }
 0x4dd   : > { %4078 = vmatpush2.bf16.msra.mxu0 %v4969_v24  ;;  %4113 = vmatpush1.bf16.msra.mxu1 %v5005_v25 }
 0x4de   : > { %4079 = vmatprep.subr.bf16.mxu0 %v4974_v26  ;;  %4114 = vmatprep.subr.bf16.mxu1 %v5010_v27 }
 0x4e1   : > { %4080 = vmatpush2.bf16.msra.mxu0 %v4972_v28  ;;  %4115 = vmatpush2.bf16.msra.mxu1 %v5008_v29 }
 0x4e2   : > { %4081 = vmatprep.subr.bf16.mxu0 %v4977_v30  ;;  %4116 = vmatprep.subr.bf16.mxu1 %v5013_v31 }
 0x4e5   : > { %4082 = vmatpush2.bf16.msra.mxu0 %v4975_v32  ;;  %4117 = vmatpush2.bf16.msra.mxu1 %v5011_v34 }
 0x4e6   : > { %4083 = vmatprep.subr.bf16.mxu0 %v4980_v33  ;;  %4118 = vmatprep.subr.bf16.mxu1 %v5016_v36 }
 0x4e9   : > { %4084 = vmatpush2.bf16.msra.mxu0 %v4978_v37  ;;  %4119 = vmatpush2.bf16.msra.mxu1 %v5014_v38 }
 0x4ea   : > { %4085 = vmatprep.subr.bf16.mxu0 %v4983_v35  ;;  %4120 = vmatprep.subr.bf16.mxu1 %v5019_v39 }
 0x4ed   : > { %4086 = vmatpush2.bf16.msra.mxu0 %v4981_v40  ;;  %4121 = vmatpush2.bf16.msra.mxu1 %v5017_v41 }
 0x4ee   : > { %4122 = vmatprep.subr.bf16.mxu1 %v5022_v42 }
 0x4f0   : > { %v3027_v49 = vpop.f32.mrf.mxu0 }
 0x4f1   : > { %v3070_v50 = vpop.f32.mrf.mxu1  ;;  %4123 = vmatpush2.bf16.msra.mxu1 %v5020_v45  ;;  %v3028_v57 = vadd.f32 %v3027_v49, %v1520_v48  ;;  %v3326_v49 = vrot.slane %v3317_v44, %v5412_v9 }
 0x4f2   : > { %v3029_v52 = vpop.f32.mrf.mxu0  ;;  %4124 = vmatprep.subr.bf16.mxu1 %v5025_v46 }
 0x4f3   : > { %v3030_v54 = vadd.f32 %v3029_v52, %v1524_v47  ;;  %v3072_v56 = vpop.f32.mrf.mxu1  ;;  %v3071_v3 = vadd.f32 %v3070_v50, %v3028_v57 }
 0x4f4   : > { %v3031_v58 = vpop.f32.mrf.mxu0 }
 0x4f5   : > { %v3032_v59 = vadd.f32 %v3031_v58, %v1520_v48  ;;  %v3074_v5 = vpop.f32.mrf.mxu1  ;;  %4125 = vmatpush2.bf16.msra.mxu1 %v5023_v51  ;;  %v3073_v7 = vadd.f32 %v3072_v56, %v3030_v54  ;;  %v3169_v16 = vmax.f32 %v3071_v3, 0.0  ;;  %v3322_v48 = vrot.slane %v3317_v44, %v5415_v10 }
 0x4f6   : > { %v3033_v6 = vpop.f32.mrf.mxu0  ;;  %4126 = vmatprep.subr.bf16.mxu1 %v5028_v53 }
 0x4f7   : > { %v3075_v0 = vadd.f32 %v3074_v5, %v3032_v59  ;;  %v3034_v11 = vadd.f32 %v3033_v6, %v1524_v47  ;;  %v3076_v4 = vpop.f32.mrf.mxu1  ;;  %v3170_v1 = vmax.f32 %v3073_v7, 0.0 }
 0x4f9   : > { %v3077_v12 = vadd.f32 %v3076_v4, %v3034_v11  ;;  %4127 = vmatpush2.bf16.msra.mxu1 %v5026_v62  ;;  %v3177_v14 = vmax.f32 %v3075_v0, 0.0 }
 0x4fa   : > { %4128 = vmatprep.subr.bf16.mxu1 %v5031_v63 }
 0x4fb   : > { %v3178_v15 = vmax.f32 %v3077_v12, 0.0  ;;  %v3185_v60 = vpack.c.bf16 %v3177_v14, %v3169_v16 }
 0x4fd   : > { %v3186_v17 = vpack.c.bf16 %v3178_v15, %v3170_v1  ;;  %4129 = vmatpush2.bf16.msra.mxu1 %v5029_v13 }
 0x4ff   : > { %4087 = vmatprep.mubr.bf16.mxu0 %v3186_v17 }
 0x500   : > { %4088 = vmatmul.mubr.bf16.vlgmr.msra.gmra.mxu0 %v3185_v60 }
 0x530   : > { %v3113_v21 = vpop.f32.mrf.mxu0 }
 0x531   : > { %v3156_v61 = vpop.f32.mrf.mxu1  ;;  %v3114_v25 = vadd.f32 %v3113_v21, %v1528_v20 }
 0x532   : > { %v3115_v22 = vpop.f32.mrf.mxu0 }
 0x533   : > { %v3116_v23 = vadd.f32 %v3115_v22, %v1532_v19  ;;  %v3158_v24 = vpop.f32.mrf.mxu1  ;;  %v3157_v34 = vadd.f32 %v3156_v61, %v3114_v25 }
 0x534   : > { %v3117_v26 = vpop.f32.mrf.mxu0 }
 0x535   : > { %v3118_v27 = vadd.f32 %v3117_v26, %v1528_v20  ;;  %v3160_v28 = vpop.f32.mrf.mxu1  ;;  %v3159_v30 = vadd.f32 %v3158_v24, %v3116_v23  ;;  %v3171_v55 = vmax.f32 %v3157_v34, 0.0 }
 0x536   : > { %v3119_v29 = vpop.f32.mrf.mxu0 }
 0x537   : > { %v3161_v31 = vadd.f32 %v3160_v28, %v3118_v27  ;;  %v3120_v32 = vadd.f32 %v3119_v29, %v1532_v19  ;;  %v3162_v33 = vpop.f32.mrf.mxu1  ;;  %v3172_v37 = vmax.f32 %v3159_v30, 0.0 }
 0x539   : > { %v3163_v8 = vadd.f32 %v3162_v33, %v3120_v32  ;;  %v3179_v36 = vmax.f32 %v3161_v31, 0.0 }
 0x53b   : > { %v3180_v38 = vmax.f32 %v3163_v8, 0.0  ;;  %v3187_v39 = vpack.c.bf16 %v3179_v36, %v3171_v55 }
 0x53d   : > { %v3188_v35 = vpack.c.bf16 %v3180_v38, %v3172_v37 }
 0x53f   : > { %4130 = vmatprep.mubr.bf16.mxu1 %v3188_v35 }
 0x540   : > { %4131 = vmatmul.mubr.bf16.vlgmr.msra.gmra.mxu1 %v3187_v39 }
 0x570   : > { %v4003_v40 = vpop.f32.mrf.mxu0 }
 0x571   : > { %v4004_v52 = vadd.f32 %v4003_v40, %v3322_v48 }
 0x572   : > { %v4005_v41 = vpop.f32.mrf.mxu0 }
 0x573   : > { %v4006_v53 = vadd.f32 %v4005_v41, %v3326_v49 }
 0x574   : > { %v4007_v42 = vpop.f32.mrf.mxu0 }
 0x575   : > { %v4008_v58 = vadd.f32 %v4007_v42, %v3322_v48 }
 0x576   : > { %v4009_v45 = vpop.f32.mrf.mxu0 }
 0x577   : > { %v4010_v6 = vadd.f32 %v4009_v45, %v3326_v49 }
 0x580   : > { %v4046_v43 = vpop.f32.mrf.mxu1 }
 0x581   : > { %v4047_v54 = vadd.f32 %v4046_v43, %v4004_v52 }
 0x582   : > { %v4048_v46 = vpop.f32.mrf.mxu1 }
 0x583   : > { %v4049_v59 = vadd.f32 %v4048_v46, %v4006_v53 }
 0x584   : > { %v4050_v50 = vpop.f32.mrf.mxu1 }
 0x585   : > { %v4051_v10 = vadd.f32 %v4050_v50, %v4008_v58 }
 0x586   : > { %v4052_v56 = vpop.f32.mrf.mxu1 }
 0x587   : > { %v4053_v11 = vadd.f32 %v4052_v56, %v4010_v6 }
 0x5c0   : > { %v4089_v47 = vpop.f32.mrf.mxu0 }
 0x5c1   : > { %v4090_v5 = vadd.f32 %v4089_v47, %v4047_v54 }
 0x5c2   : > { %v4091_v51 = vpop.f32.mrf.mxu0 }
 0x5c3   : > { %v4092_v63 = vadd.f32 %v4091_v51, %v4049_v59 }
 0x5c4   : > { %v4093_v57 = vpop.f32.mrf.mxu0 }
 0x5c5   : > { %v4094_v3 = vadd.f32 %v4093_v57, %v4051_v10 }
 0x5c6   : > { %v4095_v7 = vpop.f32.mrf.mxu0 }
 0x5c7   : > { %v4096_v13 = vadd.f32 %v4095_v7, %v4053_v11 }
 0x600   : > { %v4132_v62 = vpop.f32.mrf.mxu1 }
 0x601   : > { %v4133_v9 = vadd.f32 %v4132_v62, %v4090_v5 }
 0x602   : > { %v4134_v0 = vpop.f32.mrf.mxu1 }
 0x603   : > { %4141 = vst [vmem:[%s444_s23] sm:$0xff] %v4133_v9  ;;  %v4135_v4 = vadd.f32 %v4134_v0, %v4092_v63 }
 0x604   : > { %v4136_v12 = vpop.f32.mrf.mxu1 }
 0x605   : > { %4142 = vst [vmem:[%s444_s23 + $0x8] sm:$0xff] %v4135_v4  ;;  %v4137_v14 = vadd.f32 %v4136_v12, %v4094_v3 }
 0x606   : > { %v4138_v1 = vpop.f32.mrf.mxu1 }
 0x607   : > { %4143 = vst [vmem:[%s444_s23 + $0x10] sm:$0xff] %v4137_v14  ;;  %v4139_v15 = vadd.f32 %v4138_v1, %v4096_v13 }
 0x609   : > { %4144 = vst [vmem:[%s444_s23 + $0x18] sm:$0xff] %v4139_v15 }
 0x60a PF: > { %s23_s25 = sadd.s32 1, %s5042_s25  }
 0x60b   : > { %p20_p4 = scmp.ge.s32.totalorder %s23_s25, 4  }
 0x60d   :  { %22 = sbr.rel (!%p20_p4) target bundleno = 1 (0x1), region = 102 }

</bundles_post_ra>
